<compile_context>
chip_gen: v7x
topology: tpu7x:2x2x1
jax: 0.10.0
libtpu: 0.0.40
codegen_flags: <defaults>
</compile_context>

<pallas_src>
import functools

import jax
import jax.numpy as jnp
from jax.experimental import pallas as pl
from jax.experimental.pallas import tpu as pltpu
import numpy as np

INPUT_SIZE = 5      # len(features)
HIDDEN_SIZE = 50
NUM_LAYERS = 2
OUTPUT_SIZE = 1

GATE_PAD = 128      # lanes per gate slot (i, f, g, o each own one 128-lane slot)
SUBLANE = 8         # sublane granularity; also the per-grid-step batch tile
D_PAD = 8           # input features padded 5 -> 8
TB = SUBLANE        # batch tile (rows per grid step)


def wear_lstm_kernel(x_ref, wih0_ref, wrec_ref, b0_ref,
                     wih1_ref, b1_ref, wfc_ref, bfc_ref,
                     out_ref, xp_scr, *, T):
    """One batch tile: 2 LSTM layers over all timesteps + fc + sigmoid, all in VMEM.

    x_ref   : (1, T*TB, D_PAD)        rows grouped time-major within this batch tile
    wih0_ref: (D_PAD, 4*GATE_PAD)     gate g lives in lanes [g*128 : g*128+H], rest zero
    wrec_ref: (2*GATE_PAD, 8*GATE_PAD) block-diag: [whh0 | 0 ; 0 | whh1], lane-aligned gates
    b0_ref  : (1, 4*GATE_PAD)         b_ih0 + b_hh0, lane-padded
    wih1_ref: (GATE_PAD, 4*GATE_PAD)
    b1_ref  : (1, 4*GATE_PAD)         b_ih1 + b_hh1
    wfc_ref : (1, GATE_PAD)
    bfc_ref : (1, 1)
    out_ref : (TB, 1)
    xp_scr  : (T*TB, 4*GATE_PAD) VMEM scratch for the hoisted layer-0 projection
    """
    # Layer-0 input projection hoisted out of the recurrence; result lives in a VMEM
    # scratch ref so only one (TB, 512) slice is live per step of the unrolled loop.
    xp_scr[...] = (jnp.dot(x_ref[0], wih0_ref[...],
                           preferred_element_type=jnp.float32) + b0_ref[...])

    def gates_to_hc(g, c):
        # PyTorch gate order [i, f, g, o]; each gate is a full 128-lane slot.
        i = jax.nn.sigmoid(g[:, 0:GATE_PAD])
        f = jax.nn.sigmoid(g[:, GATE_PAD:2 * GATE_PAD])
        gg = jnp.tanh(g[:, 2 * GATE_PAD:3 * GATE_PAD])
        o = jax.nn.sigmoid(g[:, 3 * GATE_PAD:4 * GATE_PAD])
        c_new = f * c + i * gg
        h_new = o * jnp.tanh(c_new)
        # pad lanes: pre-activation 0 -> i=f=o=0.5, g=0 -> c_pad, h_pad stay exactly 0.
        return h_new, c_new

    h0 = jnp.zeros((TB, GATE_PAD), jnp.float32)
    c0 = jnp.zeros((TB, GATE_PAD), jnp.float32)
    h1 = jnp.zeros((TB, GATE_PAD), jnp.float32)
    c1 = jnp.zeros((TB, GATE_PAD), jnp.float32)

    # Fully unrolled time loop (T static and small).
    for t in range(T):
        # Single fused recurrent matmul (K=256 fills the MXU); depends only on the
        # previous-step carries, so it issues before any of this step's EUP work.
        h_cat = jnp.concatenate([h0, h1], axis=-1)                    # (TB, 256)
        rec = jnp.dot(h_cat, wrec_ref[...],
                      preferred_element_type=jnp.float32)             # (TB, 1024)

        g0 = xp_scr[pl.ds(t * TB, TB), :] + rec[:, :4 * GATE_PAD]     # static slice
        h0, c0 = gates_to_hc(g0, c0)

        g1 = (jnp.dot(h0, wih1_ref[...], preferred_element_type=jnp.float32)
              + rec[:, 4 * GATE_PAD:] + b1_ref[...])
        h1, c1 = gates_to_hc(g1, c1)

    # fc(last hidden) as VPU broadcast-multiply + lane reduce (skip an N=1 MXU matmul).
    logits = jnp.sum(h1 * wfc_ref[...], axis=-1, keepdims=True) + bfc_ref[...]
    out_ref[...] = jax.nn.sigmoid(logits)


def _pack_gate_matrix(w, in_pad, hidden):
    """PyTorch (4H, in) weight -> (in_pad, 4*GATE_PAD), each gate lane-aligned to 128."""
    in_dim = w.shape[1]
    parts = []
    for g in range(4):
        blk = jnp.zeros((in_pad, GATE_PAD), jnp.float32)
        blk = blk.at[:in_dim, :hidden].set(
            w[g * hidden:(g + 1) * hidden, :].T.astype(jnp.float32))
        parts.append(blk)
    return jnp.concatenate(parts, axis=1)


def _pack_block_diag_rec(whh0, whh1, hidden):
    """Block-diagonal recurrent weight: (2*GATE_PAD, 8*GATE_PAD) = blkdiag(whh0, whh1)."""
    w0 = _pack_gate_matrix(whh0, GATE_PAD, hidden)      # (128, 512)
    w1 = _pack_gate_matrix(whh1, GATE_PAD, hidden)      # (128, 512)
    top = jnp.concatenate([w0, jnp.zeros_like(w1)], axis=1)   # (128, 1024)
    bot = jnp.concatenate([jnp.zeros_like(w0), w1], axis=1)   # (128, 1024)
    return jnp.concatenate([top, bot], axis=0)                # (256, 1024)


def _pack_gate_bias(bih, bhh, hidden):
    """(4H,) + (4H,) combined bias -> (1, 4*GATE_PAD), lane-aligned per gate."""
    b = (bih + bhh).astype(jnp.float32)
    parts = []
    for g in range(4):
        blk = jnp.zeros((1, GATE_PAD), jnp.float32)
        blk = blk.at[0, :hidden].set(b[g * hidden:(g + 1) * hidden])
        parts.append(blk)
    return jnp.concatenate(parts, axis=1)


def wear_lstm_forward(x, params):
    """x: (B, T, D) float32 (PyTorch batch_first). Returns (B, 1) sigmoid output."""
    (wih0, whh0, bih0, bhh0, wih1, whh1, bih1, bhh1, wfc, bfc) = params
    B, T, D = x.shape
    H = HIDDEN_SIZE
    B_pad = ((B + TB - 1) // TB) * TB
    nbt = B_pad // TB

    # time-major, pad batch to TB multiple and features to 8, then group by batch tile:
    # x_g[bt, t*TB + j, :] = x[bt*TB + j, t, :]   (rows time-major inside each tile)
    x_tm = jnp.transpose(x, (1, 0, 2)).astype(jnp.float32)               # (T, B, D)
    x_tm = jnp.pad(x_tm, ((0, 0), (0, B_pad - B), (0, D_PAD - D)))       # (T, B_pad, D_PAD)
    x_g = (x_tm.reshape(T, nbt, TB, D_PAD)
                .transpose(1, 0, 2, 3)
                .reshape(nbt, T * TB, D_PAD))                            # (nbt, T*TB, D_PAD)

    wfc_row = jnp.zeros((1, GATE_PAD), jnp.float32).at[0, :H].set(
        wfc.reshape(-1).astype(jnp.float32))

    args = (
        x_g,
        _pack_gate_matrix(wih0, D_PAD, H),
        _pack_block_diag_rec(whh0, whh1, H),
        _pack_gate_bias(bih0, bhh0, H),
        _pack_gate_matrix(wih1, GATE_PAD, H),
        _pack_gate_bias(bih1, bhh1, H),
        wfc_row,
        bfc.reshape(1, 1).astype(jnp.float32),
    )

    def full_spec(a):
        nd = a.ndim
        return pl.BlockSpec(a.shape, lambda b, _nd=nd: (0,) * _nd)

    in_specs = [pl.BlockSpec((1, T * TB, D_PAD), lambda b: (b, 0, 0))]
    in_specs += [full_spec(a) for a in args[1:]]
    out_specs = pl.BlockSpec((TB, OUTPUT_SIZE), lambda b: (b, 0))

    kernel = functools.partial(wear_lstm_kernel, T=T)
    out_pad = pl.pallas_call(
        kernel,
        out_shape=jax.ShapeDtypeStruct((B_pad, OUTPUT_SIZE), jnp.float32),
        grid=(nbt,),
        in_specs=in_specs,
        out_specs=out_specs,
        scratch_shapes=[pltpu.VMEM((T * TB, 4 * GATE_PAD), jnp.float32)],
        compiler_params=pltpu.CompilerParams(
            dimension_semantics=("parallel",)),   # shards batch tiles across v7x's 2 TCs
    )(*args)
    return out_pad[:B]


def init_params(key, input_size=INPUT_SIZE, hidden_size=HIDDEN_SIZE,
                output_size=OUTPUT_SIZE):
    """Deterministic params matching nn.LSTM(input,hidden,2,batch_first) + nn.Linear shapes."""
    k = 1.0 / np.sqrt(hidden_size)
    keys = jax.random.split(key, 10)
    u = lambda kk, shape: jax.random.uniform(kk, shape, jnp.float32, -k, k)
    wih0 = u(keys[0], (4 * hidden_size, input_size))
    whh0 = u(keys[1], (4 * hidden_size, hidden_size))
    bih0 = u(keys[2], (4 * hidden_size,))
    bhh0 = u(keys[3], (4 * hidden_size,))
    wih1 = u(keys[4], (4 * hidden_size, hidden_size))
    whh1 = u(keys[5], (4 * hidden_size, hidden_size))
    bih1 = u(keys[6], (4 * hidden_size,))
    bhh1 = u(keys[7], (4 * hidden_size,))
    wfc = u(keys[8], (output_size, hidden_size))
    bfc = u(keys[9], (output_size,))
    return (wih0, whh0, bih0, bhh0, wih1, whh1, bih1, bhh1, wfc, bfc)


def ref_forward(x, params):
    """Pure-JAX reference mirroring PyTorch LSTM semantics for verification."""
    (wih0, whh0, bih0, bhh0, wih1, whh1, bih1, bhh1, wfc, bfc) = params
    B, T, D = x.shape
    H = whh0.shape[1]

    def cell(x_t, h, c, wih, whh, bih, bhh):
        g = x_t @ wih.T + h @ whh.T + bih + bhh
        i, f, gg, o = jnp.split(g, 4, axis=-1)
        c = jax.nn.sigmoid(f) * c + jax.nn.sigmoid(i) * jnp.tanh(gg)
        h = jax.nn.sigmoid(o) * jnp.tanh(c)
        return h, c

    h0 = c0 = h1 = c1 = jnp.zeros((B, H), jnp.float32)
    for t in range(T):
        h0, c0 = cell(x[:, t], h0, c0, wih0, whh0, bih0, bhh0)
        h1, c1 = cell(h0, h1, c1, wih1, whh1, bih1, bhh1)
    return jax.nn.sigmoid(h1 @ wfc.T + bfc)


if __name__ == "__main__":
    key = jax.random.PRNGKey(0)
    pkey, xkey = jax.random.split(key)

    params = init_params(pkey)

    batch, seq_len = 2, 8
    x = jax.random.normal(xkey, (batch, seq_len, INPUT_SIZE), dtype=jnp.float32)

    out = wear_lstm_forward(x, params)
    out = jax.block_until_ready(out)

    expected = ref_forward(x, params)
    np.testing.assert_allclose(np.asarray(out), np.asarray(expected),
                               rtol=1e-5, atol=1e-5)
    assert out.shape == (batch, OUTPUT_SIZE)
    print("KERNEL_OK")
</pallas_src>

<mosaic_0001>
module attributes {stable_mosaic.version = 11 : i64} {
  func.func @wear_lstm_kernel(%arg0: i32, %arg1: memref<1x64x8xf32, #tpu.memory_space<vmem>>, %arg2: memref<8x512xf32, #tpu.memory_space<vmem>>, %arg3: memref<256x1024xf32, #tpu.memory_space<vmem>>, %arg4: memref<1x512xf32, #tpu.memory_space<vmem>>, %arg5: memref<128x512xf32, #tpu.memory_space<vmem>>, %arg6: memref<1x512xf32, #tpu.memory_space<vmem>>, %arg7: memref<1x128xf32, #tpu.memory_space<vmem>>, %arg8: memref<1x1xf32, #tpu.memory_space<vmem>>, %arg9: memref<8x1xf32, #tpu.memory_space<vmem>>, %arg10: memref<64x512xf32, #tpu.memory_space<vmem>>) attributes {dimension_semantics = [#tpu.dimension_semantics<parallel>], iteration_bounds = array<i64: 1>, scalar_prefetch = 0 : i64, scratch_operands = 1 : i64, tpu.core_type = #tpu.core_type<tc>, window_params = [{transform_indices = @transform_0, window_bounds = array<i64: 1, 64, 8>}, {pipeline_mode = #tpu.pipeline_mode<synchronous>, transform_indices = @transform_1, window_bounds = array<i64: 8, 512>}, {pipeline_mode = #tpu.pipeline_mode<synchronous>, transform_indices = @transform_2, window_bounds = array<i64: 256, 1024>}, {pipeline_mode = #tpu.pipeline_mode<synchronous>, transform_indices = @transform_3, window_bounds = array<i64: 1, 512>}, {pipeline_mode = #tpu.pipeline_mode<synchronous>, transform_indices = @transform_4, window_bounds = array<i64: 128, 512>}, {pipeline_mode = #tpu.pipeline_mode<synchronous>, transform_indices = @transform_5, window_bounds = array<i64: 1, 512>}, {pipeline_mode = #tpu.pipeline_mode<synchronous>, transform_indices = @transform_6, window_bounds = array<i64: 1, 128>}, {pipeline_mode = #tpu.pipeline_mode<synchronous>, transform_indices = @transform_7, window_bounds = array<i64: 1, 1>}, {transform_indices = @transform_8, window_bounds = array<i64: 8, 1>}]} {
    %c0 = arith.constant 0 : index
    %c0_0 = arith.constant 0 : index
    %c0_1 = arith.constant 0 : index
    %0 = vector.load %arg1[%c0, %c0_0, %c0_1] : memref<1x64x8xf32, #tpu.memory_space<vmem>>, vector<1x64x8xf32>
    %1 = vector.shape_cast %0 : vector<1x64x8xf32> to vector<64x8xf32>
    %c0_2 = arith.constant 0 : index
    %c0_3 = arith.constant 0 : index
    %2 = vector.load %arg2[%c0_2, %c0_3] : memref<8x512xf32, #tpu.memory_space<vmem>>, vector<8x512xf32>
    %cst = arith.constant dense<0.000000e+00> : vector<64x512xf32>
    %3 = tpu.matmul %1, %2, %cst {dimension_numbers = #tpu.dot_dimension_numbers<[1], [0], [0], [1], [0, 0, 1, 1], [], []>} : vector<64x8xf32>, vector<8x512xf32>, vector<64x512xf32> -> vector<64x512xf32>
    %c0_4 = arith.constant 0 : index
    %c0_5 = arith.constant 0 : index
    %4 = vector.load %arg4[%c0_4, %c0_5] : memref<1x512xf32, #tpu.memory_space<vmem>>, vector<1x512xf32>
    %5 = vector.broadcast %4 : vector<1x512xf32> to vector<64x512xf32>
    %6 = arith.addf %3, %5 : vector<64x512xf32>
    %c0_6 = arith.constant 0 : index
    %c0_7 = arith.constant 0 : index
    %7 = vector.load %arg10[%c0_6, %c0_7] : memref<64x512xf32, #tpu.memory_space<vmem>>, vector<64x512xf32>
    tpu.vector_store %arg10[%c0_6, %c0_7], %6 {strides = array<i32>} : memref<64x512xf32, #tpu.memory_space<vmem>>, vector<64x512xf32>,
    %cst_8 = arith.constant 0.000000e+00 : f32
    %8 = vector.broadcast %cst_8 : f32 to vector<8x128xf32>
    %cst_9 = arith.constant 0.000000e+00 : f32
    %9 = vector.broadcast %cst_9 : f32 to vector<8x128xf32>
    %cst_10 = arith.constant 0.000000e+00 : f32
    %10 = vector.broadcast %cst_10 : f32 to vector<8x128xf32>
    %cst_11 = arith.constant 0.000000e+00 : f32
    %11 = vector.broadcast %cst_11 : f32 to vector<8x128xf32>
    %12 = tpu.concatenate %8, %10 in 1 : vector<8x128xf32>, vector<8x128xf32> -> vector<8x256xf32>
    %c0_12 = arith.constant 0 : index
    %c0_13 = arith.constant 0 : index
    %13 = vector.load %arg3[%c0_12, %c0_13] : memref<256x1024xf32, #tpu.memory_space<vmem>>, vector<256x1024xf32>
    %cst_14 = arith.constant dense<0.000000e+00> : vector<8x1024xf32>
    %14 = tpu.matmul %12, %13, %cst_14 {dimension_numbers = #tpu.dot_dimension_numbers<[1], [0], [0], [1], [0, 0, 1, 1], [], []>} : vector<8x256xf32>, vector<256x1024xf32>, vector<8x1024xf32> -> vector<8x1024xf32>
    %c0_15 = arith.constant 0 : index
    %c0_16 = arith.constant 0 : index
    %15 = vector.load %arg10[%c0_15, %c0_16] : memref<64x512xf32, #tpu.memory_space<vmem>>, vector<8x512xf32>
    %16 = vector.extract_strided_slice %14 {offsets = [0, 0], sizes = [8, 512], strides = [1, 1]} : vector<8x1024xf32> to vector<8x512xf32>
    %17 = arith.addf %15, %16 : vector<8x512xf32>
    %18 = vector.extract_strided_slice %17 {offsets = [0, 0], sizes = [8, 128], strides = [1, 1]} : vector<8x512xf32> to vector<8x128xf32>
    %19 = arith.negf %18 : vector<8x128xf32>
    %20 = math.exp %19 : vector<8x128xf32>
    %cst_17 = arith.constant 1.000000e+00 : f32
    %21 = vector.broadcast %cst_17 : f32 to vector<8x128xf32>
    %22 = arith.addf %21, %20 : vector<8x128xf32>
    %23 = arith.divf %21, %22 : vector<8x128xf32>
    %24 = vector.extract_strided_slice %17 {offsets = [0, 128], sizes = [8, 128], strides = [1, 1]} : vector<8x512xf32> to vector<8x128xf32>
    %25 = arith.negf %24 : vector<8x128xf32>
    %26 = math.exp %25 : vector<8x128xf32>
    %cst_18 = arith.constant 1.000000e+00 : f32
    %27 = vector.broadcast %cst_18 : f32 to vector<8x128xf32>
    %28 = arith.addf %27, %26 : vector<8x128xf32>
    %29 = arith.divf %27, %28 : vector<8x128xf32>
    %30 = vector.extract_strided_slice %17 {offsets = [0, 256], sizes = [8, 128], strides = [1, 1]} : vector<8x512xf32> to vector<8x128xf32>
    %31 = math.tanh %30 : vector<8x128xf32>
    %32 = vector.extract_strided_slice %17 {offsets = [0, 384], sizes = [8, 128], strides = [1, 1]} : vector<8x512xf32> to vector<8x128xf32>
    %33 = arith.negf %32 : vector<8x128xf32>
    %34 = math.exp %33 : vector<8x128xf32>
    %cst_19 = arith.constant 1.000000e+00 : f32
    %35 = vector.broadcast %cst_19 : f32 to vector<8x128xf32>
    %36 = arith.addf %35, %34 : vector<8x128xf32>
    %37 = arith.divf %35, %36 : vector<8x128xf32>
    %38 = arith.mulf %29, %9 : vector<8x128xf32>
    %39 = arith.mulf %23, %31 : vector<8x128xf32>
    %40 = arith.addf %38, %39 : vector<8x128xf32>
    %41 = math.tanh %40 : vector<8x128xf32>
    %42 = arith.mulf %37, %41 : vector<8x128xf32>
    %c0_20 = arith.constant 0 : index
    %c0_21 = arith.constant 0 : index
    %43 = vector.load %arg5[%c0_20, %c0_21] : memref<128x512xf32, #tpu.memory_space<vmem>>, vector<128x512xf32>
    %cst_22 = arith.constant dense<0.000000e+00> : vector<8x512xf32>
    %44 = tpu.matmul %42, %43, %cst_22 {dimension_numbers = #tpu.dot_dimension_numbers<[1], [0], [0], [1], [0, 0, 1, 1], [], []>} : vector<8x128xf32>, vector<128x512xf32>, vector<8x512xf32> -> vector<8x512xf32>
    %45 = vector.extract_strided_slice %14 {offsets = [0, 512], sizes = [8, 512], strides = [1, 1]} : vector<8x1024xf32> to vector<8x512xf32>
    %46 = arith.addf %44, %45 : vector<8x512xf32>
    %c0_23 = arith.constant 0 : index
    %c0_24 = arith.constant 0 : index
    %47 = vector.load %arg6[%c0_23, %c0_24] : memref<1x512xf32, #tpu.memory_space<vmem>>, vector<1x512xf32>
    %48 = vector.broadcast %47 : vector<1x512xf32> to vector<8x512xf32>
    %49 = arith.addf %46, %48 : vector<8x512xf32>
    %50 = vector.extract_strided_slice %49 {offsets = [0, 0], sizes = [8, 128], strides = [1, 1]} : vector<8x512xf32> to vector<8x128xf32>
    %51 = arith.negf %50 : vector<8x128xf32>
    %52 = math.exp %51 : vector<8x128xf32>
    %cst_25 = arith.constant 1.000000e+00 : f32
    %53 = vector.broadcast %cst_25 : f32 to vector<8x128xf32>
    %54 = arith.addf %53, %52 : vector<8x128xf32>
    %55 = arith.divf %53, %54 : vector<8x128xf32>
    %56 = vector.extract_strided_slice %49 {offsets = [0, 128], sizes = [8, 128], strides = [1, 1]} : vector<8x512xf32> to vector<8x128xf32>
    %57 = arith.negf %56 : vector<8x128xf32>
    %58 = math.exp %57 : vector<8x128xf32>
    %cst_26 = arith.constant 1.000000e+00 : f32
    %59 = vector.broadcast %cst_26 : f32 to vector<8x128xf32>
    %60 = arith.addf %59, %58 : vector<8x128xf32>
    %61 = arith.divf %59, %60 : vector<8x128xf32>
    %62 = vector.extract_strided_slice %49 {offsets = [0, 256], sizes = [8, 128], strides = [1, 1]} : vector<8x512xf32> to vector<8x128xf32>
    %63 = math.tanh %62 : vector<8x128xf32>
    %64 = vector.extract_strided_slice %49 {offsets = [0, 384], sizes = [8, 128], strides = [1, 1]} : vector<8x512xf32> to vector<8x128xf32>
    %65 = arith.negf %64 : vector<8x128xf32>
    %66 = math.exp %65 : vector<8x128xf32>
    %cst_27 = arith.constant 1.000000e+00 : f32
    %67 = vector.broadcast %cst_27 : f32 to vector<8x128xf32>
    %68 = arith.addf %67, %66 : vector<8x128xf32>
    %69 = arith.divf %67, %68 : vector<8x128xf32>
    %70 = arith.mulf %61, %11 : vector<8x128xf32>
    %71 = arith.mulf %55, %63 : vector<8x128xf32>
    %72 = arith.addf %70, %71 : vector<8x128xf32>
    %73 = math.tanh %72 : vector<8x128xf32>
    %74 = arith.mulf %69, %73 : vector<8x128xf32>
    %75 = tpu.concatenate %42, %74 in 1 : vector<8x128xf32>, vector<8x128xf32> -> vector<8x256xf32>
    %c0_28 = arith.constant 0 : index
    %c0_29 = arith.constant 0 : index
    %76 = vector.load %arg3[%c0_28, %c0_29] : memref<256x1024xf32, #tpu.memory_space<vmem>>, vector<256x1024xf32>
    %cst_30 = arith.constant dense<0.000000e+00> : vector<8x1024xf32>
    %77 = tpu.matmul %75, %76, %cst_30 {dimension_numbers = #tpu.dot_dimension_numbers<[1], [0], [0], [1], [0, 0, 1, 1], [], []>} : vector<8x256xf32>, vector<256x1024xf32>, vector<8x1024xf32> -> vector<8x1024xf32>
    %c8 = arith.constant 8 : index
    %c0_31 = arith.constant 0 : index
    %78 = vector.load %arg10[%c8, %c0_31] : memref<64x512xf32, #tpu.memory_space<vmem>>, vector<8x512xf32>
    %79 = vector.extract_strided_slice %77 {offsets = [0, 0], sizes = [8, 512], strides = [1, 1]} : vector<8x1024xf32> to vector<8x512xf32>
    %80 = arith.addf %78, %79 : vector<8x512xf32>
    %81 = vector.extract_strided_slice %80 {offsets = [0, 0], sizes = [8, 128], strides = [1, 1]} : vector<8x512xf32> to vector<8x128xf32>
    %82 = arith.negf %81 : vector<8x128xf32>
    %83 = math.exp %82 : vector<8x128xf32>
    %cst_32 = arith.constant 1.000000e+00 : f32
    %84 = vector.broadcast %cst_32 : f32 to vector<8x128xf32>
    %85 = arith.addf %84, %83 : vector<8x128xf32>
    %86 = arith.divf %84, %85 : vector<8x128xf32>
    %87 = vector.extract_strided_slice %80 {offsets = [0, 128], sizes = [8, 128], strides = [1, 1]} : vector<8x512xf32> to vector<8x128xf32>
    %88 = arith.negf %87 : vector<8x128xf32>
    %89 = math.exp %88 : vector<8x128xf32>
    %cst_33 = arith.constant 1.000000e+00 : f32
    %90 = vector.broadcast %cst_33 : f32 to vector<8x128xf32>
    %91 = arith.addf %90, %89 : vector<8x128xf32>
    %92 = arith.divf %90, %91 : vector<8x128xf32>
    %93 = vector.extract_strided_slice %80 {offsets = [0, 256], sizes = [8, 128], strides = [1, 1]} : vector<8x512xf32> to vector<8x128xf32>
    %94 = math.tanh %93 : vector<8x128xf32>
    %95 = vector.extract_strided_slice %80 {offsets = [0, 384], sizes = [8, 128], strides = [1, 1]} : vector<8x512xf32> to vector<8x128xf32>
    %96 = arith.negf %95 : vector<8x128xf32>
    %97 = math.exp %96 : vector<8x128xf32>
    %cst_34 = arith.constant 1.000000e+00 : f32
    %98 = vector.broadcast %cst_34 : f32 to vector<8x128xf32>
    %99 = arith.addf %98, %97 : vector<8x128xf32>
    %100 = arith.divf %98, %99 : vector<8x128xf32>
    %101 = arith.mulf %92, %40 : vector<8x128xf32>
    %102 = arith.mulf %86, %94 : vector<8x128xf32>
    %103 = arith.addf %101, %102 : vector<8x128xf32>
    %104 = math.tanh %103 : vector<8x128xf32>
    %105 = arith.mulf %100, %104 : vector<8x128xf32>
    %c0_35 = arith.constant 0 : index
    %c0_36 = arith.constant 0 : index
    %106 = vector.load %arg5[%c0_35, %c0_36] : memref<128x512xf32, #tpu.memory_space<vmem>>, vector<128x512xf32>
    %cst_37 = arith.constant dense<0.000000e+00> : vector<8x512xf32>
    %107 = tpu.matmul %105, %106, %cst_37 {dimension_numbers = #tpu.dot_dimension_numbers<[1], [0], [0], [1], [0, 0, 1, 1], [], []>} : vector<8x128xf32>, vector<128x512xf32>, vector<8x512xf32> -> vector<8x512xf32>
    %108 = vector.extract_strided_slice %77 {offsets = [0, 512], sizes = [8, 512], strides = [1, 1]} : vector<8x1024xf32> to vector<8x512xf32>
    %109 = arith.addf %107, %108 : vector<8x512xf32>
    %c0_38 = arith.constant 0 : index
    %c0_39 = arith.constant 0 : index
    %110 = vector.load %arg6[%c0_38, %c0_39] : memref<1x512xf32, #tpu.memory_space<vmem>>, vector<1x512xf32>
    %111 = vector.broadcast %110 : vector<1x512xf32> to vector<8x512xf32>
    %112 = arith.addf %109, %111 : vector<8x512xf32>
    %113 = vector.extract_strided_slice %112 {offsets = [0, 0], sizes = [8, 128], strides = [1, 1]} : vector<8x512xf32> to vector<8x128xf32>
    %114 = arith.negf %113 : vector<8x128xf32>
    %115 = math.exp %114 : vector<8x128xf32>
    %cst_40 = arith.constant 1.000000e+00 : f32
    %116 = vector.broadcast %cst_40 : f32 to vector<8x128xf32>
    %117 = arith.addf %116, %115 : vector<8x128xf32>
    %118 = arith.divf %116, %117 : vector<8x128xf32>
    %119 = vector.extract_strided_slice %112 {offsets = [0, 128], sizes = [8, 128], strides = [1, 1]} : vector<8x512xf32> to vector<8x128xf32>
    %120 = arith.negf %119 : vector<8x128xf32>
    %121 = math.exp %120 : vector<8x128xf32>
    %cst_41 = arith.constant 1.000000e+00 : f32
    %122 = vector.broadcast %cst_41 : f32 to vector<8x128xf32>
    %123 = arith.addf %122, %121 : vector<8x128xf32>
    %124 = arith.divf %122, %123 : vector<8x128xf32>
    %125 = vector.extract_strided_slice %112 {offsets = [0, 256], sizes = [8, 128], strides = [1, 1]} : vector<8x512xf32> to vector<8x128xf32>
    %126 = math.tanh %125 : vector<8x128xf32>
    %127 = vector.extract_strided_slice %112 {offsets = [0, 384], sizes = [8, 128], strides = [1, 1]} : vector<8x512xf32> to vector<8x128xf32>
    %128 = arith.negf %127 : vector<8x128xf32>
    %129 = math.exp %128 : vector<8x128xf32>
    %cst_42 = arith.constant 1.000000e+00 : f32
    %130 = vector.broadcast %cst_42 : f32 to vector<8x128xf32>
    %131 = arith.addf %130, %129 : vector<8x128xf32>
    %132 = arith.divf %130, %131 : vector<8x128xf32>
    %133 = arith.mulf %124, %72 : vector<8x128xf32>
    %134 = arith.mulf %118, %126 : vector<8x128xf32>
    %135 = arith.addf %133, %134 : vector<8x128xf32>
    %136 = math.tanh %135 : vector<8x128xf32>
    %137 = arith.mulf %132, %136 : vector<8x128xf32>
    %138 = tpu.concatenate %105, %137 in 1 : vector<8x128xf32>, vector<8x128xf32> -> vector<8x256xf32>
    %c0_43 = arith.constant 0 : index
    %c0_44 = arith.constant 0 : index
    %139 = vector.load %arg3[%c0_43, %c0_44] : memref<256x1024xf32, #tpu.memory_space<vmem>>, vector<256x1024xf32>
    %cst_45 = arith.constant dense<0.000000e+00> : vector<8x1024xf32>
    %140 = tpu.matmul %138, %139, %cst_45 {dimension_numbers = #tpu.dot_dimension_numbers<[1], [0], [0], [1], [0, 0, 1, 1], [], []>} : vector<8x256xf32>, vector<256x1024xf32>, vector<8x1024xf32> -> vector<8x1024xf32>
    %c16 = arith.constant 16 : index
    %c0_46 = arith.constant 0 : index
    %141 = vector.load %arg10[%c16, %c0_46] : memref<64x512xf32, #tpu.memory_space<vmem>>, vector<8x512xf32>
    %142 = vector.extract_strided_slice %140 {offsets = [0, 0], sizes = [8, 512], strides = [1, 1]} : vector<8x1024xf32> to vector<8x512xf32>
    %143 = arith.addf %141, %142 : vector<8x512xf32>
    %144 = vector.extract_strided_slice %143 {offsets = [0, 0], sizes = [8, 128], strides = [1, 1]} : vector<8x512xf32> to vector<8x128xf32>
    %145 = arith.negf %144 : vector<8x128xf32>
    %146 = math.exp %145 : vector<8x128xf32>
    %cst_47 = arith.constant 1.000000e+00 : f32
    %147 = vector.broadcast %cst_47 : f32 to vector<8x128xf32>
    %148 = arith.addf %147, %146 : vector<8x128xf32>
    %149 = arith.divf %147, %148 : vector<8x128xf32>
    %150 = vector.extract_strided_slice %143 {offsets = [0, 128], sizes = [8, 128], strides = [1, 1]} : vector<8x512xf32> to vector<8x128xf32>
    %151 = arith.negf %150 : vector<8x128xf32>
    %152 = math.exp %151 : vector<8x128xf32>
    %cst_48 = arith.constant 1.000000e+00 : f32
    %153 = vector.broadcast %cst_48 : f32 to vector<8x128xf32>
    %154 = arith.addf %153, %152 : vector<8x128xf32>
    %155 = arith.divf %153, %154 : vector<8x128xf32>
    %156 = vector.extract_strided_slice %143 {offsets = [0, 256], sizes = [8, 128], strides = [1, 1]} : vector<8x512xf32> to vector<8x128xf32>
    %157 = math.tanh %156 : vector<8x128xf32>
    %158 = vector.extract_strided_slice %143 {offsets = [0, 384], sizes = [8, 128], strides = [1, 1]} : vector<8x512xf32> to vector<8x128xf32>
    %159 = arith.negf %158 : vector<8x128xf32>
    %160 = math.exp %159 : vector<8x128xf32>
    %cst_49 = arith.constant 1.000000e+00 : f32
    %161 = vector.broadcast %cst_49 : f32 to vector<8x128xf32>
    %162 = arith.addf %161, %160 : vector<8x128xf32>
    %163 = arith.divf %161, %162 : vector<8x128xf32>
    %164 = arith.mulf %155, %103 : vector<8x128xf32>
    %165 = arith.mulf %149, %157 : vector<8x128xf32>
    %166 = arith.addf %164, %165 : vector<8x128xf32>
    %167 = math.tanh %166 : vector<8x128xf32>
    %168 = arith.mulf %163, %167 : vector<8x128xf32>
    %c0_50 = arith.constant 0 : index
    %c0_51 = arith.constant 0 : index
    %169 = vector.load %arg5[%c0_50, %c0_51] : memref<128x512xf32, #tpu.memory_space<vmem>>, vector<128x512xf32>
    %cst_52 = arith.constant dense<0.000000e+00> : vector<8x512xf32>
    %170 = tpu.matmul %168, %169, %cst_52 {dimension_numbers = #tpu.dot_dimension_numbers<[1], [0], [0], [1], [0, 0, 1, 1], [], []>} : vector<8x128xf32>, vector<128x512xf32>, vector<8x512xf32> -> vector<8x512xf32>
    %171 = vector.extract_strided_slice %140 {offsets = [0, 512], sizes = [8, 512], strides = [1, 1]} : vector<8x1024xf32> to vector<8x512xf32>
    %172 = arith.addf %170, %171 : vector<8x512xf32>
    %c0_53 = arith.constant 0 : index
    %c0_54 = arith.constant 0 : index
    %173 = vector.load %arg6[%c0_53, %c0_54] : memref<1x512xf32, #tpu.memory_space<vmem>>, vector<1x512xf32>
    %174 = vector.broadcast %173 : vector<1x512xf32> to vector<8x512xf32>
    %175 = arith.addf %172, %174 : vector<8x512xf32>
    %176 = vector.extract_strided_slice %175 {offsets = [0, 0], sizes = [8, 128], strides = [1, 1]} : vector<8x512xf32> to vector<8x128xf32>
    %177 = arith.negf %176 : vector<8x128xf32>
    %178 = math.exp %177 : vector<8x128xf32>
    %cst_55 = arith.constant 1.000000e+00 : f32
    %179 = vector.broadcast %cst_55 : f32 to vector<8x128xf32>
    %180 = arith.addf %179, %178 : vector<8x128xf32>
    %181 = arith.divf %179, %180 : vector<8x128xf32>
    %182 = vector.extract_strided_slice %175 {offsets = [0, 128], sizes = [8, 128], strides = [1, 1]} : vector<8x512xf32> to vector<8x128xf32>
    %183 = arith.negf %182 : vector<8x128xf32>
    %184 = math.exp %183 : vector<8x128xf32>
    %cst_56 = arith.constant 1.000000e+00 : f32
    %185 = vector.broadcast %cst_56 : f32 to vector<8x128xf32>
    %186 = arith.addf %185, %184 : vector<8x128xf32>
    %187 = arith.divf %185, %186 : vector<8x128xf32>
    %188 = vector.extract_strided_slice %175 {offsets = [0, 256], sizes = [8, 128], strides = [1, 1]} : vector<8x512xf32> to vector<8x128xf32>
    %189 = math.tanh %188 : vector<8x128xf32>
    %190 = vector.extract_strided_slice %175 {offsets = [0, 384], sizes = [8, 128], strides = [1, 1]} : vector<8x512xf32> to vector<8x128xf32>
    %191 = arith.negf %190 : vector<8x128xf32>
    %192 = math.exp %191 : vector<8x128xf32>
    %cst_57 = arith.constant 1.000000e+00 : f32
    %193 = vector.broadcast %cst_57 : f32 to vector<8x128xf32>
    %194 = arith.addf %193, %192 : vector<8x128xf32>
    %195 = arith.divf %193, %194 : vector<8x128xf32>
    %196 = arith.mulf %187, %135 : vector<8x128xf32>
    %197 = arith.mulf %181, %189 : vector<8x128xf32>
    %198 = arith.addf %196, %197 : vector<8x128xf32>
    %199 = math.tanh %198 : vector<8x128xf32>
    %200 = arith.mulf %195, %199 : vector<8x128xf32>
    %201 = tpu.concatenate %168, %200 in 1 : vector<8x128xf32>, vector<8x128xf32> -> vector<8x256xf32>
    %c0_58 = arith.constant 0 : index
    %c0_59 = arith.constant 0 : index
    %202 = vector.load %arg3[%c0_58, %c0_59] : memref<256x1024xf32, #tpu.memory_space<vmem>>, vector<256x1024xf32>
    %cst_60 = arith.constant dense<0.000000e+00> : vector<8x1024xf32>
    %203 = tpu.matmul %201, %202, %cst_60 {dimension_numbers = #tpu.dot_dimension_numbers<[1], [0], [0], [1], [0, 0, 1, 1], [], []>} : vector<8x256xf32>, vector<256x1024xf32>, vector<8x1024xf32> -> vector<8x1024xf32>
    %c24 = arith.constant 24 : index
    %c0_61 = arith.constant 0 : index
    %204 = vector.load %arg10[%c24, %c0_61] : memref<64x512xf32, #tpu.memory_space<vmem>>, vector<8x512xf32>
    %205 = vector.extract_strided_slice %203 {offsets = [0, 0], sizes = [8, 512], strides = [1, 1]} : vector<8x1024xf32> to vector<8x512xf32>
    %206 = arith.addf %204, %205 : vector<8x512xf32>
    %207 = vector.extract_strided_slice %206 {offsets = [0, 0], sizes = [8, 128], strides = [1, 1]} : vector<8x512xf32> to vector<8x128xf32>
    %208 = arith.negf %207 : vector<8x128xf32>
    %209 = math.exp %208 : vector<8x128xf32>
    %cst_62 = arith.constant 1.000000e+00 : f32
    %210 = vector.broadcast %cst_62 : f32 to vector<8x128xf32>
    %211 = arith.addf %210, %209 : vector<8x128xf32>
    %212 = arith.divf %210, %211 : vector<8x128xf32>
    %213 = vector.extract_strided_slice %206 {offsets = [0, 128], sizes = [8, 128], strides = [1, 1]} : vector<8x512xf32> to vector<8x128xf32>
    %214 = arith.negf %213 : vector<8x128xf32>
    %215 = math.exp %214 : vector<8x128xf32>
    %cst_63 = arith.constant 1.000000e+00 : f32
    %216 = vector.broadcast %cst_63 : f32 to vector<8x128xf32>
    %217 = arith.addf %216, %215 : vector<8x128xf32>
    %218 = arith.divf %216, %217 : vector<8x128xf32>
    %219 = vector.extract_strided_slice %206 {offsets = [0, 256], sizes = [8, 128], strides = [1, 1]} : vector<8x512xf32> to vector<8x128xf32>
    %220 = math.tanh %219 : vector<8x128xf32>
    %221 = vector.extract_strided_slice %206 {offsets = [0, 384], sizes = [8, 128], strides = [1, 1]} : vector<8x512xf32> to vector<8x128xf32>
    %222 = arith.negf %221 : vector<8x128xf32>
    %223 = math.exp %222 : vector<8x128xf32>
    %cst_64 = arith.constant 1.000000e+00 : f32
    %224 = vector.broadcast %cst_64 : f32 to vector<8x128xf32>
    %225 = arith.addf %224, %223 : vector<8x128xf32>
    %226 = arith.divf %224, %225 : vector<8x128xf32>
    %227 = arith.mulf %218, %166 : vector<8x128xf32>
    %228 = arith.mulf %212, %220 : vector<8x128xf32>
    %229 = arith.addf %227, %228 : vector<8x128xf32>
    %230 = math.tanh %229 : vector<8x128xf32>
    %231 = arith.mulf %226, %230 : vector<8x128xf32>
    %c0_65 = arith.constant 0 : index
    %c0_66 = arith.constant 0 : index
    %232 = vector.load %arg5[%c0_65, %c0_66] : memref<128x512xf32, #tpu.memory_space<vmem>>, vector<128x512xf32>
    %cst_67 = arith.constant dense<0.000000e+00> : vector<8x512xf32>
    %233 = tpu.matmul %231, %232, %cst_67 {dimension_numbers = #tpu.dot_dimension_numbers<[1], [0], [0], [1], [0, 0, 1, 1], [], []>} : vector<8x128xf32>, vector<128x512xf32>, vector<8x512xf32> -> vector<8x512xf32>
    %234 = vector.extract_strided_slice %203 {offsets = [0, 512], sizes = [8, 512], strides = [1, 1]} : vector<8x1024xf32> to vector<8x512xf32>
    %235 = arith.addf %233, %234 : vector<8x512xf32>
    %c0_68 = arith.constant 0 : index
    %c0_69 = arith.constant 0 : index
    %236 = vector.load %arg6[%c0_68, %c0_69] : memref<1x512xf32, #tpu.memory_space<vmem>>, vector<1x512xf32>
    %237 = vector.broadcast %236 : vector<1x512xf32> to vector<8x512xf32>
    %238 = arith.addf %235, %237 : vector<8x512xf32>
    %239 = vector.extract_strided_slice %238 {offsets = [0, 0], sizes = [8, 128], strides = [1, 1]} : vector<8x512xf32> to vector<8x128xf32>
    %240 = arith.negf %239 : vector<8x128xf32>
    %241 = math.exp %240 : vector<8x128xf32>
    %cst_70 = arith.constant 1.000000e+00 : f32
    %242 = vector.broadcast %cst_70 : f32 to vector<8x128xf32>
    %243 = arith.addf %242, %241 : vector<8x128xf32>
    %244 = arith.divf %242, %243 : vector<8x128xf32>
    %245 = vector.extract_strided_slice %238 {offsets = [0, 128], sizes = [8, 128], strides = [1, 1]} : vector<8x512xf32> to vector<8x128xf32>
    %246 = arith.negf %245 : vector<8x128xf32>
    %247 = math.exp %246 : vector<8x128xf32>
    %cst_71 = arith.constant 1.000000e+00 : f32
    %248 = vector.broadcast %cst_71 : f32 to vector<8x128xf32>
    %249 = arith.addf %248, %247 : vector<8x128xf32>
    %250 = arith.divf %248, %249 : vector<8x128xf32>
    %251 = vector.extract_strided_slice %238 {offsets = [0, 256], sizes = [8, 128], strides = [1, 1]} : vector<8x512xf32> to vector<8x128xf32>
    %252 = math.tanh %251 : vector<8x128xf32>
    %253 = vector.extract_strided_slice %238 {offsets = [0, 384], sizes = [8, 128], strides = [1, 1]} : vector<8x512xf32> to vector<8x128xf32>
    %254 = arith.negf %253 : vector<8x128xf32>
    %255 = math.exp %254 : vector<8x128xf32>
    %cst_72 = arith.constant 1.000000e+00 : f32
    %256 = vector.broadcast %cst_72 : f32 to vector<8x128xf32>
    %257 = arith.addf %256, %255 : vector<8x128xf32>
    %258 = arith.divf %256, %257 : vector<8x128xf32>
    %259 = arith.mulf %250, %198 : vector<8x128xf32>
    %260 = arith.mulf %244, %252 : vector<8x128xf32>
    %261 = arith.addf %259, %260 : vector<8x128xf32>
    %262 = math.tanh %261 : vector<8x128xf32>
    %263 = arith.mulf %258, %262 : vector<8x128xf32>
    %264 = tpu.concatenate %231, %263 in 1 : vector<8x128xf32>, vector<8x128xf32> -> vector<8x256xf32>
    %c0_73 = arith.constant 0 : index
    %c0_74 = arith.constant 0 : index
    %265 = vector.load %arg3[%c0_73, %c0_74] : memref<256x1024xf32, #tpu.memory_space<vmem>>, vector<256x1024xf32>
    %cst_75 = arith.constant dense<0.000000e+00> : vector<8x1024xf32>
    %266 = tpu.matmul %264, %265, %cst_75 {dimension_numbers = #tpu.dot_dimension_numbers<[1], [0], [0], [1], [0, 0, 1, 1], [], []>} : vector<8x256xf32>, vector<256x1024xf32>, vector<8x1024xf32> -> vector<8x1024xf32>
    %c32 = arith.constant 32 : index
    %c0_76 = arith.constant 0 : index
    %267 = vector.load %arg10[%c32, %c0_76] : memref<64x512xf32, #tpu.memory_space<vmem>>, vector<8x512xf32>
    %268 = vector.extract_strided_slice %266 {offsets = [0, 0], sizes = [8, 512], strides = [1, 1]} : vector<8x1024xf32> to vector<8x512xf32>
    %269 = arith.addf %267, %268 : vector<8x512xf32>
    %270 = vector.extract_strided_slice %269 {offsets = [0, 0], sizes = [8, 128], strides = [1, 1]} : vector<8x512xf32> to vector<8x128xf32>
    %271 = arith.negf %270 : vector<8x128xf32>
    %272 = math.exp %271 : vector<8x128xf32>
    %cst_77 = arith.constant 1.000000e+00 : f32
    %273 = vector.broadcast %cst_77 : f32 to vector<8x128xf32>
    %274 = arith.addf %273, %272 : vector<8x128xf32>
    %275 = arith.divf %273, %274 : vector<8x128xf32>
    %276 = vector.extract_strided_slice %269 {offsets = [0, 128], sizes = [8, 128], strides = [1, 1]} : vector<8x512xf32> to vector<8x128xf32>
    %277 = arith.negf %276 : vector<8x128xf32>
    %278 = math.exp %277 : vector<8x128xf32>
    %cst_78 = arith.constant 1.000000e+00 : f32
    %279 = vector.broadcast %cst_78 : f32 to vector<8x128xf32>
    %280 = arith.addf %279, %278 : vector<8x128xf32>
    %281 = arith.divf %279, %280 : vector<8x128xf32>
    %282 = vector.extract_strided_slice %269 {offsets = [0, 256], sizes = [8, 128], strides = [1, 1]} : vector<8x512xf32> to vector<8x128xf32>
    %283 = math.tanh %282 : vector<8x128xf32>
    %284 = vector.extract_strided_slice %269 {offsets = [0, 384], sizes = [8, 128], strides = [1, 1]} : vector<8x512xf32> to vector<8x128xf32>
    %285 = arith.negf %284 : vector<8x128xf32>
    %286 = math.exp %285 : vector<8x128xf32>
    %cst_79 = arith.constant 1.000000e+00 : f32
    %287 = vector.broadcast %cst_79 : f32 to vector<8x128xf32>
    %288 = arith.addf %287, %286 : vector<8x128xf32>
    %289 = arith.divf %287, %288 : vector<8x128xf32>
    %290 = arith.mulf %281, %229 : vector<8x128xf32>
    %291 = arith.mulf %275, %283 : vector<8x128xf32>
    %292 = arith.addf %290, %291 : vector<8x128xf32>
    %293 = math.tanh %292 : vector<8x128xf32>
    %294 = arith.mulf %289, %293 : vector<8x128xf32>
    %c0_80 = arith.constant 0 : index
    %c0_81 = arith.constant 0 : index
    %295 = vector.load %arg5[%c0_80, %c0_81] : memref<128x512xf32, #tpu.memory_space<vmem>>, vector<128x512xf32>
    %cst_82 = arith.constant dense<0.000000e+00> : vector<8x512xf32>
    %296 = tpu.matmul %294, %295, %cst_82 {dimension_numbers = #tpu.dot_dimension_numbers<[1], [0], [0], [1], [0, 0, 1, 1], [], []>} : vector<8x128xf32>, vector<128x512xf32>, vector<8x512xf32> -> vector<8x512xf32>
    %297 = vector.extract_strided_slice %266 {offsets = [0, 512], sizes = [8, 512], strides = [1, 1]} : vector<8x1024xf32> to vector<8x512xf32>
    %298 = arith.addf %296, %297 : vector<8x512xf32>
    %c0_83 = arith.constant 0 : index
    %c0_84 = arith.constant 0 : index
    %299 = vector.load %arg6[%c0_83, %c0_84] : memref<1x512xf32, #tpu.memory_space<vmem>>, vector<1x512xf32>
    %300 = vector.broadcast %299 : vector<1x512xf32> to vector<8x512xf32>
    %301 = arith.addf %298, %300 : vector<8x512xf32>
    %302 = vector.extract_strided_slice %301 {offsets = [0, 0], sizes = [8, 128], strides = [1, 1]} : vector<8x512xf32> to vector<8x128xf32>
    %303 = arith.negf %302 : vector<8x128xf32>
    %304 = math.exp %303 : vector<8x128xf32>
    %cst_85 = arith.constant 1.000000e+00 : f32
    %305 = vector.broadcast %cst_85 : f32 to vector<8x128xf32>
    %306 = arith.addf %305, %304 : vector<8x128xf32>
    %307 = arith.divf %305, %306 : vector<8x128xf32>
    %308 = vector.extract_strided_slice %301 {offsets = [0, 128], sizes = [8, 128], strides = [1, 1]} : vector<8x512xf32> to vector<8x128xf32>
    %309 = arith.negf %308 : vector<8x128xf32>
    %310 = math.exp %309 : vector<8x128xf32>
    %cst_86 = arith.constant 1.000000e+00 : f32
    %311 = vector.broadcast %cst_86 : f32 to vector<8x128xf32>
    %312 = arith.addf %311, %310 : vector<8x128xf32>
    %313 = arith.divf %311, %312 : vector<8x128xf32>
    %314 = vector.extract_strided_slice %301 {offsets = [0, 256], sizes = [8, 128], strides = [1, 1]} : vector<8x512xf32> to vector<8x128xf32>
    %315 = math.tanh %314 : vector<8x128xf32>
    %316 = vector.extract_strided_slice %301 {offsets = [0, 384], sizes = [8, 128], strides = [1, 1]} : vector<8x512xf32> to vector<8x128xf32>
    %317 = arith.negf %316 : vector<8x128xf32>
    %318 = math.exp %317 : vector<8x128xf32>
    %cst_87 = arith.constant 1.000000e+00 : f32
    %319 = vector.broadcast %cst_87 : f32 to vector<8x128xf32>
    %320 = arith.addf %319, %318 : vector<8x128xf32>
    %321 = arith.divf %319, %320 : vector<8x128xf32>
    %322 = arith.mulf %313, %261 : vector<8x128xf32>
    %323 = arith.mulf %307, %315 : vector<8x128xf32>
    %324 = arith.addf %322, %323 : vector<8x128xf32>
    %325 = math.tanh %324 : vector<8x128xf32>
    %326 = arith.mulf %321, %325 : vector<8x128xf32>
    %327 = tpu.concatenate %294, %326 in 1 : vector<8x128xf32>, vector<8x128xf32> -> vector<8x256xf32>
    %c0_88 = arith.constant 0 : index
    %c0_89 = arith.constant 0 : index
    %328 = vector.load %arg3[%c0_88, %c0_89] : memref<256x1024xf32, #tpu.memory_space<vmem>>, vector<256x1024xf32>
    %cst_90 = arith.constant dense<0.000000e+00> : vector<8x1024xf32>
    %329 = tpu.matmul %327, %328, %cst_90 {dimension_numbers = #tpu.dot_dimension_numbers<[1], [0], [0], [1], [0, 0, 1, 1], [], []>} : vector<8x256xf32>, vector<256x1024xf32>, vector<8x1024xf32> -> vector<8x1024xf32>
    %c40 = arith.constant 40 : index
    %c0_91 = arith.constant 0 : index
    %330 = vector.load %arg10[%c40, %c0_91] : memref<64x512xf32, #tpu.memory_space<vmem>>, vector<8x512xf32>
    %331 = vector.extract_strided_slice %329 {offsets = [0, 0], sizes = [8, 512], strides = [1, 1]} : vector<8x1024xf32> to vector<8x512xf32>
    %332 = arith.addf %330, %331 : vector<8x512xf32>
    %333 = vector.extract_strided_slice %332 {offsets = [0, 0], sizes = [8, 128], strides = [1, 1]} : vector<8x512xf32> to vector<8x128xf32>
    %334 = arith.negf %333 : vector<8x128xf32>
    %335 = math.exp %334 : vector<8x128xf32>
    %cst_92 = arith.constant 1.000000e+00 : f32
    %336 = vector.broadcast %cst_92 : f32 to vector<8x128xf32>
    %337 = arith.addf %336, %335 : vector<8x128xf32>
    %338 = arith.divf %336, %337 : vector<8x128xf32>
    %339 = vector.extract_strided_slice %332 {offsets = [0, 128], sizes = [8, 128], strides = [1, 1]} : vector<8x512xf32> to vector<8x128xf32>
    %340 = arith.negf %339 : vector<8x128xf32>
    %341 = math.exp %340 : vector<8x128xf32>
    %cst_93 = arith.constant 1.000000e+00 : f32
    %342 = vector.broadcast %cst_93 : f32 to vector<8x128xf32>
    %343 = arith.addf %342, %341 : vector<8x128xf32>
    %344 = arith.divf %342, %343 : vector<8x128xf32>
    %345 = vector.extract_strided_slice %332 {offsets = [0, 256], sizes = [8, 128], strides = [1, 1]} : vector<8x512xf32> to vector<8x128xf32>
    %346 = math.tanh %345 : vector<8x128xf32>
    %347 = vector.extract_strided_slice %332 {offsets = [0, 384], sizes = [8, 128], strides = [1, 1]} : vector<8x512xf32> to vector<8x128xf32>
    %348 = arith.negf %347 : vector<8x128xf32>
    %349 = math.exp %348 : vector<8x128xf32>
    %cst_94 = arith.constant 1.000000e+00 : f32
    %350 = vector.broadcast %cst_94 : f32 to vector<8x128xf32>
    %351 = arith.addf %350, %349 : vector<8x128xf32>
    %352 = arith.divf %350, %351 : vector<8x128xf32>
    %353 = arith.mulf %344, %292 : vector<8x128xf32>
    %354 = arith.mulf %338, %346 : vector<8x128xf32>
    %355 = arith.addf %353, %354 : vector<8x128xf32>
    %356 = math.tanh %355 : vector<8x128xf32>
    %357 = arith.mulf %352, %356 : vector<8x128xf32>
    %c0_95 = arith.constant 0 : index
    %c0_96 = arith.constant 0 : index
    %358 = vector.load %arg5[%c0_95, %c0_96] : memref<128x512xf32, #tpu.memory_space<vmem>>, vector<128x512xf32>
    %cst_97 = arith.constant dense<0.000000e+00> : vector<8x512xf32>
    %359 = tpu.matmul %357, %358, %cst_97 {dimension_numbers = #tpu.dot_dimension_numbers<[1], [0], [0], [1], [0, 0, 1, 1], [], []>} : vector<8x128xf32>, vector<128x512xf32>, vector<8x512xf32> -> vector<8x512xf32>
    %360 = vector.extract_strided_slice %329 {offsets = [0, 512], sizes = [8, 512], strides = [1, 1]} : vector<8x1024xf32> to vector<8x512xf32>
    %361 = arith.addf %359, %360 : vector<8x512xf32>
    %c0_98 = arith.constant 0 : index
    %c0_99 = arith.constant 0 : index
    %362 = vector.load %arg6[%c0_98, %c0_99] : memref<1x512xf32, #tpu.memory_space<vmem>>, vector<1x512xf32>
    %363 = vector.broadcast %362 : vector<1x512xf32> to vector<8x512xf32>
    %364 = arith.addf %361, %363 : vector<8x512xf32>
    %365 = vector.extract_strided_slice %364 {offsets = [0, 0], sizes = [8, 128], strides = [1, 1]} : vector<8x512xf32> to vector<8x128xf32>
    %366 = arith.negf %365 : vector<8x128xf32>
    %367 = math.exp %366 : vector<8x128xf32>
    %cst_100 = arith.constant 1.000000e+00 : f32
    %368 = vector.broadcast %cst_100 : f32 to vector<8x128xf32>
    %369 = arith.addf %368, %367 : vector<8x128xf32>
    %370 = arith.divf %368, %369 : vector<8x128xf32>
    %371 = vector.extract_strided_slice %364 {offsets = [0, 128], sizes = [8, 128], strides = [1, 1]} : vector<8x512xf32> to vector<8x128xf32>
    %372 = arith.negf %371 : vector<8x128xf32>
    %373 = math.exp %372 : vector<8x128xf32>
    %cst_101 = arith.constant 1.000000e+00 : f32
    %374 = vector.broadcast %cst_101 : f32 to vector<8x128xf32>
    %375 = arith.addf %374, %373 : vector<8x128xf32>
    %376 = arith.divf %374, %375 : vector<8x128xf32>
    %377 = vector.extract_strided_slice %364 {offsets = [0, 256], sizes = [8, 128], strides = [1, 1]} : vector<8x512xf32> to vector<8x128xf32>
    %378 = math.tanh %377 : vector<8x128xf32>
    %379 = vector.extract_strided_slice %364 {offsets = [0, 384], sizes = [8, 128], strides = [1, 1]} : vector<8x512xf32> to vector<8x128xf32>
    %380 = arith.negf %379 : vector<8x128xf32>
    %381 = math.exp %380 : vector<8x128xf32>
    %cst_102 = arith.constant 1.000000e+00 : f32
    %382 = vector.broadcast %cst_102 : f32 to vector<8x128xf32>
    %383 = arith.addf %382, %381 : vector<8x128xf32>
    %384 = arith.divf %382, %383 : vector<8x128xf32>
    %385 = arith.mulf %376, %324 : vector<8x128xf32>
    %386 = arith.mulf %370, %378 : vector<8x128xf32>
    %387 = arith.addf %385, %386 : vector<8x128xf32>
    %388 = math.tanh %387 : vector<8x128xf32>
    %389 = arith.mulf %384, %388 : vector<8x128xf32>
    %390 = tpu.concatenate %357, %389 in 1 : vector<8x128xf32>, vector<8x128xf32> -> vector<8x256xf32>
    %c0_103 = arith.constant 0 : index
    %c0_104 = arith.constant 0 : index
    %391 = vector.load %arg3[%c0_103, %c0_104] : memref<256x1024xf32, #tpu.memory_space<vmem>>, vector<256x1024xf32>
    %cst_105 = arith.constant dense<0.000000e+00> : vector<8x1024xf32>
    %392 = tpu.matmul %390, %391, %cst_105 {dimension_numbers = #tpu.dot_dimension_numbers<[1], [0], [0], [1], [0, 0, 1, 1], [], []>} : vector<8x256xf32>, vector<256x1024xf32>, vector<8x1024xf32> -> vector<8x1024xf32>
    %c48 = arith.constant 48 : index
    %c0_106 = arith.constant 0 : index
    %393 = vector.load %arg10[%c48, %c0_106] : memref<64x512xf32, #tpu.memory_space<vmem>>, vector<8x512xf32>
    %394 = vector.extract_strided_slice %392 {offsets = [0, 0], sizes = [8, 512], strides = [1, 1]} : vector<8x1024xf32> to vector<8x512xf32>
    %395 = arith.addf %393, %394 : vector<8x512xf32>
    %396 = vector.extract_strided_slice %395 {offsets = [0, 0], sizes = [8, 128], strides = [1, 1]} : vector<8x512xf32> to vector<8x128xf32>
    %397 = arith.negf %396 : vector<8x128xf32>
    %398 = math.exp %397 : vector<8x128xf32>
    %cst_107 = arith.constant 1.000000e+00 : f32
    %399 = vector.broadcast %cst_107 : f32 to vector<8x128xf32>
    %400 = arith.addf %399, %398 : vector<8x128xf32>
    %401 = arith.divf %399, %400 : vector<8x128xf32>
    %402 = vector.extract_strided_slice %395 {offsets = [0, 128], sizes = [8, 128], strides = [1, 1]} : vector<8x512xf32> to vector<8x128xf32>
    %403 = arith.negf %402 : vector<8x128xf32>
    %404 = math.exp %403 : vector<8x128xf32>
    %cst_108 = arith.constant 1.000000e+00 : f32
    %405 = vector.broadcast %cst_108 : f32 to vector<8x128xf32>
    %406 = arith.addf %405, %404 : vector<8x128xf32>
    %407 = arith.divf %405, %406 : vector<8x128xf32>
    %408 = vector.extract_strided_slice %395 {offsets = [0, 256], sizes = [8, 128], strides = [1, 1]} : vector<8x512xf32> to vector<8x128xf32>
    %409 = math.tanh %408 : vector<8x128xf32>
    %410 = vector.extract_strided_slice %395 {offsets = [0, 384], sizes = [8, 128], strides = [1, 1]} : vector<8x512xf32> to vector<8x128xf32>
    %411 = arith.negf %410 : vector<8x128xf32>
    %412 = math.exp %411 : vector<8x128xf32>
    %cst_109 = arith.constant 1.000000e+00 : f32
    %413 = vector.broadcast %cst_109 : f32 to vector<8x128xf32>
    %414 = arith.addf %413, %412 : vector<8x128xf32>
    %415 = arith.divf %413, %414 : vector<8x128xf32>
    %416 = arith.mulf %407, %355 : vector<8x128xf32>
    %417 = arith.mulf %401, %409 : vector<8x128xf32>
    %418 = arith.addf %416, %417 : vector<8x128xf32>
    %419 = math.tanh %418 : vector<8x128xf32>
    %420 = arith.mulf %415, %419 : vector<8x128xf32>
    %c0_110 = arith.constant 0 : index
    %c0_111 = arith.constant 0 : index
    %421 = vector.load %arg5[%c0_110, %c0_111] : memref<128x512xf32, #tpu.memory_space<vmem>>, vector<128x512xf32>
    %cst_112 = arith.constant dense<0.000000e+00> : vector<8x512xf32>
    %422 = tpu.matmul %420, %421, %cst_112 {dimension_numbers = #tpu.dot_dimension_numbers<[1], [0], [0], [1], [0, 0, 1, 1], [], []>} : vector<8x128xf32>, vector<128x512xf32>, vector<8x512xf32> -> vector<8x512xf32>
    %423 = vector.extract_strided_slice %392 {offsets = [0, 512], sizes = [8, 512], strides = [1, 1]} : vector<8x1024xf32> to vector<8x512xf32>
    %424 = arith.addf %422, %423 : vector<8x512xf32>
    %c0_113 = arith.constant 0 : index
    %c0_114 = arith.constant 0 : index
    %425 = vector.load %arg6[%c0_113, %c0_114] : memref<1x512xf32, #tpu.memory_space<vmem>>, vector<1x512xf32>
    %426 = vector.broadcast %425 : vector<1x512xf32> to vector<8x512xf32>
    %427 = arith.addf %424, %426 : vector<8x512xf32>
    %428 = vector.extract_strided_slice %427 {offsets = [0, 0], sizes = [8, 128], strides = [1, 1]} : vector<8x512xf32> to vector<8x128xf32>
    %429 = arith.negf %428 : vector<8x128xf32>
    %430 = math.exp %429 : vector<8x128xf32>
    %cst_115 = arith.constant 1.000000e+00 : f32
    %431 = vector.broadcast %cst_115 : f32 to vector<8x128xf32>
    %432 = arith.addf %431, %430 : vector<8x128xf32>
    %433 = arith.divf %431, %432 : vector<8x128xf32>
    %434 = vector.extract_strided_slice %427 {offsets = [0, 128], sizes = [8, 128], strides = [1, 1]} : vector<8x512xf32> to vector<8x128xf32>
    %435 = arith.negf %434 : vector<8x128xf32>
    %436 = math.exp %435 : vector<8x128xf32>
    %cst_116 = arith.constant 1.000000e+00 : f32
    %437 = vector.broadcast %cst_116 : f32 to vector<8x128xf32>
    %438 = arith.addf %437, %436 : vector<8x128xf32>
    %439 = arith.divf %437, %438 : vector<8x128xf32>
    %440 = vector.extract_strided_slice %427 {offsets = [0, 256], sizes = [8, 128], strides = [1, 1]} : vector<8x512xf32> to vector<8x128xf32>
    %441 = math.tanh %440 : vector<8x128xf32>
    %442 = vector.extract_strided_slice %427 {offsets = [0, 384], sizes = [8, 128], strides = [1, 1]} : vector<8x512xf32> to vector<8x128xf32>
    %443 = arith.negf %442 : vector<8x128xf32>
    %444 = math.exp %443 : vector<8x128xf32>
    %cst_117 = arith.constant 1.000000e+00 : f32
    %445 = vector.broadcast %cst_117 : f32 to vector<8x128xf32>
    %446 = arith.addf %445, %444 : vector<8x128xf32>
    %447 = arith.divf %445, %446 : vector<8x128xf32>
    %448 = arith.mulf %439, %387 : vector<8x128xf32>
    %449 = arith.mulf %433, %441 : vector<8x128xf32>
    %450 = arith.addf %448, %449 : vector<8x128xf32>
    %451 = math.tanh %450 : vector<8x128xf32>
    %452 = arith.mulf %447, %451 : vector<8x128xf32>
    %453 = tpu.concatenate %420, %452 in 1 : vector<8x128xf32>, vector<8x128xf32> -> vector<8x256xf32>
    %c0_118 = arith.constant 0 : index
    %c0_119 = arith.constant 0 : index
    %454 = vector.load %arg3[%c0_118, %c0_119] : memref<256x1024xf32, #tpu.memory_space<vmem>>, vector<256x1024xf32>
    %cst_120 = arith.constant dense<0.000000e+00> : vector<8x1024xf32>
    %455 = tpu.matmul %453, %454, %cst_120 {dimension_numbers = #tpu.dot_dimension_numbers<[1], [0], [0], [1], [0, 0, 1, 1], [], []>} : vector<8x256xf32>, vector<256x1024xf32>, vector<8x1024xf32> -> vector<8x1024xf32>
    %c56 = arith.constant 56 : index
    %c0_121 = arith.constant 0 : index
    %456 = vector.load %arg10[%c56, %c0_121] : memref<64x512xf32, #tpu.memory_space<vmem>>, vector<8x512xf32>
    %457 = vector.extract_strided_slice %455 {offsets = [0, 0], sizes = [8, 512], strides = [1, 1]} : vector<8x1024xf32> to vector<8x512xf32>
    %458 = arith.addf %456, %457 : vector<8x512xf32>
    %459 = vector.extract_strided_slice %458 {offsets = [0, 0], sizes = [8, 128], strides = [1, 1]} : vector<8x512xf32> to vector<8x128xf32>
    %460 = arith.negf %459 : vector<8x128xf32>
    %461 = math.exp %460 : vector<8x128xf32>
    %cst_122 = arith.constant 1.000000e+00 : f32
    %462 = vector.broadcast %cst_122 : f32 to vector<8x128xf32>
    %463 = arith.addf %462, %461 : vector<8x128xf32>
    %464 = arith.divf %462, %463 : vector<8x128xf32>
    %465 = vector.extract_strided_slice %458 {offsets = [0, 128], sizes = [8, 128], strides = [1, 1]} : vector<8x512xf32> to vector<8x128xf32>
    %466 = arith.negf %465 : vector<8x128xf32>
    %467 = math.exp %466 : vector<8x128xf32>
    %cst_123 = arith.constant 1.000000e+00 : f32
    %468 = vector.broadcast %cst_123 : f32 to vector<8x128xf32>
    %469 = arith.addf %468, %467 : vector<8x128xf32>
    %470 = arith.divf %468, %469 : vector<8x128xf32>
    %471 = vector.extract_strided_slice %458 {offsets = [0, 256], sizes = [8, 128], strides = [1, 1]} : vector<8x512xf32> to vector<8x128xf32>
    %472 = math.tanh %471 : vector<8x128xf32>
    %473 = vector.extract_strided_slice %458 {offsets = [0, 384], sizes = [8, 128], strides = [1, 1]} : vector<8x512xf32> to vector<8x128xf32>
    %474 = arith.negf %473 : vector<8x128xf32>
    %475 = math.exp %474 : vector<8x128xf32>
    %cst_124 = arith.constant 1.000000e+00 : f32
    %476 = vector.broadcast %cst_124 : f32 to vector<8x128xf32>
    %477 = arith.addf %476, %475 : vector<8x128xf32>
    %478 = arith.divf %476, %477 : vector<8x128xf32>
    %479 = arith.mulf %470, %418 : vector<8x128xf32>
    %480 = arith.mulf %464, %472 : vector<8x128xf32>
    %481 = arith.addf %479, %480 : vector<8x128xf32>
    %482 = math.tanh %481 : vector<8x128xf32>
    %483 = arith.mulf %478, %482 : vector<8x128xf32>
    %c0_125 = arith.constant 0 : index
    %c0_126 = arith.constant 0 : index
    %484 = vector.load %arg5[%c0_125, %c0_126] : memref<128x512xf32, #tpu.memory_space<vmem>>, vector<128x512xf32>
    %cst_127 = arith.constant dense<0.000000e+00> : vector<8x512xf32>
    %485 = tpu.matmul %483, %484, %cst_127 {dimension_numbers = #tpu.dot_dimension_numbers<[1], [0], [0], [1], [0, 0, 1, 1], [], []>} : vector<8x128xf32>, vector<128x512xf32>, vector<8x512xf32> -> vector<8x512xf32>
    %486 = vector.extract_strided_slice %455 {offsets = [0, 512], sizes = [8, 512], strides = [1, 1]} : vector<8x1024xf32> to vector<8x512xf32>
    %487 = arith.addf %485, %486 : vector<8x512xf32>
    %c0_128 = arith.constant 0 : index
    %c0_129 = arith.constant 0 : index
    %488 = vector.load %arg6[%c0_128, %c0_129] : memref<1x512xf32, #tpu.memory_space<vmem>>, vector<1x512xf32>
    %489 = vector.broadcast %488 : vector<1x512xf32> to vector<8x512xf32>
    %490 = arith.addf %487, %489 : vector<8x512xf32>
    %491 = vector.extract_strided_slice %490 {offsets = [0, 0], sizes = [8, 128], strides = [1, 1]} : vector<8x512xf32> to vector<8x128xf32>
    %492 = arith.negf %491 : vector<8x128xf32>
    %493 = math.exp %492 : vector<8x128xf32>
    %cst_130 = arith.constant 1.000000e+00 : f32
    %494 = vector.broadcast %cst_130 : f32 to vector<8x128xf32>
    %495 = arith.addf %494, %493 : vector<8x128xf32>
    %496 = arith.divf %494, %495 : vector<8x128xf32>
    %497 = vector.extract_strided_slice %490 {offsets = [0, 128], sizes = [8, 128], strides = [1, 1]} : vector<8x512xf32> to vector<8x128xf32>
    %498 = arith.negf %497 : vector<8x128xf32>
    %499 = math.exp %498 : vector<8x128xf32>
    %cst_131 = arith.constant 1.000000e+00 : f32
    %500 = vector.broadcast %cst_131 : f32 to vector<8x128xf32>
    %501 = arith.addf %500, %499 : vector<8x128xf32>
    %502 = arith.divf %500, %501 : vector<8x128xf32>
    %503 = vector.extract_strided_slice %490 {offsets = [0, 256], sizes = [8, 128], strides = [1, 1]} : vector<8x512xf32> to vector<8x128xf32>
    %504 = math.tanh %503 : vector<8x128xf32>
    %505 = vector.extract_strided_slice %490 {offsets = [0, 384], sizes = [8, 128], strides = [1, 1]} : vector<8x512xf32> to vector<8x128xf32>
    %506 = arith.negf %505 : vector<8x128xf32>
    %507 = math.exp %506 : vector<8x128xf32>
    %cst_132 = arith.constant 1.000000e+00 : f32
    %508 = vector.broadcast %cst_132 : f32 to vector<8x128xf32>
    %509 = arith.addf %508, %507 : vector<8x128xf32>
    %510 = arith.divf %508, %509 : vector<8x128xf32>
    %511 = arith.mulf %502, %450 : vector<8x128xf32>
    %512 = arith.mulf %496, %504 : vector<8x128xf32>
    %513 = arith.addf %511, %512 : vector<8x128xf32>
    %514 = math.tanh %513 : vector<8x128xf32>
    %515 = arith.mulf %510, %514 : vector<8x128xf32>
    %c0_133 = arith.constant 0 : index
    %c0_134 = arith.constant 0 : index
    %516 = vector.load %arg7[%c0_133, %c0_134] : memref<1x128xf32, #tpu.memory_space<vmem>>, vector<1x128xf32>
    %517 = vector.broadcast %516 : vector<1x128xf32> to vector<8x128xf32>
    %518 = arith.mulf %515, %517 : vector<8x128xf32>
    %cst_135 = arith.constant dense<0.000000e+00> : vector<8xf32>
    %519 = vector.multi_reduction <add>, %518, %cst_135 [1] : vector<8x128xf32> to vector<8xf32>
    %520 = vector.shape_cast %519 : vector<8xf32> to vector<8x1xf32>
    %c0_136 = arith.constant 0 : index
    %c0_137 = arith.constant 0 : index
    %521 = vector.load %arg8[%c0_136, %c0_137] : memref<1x1xf32, #tpu.memory_space<vmem>>, vector<1x1xf32>
    %522 = vector.broadcast %521 : vector<1x1xf32> to vector<8x1xf32>
    %523 = arith.addf %520, %522 : vector<8x1xf32>
    %524 = arith.negf %523 : vector<8x1xf32>
    %525 = math.exp %524 : vector<8x1xf32>
    %cst_138 = arith.constant 1.000000e+00 : f32
    %526 = vector.broadcast %cst_138 : f32 to vector<8x1xf32>
    %527 = arith.addf %526, %525 : vector<8x1xf32>
    %528 = arith.divf %526, %527 : vector<8x1xf32>
    %c0_139 = arith.constant 0 : index
    %c0_140 = arith.constant 0 : index
    %529 = vector.load %arg9[%c0_139, %c0_140] : memref<8x1xf32, #tpu.memory_space<vmem>>, vector<8x1xf32>
    tpu.vector_store %arg9[%c0_139, %c0_140], %528 {strides = array<i32>} : memref<8x1xf32, #tpu.memory_space<vmem>>, vector<8x1xf32>,
    return
  }
  func.func @transform_0(%arg0: i32) -> (i32, i32, i32) {
    %c0_i32 = arith.constant 0 : i32
    %c0_i32_0 = arith.constant 0 : i32
    %c0_i32_1 = arith.constant 0 : i32
    return %arg0, %c0_i32, %c0_i32_0 : i32, i32, i32
  }
  func.func @transform_1(%arg0: i32) -> (i32, i32) {
    %c0_i32 = arith.constant 0 : i32
    %c0_i32_0 = arith.constant 0 : i32
    %c0_i32_1 = arith.constant 0 : i32
    return %c0_i32, %c0_i32_0 : i32, i32
  }
  func.func @transform_2(%arg0: i32) -> (i32, i32) {
    %c0_i32 = arith.constant 0 : i32
    %c0_i32_0 = arith.constant 0 : i32
    %c0_i32_1 = arith.constant 0 : i32
    return %c0_i32, %c0_i32_0 : i32, i32
  }
  func.func @transform_3(%arg0: i32) -> (i32, i32) {
    %c0_i32 = arith.constant 0 : i32
    %c0_i32_0 = arith.constant 0 : i32
    %c0_i32_1 = arith.constant 0 : i32
    return %c0_i32, %c0_i32_0 : i32, i32
  }
  func.func @transform_4(%arg0: i32) -> (i32, i32) {
    %c0_i32 = arith.constant 0 : i32
    %c0_i32_0 = arith.constant 0 : i32
    %c0_i32_1 = arith.constant 0 : i32
    return %c0_i32, %c0_i32_0 : i32, i32
  }
  func.func @transform_5(%arg0: i32) -> (i32, i32) {
    %c0_i32 = arith.constant 0 : i32
    %c0_i32_0 = arith.constant 0 : i32
    %c0_i32_1 = arith.constant 0 : i32
    return %c0_i32, %c0_i32_0 : i32, i32
  }
  func.func @transform_6(%arg0: i32) -> (i32, i32) {
    %c0_i32 = arith.constant 0 : i32
    %c0_i32_0 = arith.constant 0 : i32
    %c0_i32_1 = arith.constant 0 : i32
    return %c0_i32, %c0_i32_0 : i32, i32
  }
  func.func @transform_7(%arg0: i32) -> (i32, i32) {
    %c0_i32 = arith.constant 0 : i32
    %c0_i32_0 = arith.constant 0 : i32
    %c0_i32_1 = arith.constant 0 : i32
    return %c0_i32, %c0_i32_0 : i32, i32
  }
  func.func @transform_8(%arg0: i32) -> (i32, i32) {
    %c0_i32 = arith.constant 0 : i32
    %c0_i32_0 = arith.constant 0 : i32
    return %arg0, %c0_i32 : i32, i32
  }
}

</mosaic_0001>

<bundles_post_ra>
// kernel: tpu_custom_call.1
= control target key start
LH: loop header
LB: loop body
LE: loop exit
PB: predicated region body
PF: predicated region fallthrough
CT: control target
= control target key end

     0   :  { %s9673_s0 = inlined_call_operand.vmem [shape: f32[1,64,8], index: 0, kind: input, shape index: {}]   ;;  %s9674_s1 = inlined_call_operand.vmem [shape: f32[8,512], index: 1, kind: input, shape index: {}]   ;;  %s9675_s2 = inlined_call_operand.hbm [shape: f32[256,1024], index: 2, kind: input, shape index: {}]   ;;  %s9676_s3 = inlined_call_operand.vmem [shape: f32[1,512], index: 3, kind: input, shape index: {}]   ;;  %s9677_s4 = inlined_call_operand.hbm [shape: f32[128,512], index: 4, kind: input, shape index: {}]   ;;  %s9678_s5 = inlined_call_operand.vmem [shape: f32[1,512], index: 5, kind: input, shape index: {}]   ;;  %s9679_s6 = inlined_call_operand.vmem [shape: f32[1,128], index: 6, kind: input, shape index: {}]   ;;  %s9680_s7 = inlined_call_operand.<no memory space> [shape: f32[1,1], index: 7, kind: input, shape index: {}]   ;;  %s9681_s8 = inlined_call_operand.vmem [shape: f32[8,1], index: 8, kind: output, shape index: {}]  }
   0x1   :  { %v13_v0 = vstv %s9680_s7 }
   0x2   :  { %14 = vst [vmem:[#allocation3] sm:$0x1] %v13_v0 }
   0x3   :  { %15 = vsyncpa [#allocation5], 0 }
   0x4   :  { %16 = vsyncpa [#allocation7], 0  ;;  %s7676_s29 = smov [#allocation4]   ;;  %s7628_s11 = scalar_lea.hbm %s9675_s2, 32768 }
   0x5   :  { %s26_s30 = sshll.u32 %s7676_s29, 4  ;;  %p7629_p0 = scmp.ne.s32.totalorder %s9675_s2, %s7628_s11  ;;  %s27_s30 = int_to_ptr.vmem [resolvable:$true] %s26_s30 }
   0x6   :  { %p7632_p1 = scmp.lt.u32.totalorder %s7628_s11, %s9675_s2 }
   0x8   :  { %p7634_p2 = pnand %p7632_p1, %p7629_p0 }
   0xa   :  { %7637 = shalt.err (!%p7634_p2)
}
   0xb   :  { %s7638_s7 = scalar_lea.vmem %s27_s30, 32768  ;;  %p7643_p4 = scmp.lt.s32.totalorder %s27_s30, %s27_s30 }
   0xc   :  { %p7639_p3 = scmp.ne.s32.totalorder %s27_s30, %s7638_s7  ;;  %p7644_p5 = scmp.lt.s32.totalorder %s7638_s7, %s7638_s7 }
   0xe   :  { %p7645_p6 = por %p7644_p5, %p7643_p4 }
  0x10   :  { %p7646_p7 = pnand %p7645_p6, %p7639_p3 }
  0x12   :  { %7649 = shalt.err (!%p7646_p7)
}
  0x13   :  { %s7677_s16 = smov 1024   ;;  %s7678_s17 = smov 64  }
  0x14   :  { %32 = dma.hbm_to_vmem [thread:$0]  %s9675_s2, 32768, %s27_s30, [#allocation5], %s7677_s16, %s7677_s16, %s7678_s17  }
  0x15   :  { %s7679_s20 = smov [#allocation6]   ;;  %s7650_s24 = scalar_lea.hbm %s9677_s4, 8192 }
  0x16   :  { %s40_s21 = sshll.u32 %s7679_s20, 4  ;;  %p7651_p8 = scmp.ne.s32.totalorder %s9677_s4, %s7650_s24  ;;  %s41_s21 = int_to_ptr.vmem [resolvable:$true] %s40_s21 }
  0x17   :  { %p7654_p9 = scmp.lt.u32.totalorder %s7650_s24, %s9677_s4 }
  0x19   :  { %p7656_p10 = pnand %p7654_p9, %p7651_p8 }
  0x1b   :  { %7659 = shalt.err (!%p7656_p10)
}
  0x1c   :  { %s7660_s29 = scalar_lea.vmem %s41_s21, 8192  ;;  %p7665_p12 = scmp.lt.s32.totalorder %s41_s21, %s41_s21 }
  0x1d   :  { %p7661_p11 = scmp.ne.s32.totalorder %s41_s21, %s7660_s29  ;;  %p7666_p13 = scmp.lt.s32.totalorder %s7660_s29, %s7660_s29 }
  0x1f   :  { %p7667_p0 = por %p7666_p13, %p7665_p12 }
  0x21   :  { %p7668_p1 = pnand %p7667_p0, %p7661_p11 }
  0x23   :  { %7671 = shalt.err (!%p7668_p1)
}
  0x24   :  { %s7680_s2 = smov 512   ;;  %s7681_s30 = smov 32  }
  0x25   :  { %46 = dma.hbm_to_vmem [thread:$0]  %s9677_s4, 8192, %s41_s21, [#allocation7], %s7680_s2, %s7680_s2, %s7681_s30  }
  0x26   :  { %7672 = dma.done.wait [#allocation5], 32768  }
  0x27   :  { %7673 = vsyncadd [#allocation5], 4294934528 }
  0x28   :  { %7674 = dma.done.wait [#allocation7], 8192  }
  0x29   :  { %7675 = vsyncadd [#allocation7], 4294959104  ;;  %v9682_v1 = vmov 0.0   ;;  %v68_v2 = vld [vmem:[%s9674_s1 + $0x8] sm:$0xff]  ;;  %v70_v3 = vld [vmem:[%s9674_s1 + $0x18] sm:$0xff]  ;;  %vm93_vm0 = vcmask 64512  }
  0x2a   :  { %182 = vmatprep.mubr.f32.mxu0 %v9682_v1  ;;  %295 = vmatprep.mubr.f32.mxu1 %v9682_v1  ;;  %v67_v4 = vld [vmem:[%s9674_s1] sm:$0xff]  ;;  %v69_v5 = vld [vmem:[%s9674_s1 + $0x10] sm:$0xff]  ;;  %vm4630_vm1 = vcmask 7168  }
  0x2b   :  { %118 = vmatprep.subr.mxu0 %v68_v2  ;;  %231 = vmatprep.subr.mxu1 %v70_v3  ;;  %v377_v6 = vld [vmem:[#allocation4 + $0x8] sm:$0xff]  ;;  %v379_v9 = vld [vmem:[#allocation4 + $0x18] sm:$0xff]  ;;  %v376_v13 = vld [vmem:[#allocation4] sm:$0xff] }
  0x2c   :  { %v385_v7 = vld [vmem:[#allocation4 + $0x48] sm:$0xff]  ;;  %119 = vmatpush1.msra.mxu0 %v67_v4  ;;  %232 = vmatpush1.msra.mxu1 %v69_v5  ;;  %v387_v10 = vld [vmem:[#allocation4 + $0x58] sm:$0xff]  ;;  %v384_v14 = vld [vmem:[#allocation4 + $0x40] sm:$0xff] }
  0x2d   :  { %v7769_v8 = vpack.c.bf16 %v385_v7, %v377_v6  ;;  %v59_v11 = vld [vmem:[%s9673_s0] sm:$0xff]  ;;  %v7774_v12 = vpack.c.bf16 %v387_v10, %v379_v9  ;;  %v378_v15 = vld [vmem:[#allocation4 + $0x10] sm:$0xff]  ;;  %v7779_v16 = vpack.c.bf16 %v384_v14, %v376_v13  ;;  %v393_v18 = vld [vmem:[#allocation4 + $0x88] sm:$0xff] }
  0x2e   :  { %4638 = vmatmul.mubr.msk.f32.vlgmr.msra.gmra.mrb[0].mxu0 %vm93_vm0, %v59_v11  ;;  %4646 = vmatmul.mubr.msk.f32.vlgmr.msra.gmra.mrb[0].mxu1 %vm93_vm0, %v59_v11  ;;  %v386_v17 = vld [vmem:[#allocation4 + $0x50] sm:$0xff]  ;;  %v401_v19 = vld [vmem:[#allocation4 + $0xc8] sm:$0xff]  ;;  %v395_v22 = vld [vmem:[#allocation4 + $0x98] sm:$0xff] }
  0x2f   :  { %9962 = vst [vmem:[#allocation10_spill] sm:$0xff] %v7769_v8  ;;  %9963 = vst [vmem:[#allocation11_spill] sm:$0xff] %v7774_v12  ;;  %4706 = vmatprep.subr.bf16.mxu0 %v7769_v8  ;;  %188 = vmatprep.mubr.f32.mxu0 %v9682_v1  ;;  %v7783_v20 = vpack.c.bf16 %v386_v17, %v378_v15  ;;  %v7785_v21 = vpack.c.bf16 %v401_v19, %v393_v18  ;;  %v403_v23 = vld [vmem:[#allocation4 + $0xd8] sm:$0xff]  ;;  %v392_v24 = vld [vmem:[#allocation4 + $0x80] sm:$0xff] }
  0x30   :  { %4770 = vmatprep.subr.bf16.mxu1 %v7774_v12  ;;  %301 = vmatprep.mubr.f32.mxu1 %v9682_v1  ;;  %v7789_v25 = vpack.c.bf16 %v403_v23, %v395_v22  ;;  %v400_v26 = vld [vmem:[#allocation4 + $0xc0] sm:$0xff]  ;;  %v394_v27 = vld [vmem:[#allocation4 + $0x90] sm:$0xff]  ;;  %v409_v31 = vld [vmem:[#allocation4 + $0x108] sm:$0xff] }
  0x31   :  { %4708 = vmatpush1.bf16.msra.mxu0 %v7779_v16  ;;  %v402_v28 = vld [vmem:[#allocation4 + $0xd0] sm:$0xff]  ;;  %4772 = vmatpush1.bf16.msra.mxu1 %v7783_v20  ;;  %v7793_v29 = vpack.c.bf16 %v400_v26, %v392_v24  ;;  %v417_v32 = vld [vmem:[#allocation4 + $0x148] sm:$0xff]  ;;  %v411_v33 = vld [vmem:[#allocation4 + $0x118] sm:$0xff] }
  0x32   :  { %4710 = vmatprep.subr.bf16.mxu0 %v7785_v21  ;;  %v7795_v30 = vpack.c.bf16 %v402_v28, %v394_v27  ;;  %4774 = vmatprep.subr.bf16.mxu1 %v7789_v25  ;;  %v7798_v34 = vpack.c.bf16 %v417_v32, %v409_v31  ;;  %v419_v35 = vld [vmem:[#allocation4 + $0x158] sm:$0xff]  ;;  %v408_v36 = vld [vmem:[#allocation4 + $0x100] sm:$0xff]  ;;  %v410_v39 = vld [vmem:[#allocation4 + $0x110] sm:$0xff] }
  0x33   :  { %v416_v37 = vld [vmem:[#allocation4 + $0x140] sm:$0xff]  ;;  %v7800_v38 = vpack.c.bf16 %v419_v35, %v411_v33  ;;  %v418_v40 = vld [vmem:[#allocation4 + $0x150] sm:$0xff]  ;;  %v425_v41 = vld [vmem:[#allocation4 + $0x188] sm:$0xff] }
  0x34   :  { %v7803_v42 = vpack.c.bf16 %v416_v37, %v408_v36  ;;  %v433_v43 = vld [vmem:[#allocation4 + $0x1c8] sm:$0xff]  ;;  %v427_v44 = vld [vmem:[#allocation4 + $0x198] sm:$0xff]  ;;  %v7807_v46 = vpack.c.bf16 %v418_v40, %v410_v39  ;;  %v424_v48 = vld [vmem:[#allocation4 + $0x180] sm:$0xff] }
  0x35   :  { %4712 = vmatpush1.bf16.msra.mxu0 %v7793_v29  ;;  %v435_v45 = vld [vmem:[#allocation4 + $0x1d8] sm:$0xff]  ;;  %4776 = vmatpush1.bf16.msra.mxu1 %v7795_v30  ;;  %v7809_v47 = vpack.c.bf16 %v433_v43, %v425_v41  ;;  %v432_v49 = vld [vmem:[#allocation4 + $0x1c0] sm:$0xff]  ;;  %v426_v50 = vld [vmem:[#allocation4 + $0x190] sm:$0xff] }
  0x36   :  { %4714 = vmatprep.subr.bf16.mxu0 %v7798_v34  ;;  %4778 = vmatprep.subr.bf16.mxu1 %v7800_v38  ;;  %v7812_v51 = vpack.c.bf16 %v435_v45, %v427_v44  ;;  %v434_v52 = vld [vmem:[#allocation4 + $0x1d0] sm:$0xff]  ;;  %v441_v53 = vld [vmem:[#allocation4 + $0x208] sm:$0xff]  ;;  %v443_v55 = vld [vmem:[#allocation4 + $0x218] sm:$0xff]  ;;  %v7815_v57 = vpack.c.bf16 %v432_v49, %v424_v48 }
  0x37   :  { %v449_v54 = vld [vmem:[#allocation4 + $0x248] sm:$0xff]  ;;  %v451_v56 = vld [vmem:[#allocation4 + $0x258] sm:$0xff]  ;;  %v7819_v58 = vpack.c.bf16 %v434_v52, %v426_v50  ;;  %v440_v60 = vld [vmem:[#allocation4 + $0x200] sm:$0xff] }
  0x38   :  { %v7821_v59 = vpack.c.bf16 %v449_v54, %v441_v53  ;;  %v448_v61 = vld [vmem:[#allocation4 + $0x240] sm:$0xff]  ;;  %v442_v62 = vld [vmem:[#allocation4 + $0x210] sm:$0xff]  ;;  %v7824_v63 = vpack.c.bf16 %v451_v56, %v443_v55  ;;  %v457_v2 = vld [vmem:[#allocation4 + $0x288] sm:$0xff] }
  0x39   :  { %4716 = vmatpush1.bf16.msra.mxu0 %v7803_v42  ;;  %4780 = vmatpush1.bf16.msra.mxu1 %v7807_v46  ;;  %v450_v0 = vld [vmem:[#allocation4 + $0x250] sm:$0xff]  ;;  %v465_v3 = vld [vmem:[#allocation4 + $0x2c8] sm:$0xff]  ;;  %v459_v4 = vld [vmem:[#allocation4 + $0x298] sm:$0xff]  ;;  %v7827_v6 = vpack.c.bf16 %v448_v61, %v440_v60 }
  0x3a   :  { %4718 = vmatprep.subr.bf16.mxu0 %v7809_v47  ;;  %4782 = vmatprep.subr.bf16.mxu1 %v7812_v51  ;;  %v467_v5 = vld [vmem:[#allocation4 + $0x2d8] sm:$0xff]  ;;  %v7831_v7 = vpack.c.bf16 %v450_v0, %v442_v62  ;;  %v7833_v9 = vpack.c.bf16 %v465_v3, %v457_v2  ;;  %v456_v10 = vld [vmem:[#allocation4 + $0x280] sm:$0xff]  ;;  %v458_v13 = vld [vmem:[#allocation4 + $0x290] sm:$0xff] }
  0x3b   :  { %v464_v11 = vld [vmem:[#allocation4 + $0x2c0] sm:$0xff]  ;;  %v7836_v14 = vpack.c.bf16 %v467_v5, %v459_v4  ;;  %v466_v15 = vld [vmem:[#allocation4 + $0x2d0] sm:$0xff]  ;;  %v473_v17 = vld [vmem:[#allocation4 + $0x308] sm:$0xff] }
  0x3c   :  { %v481_v18 = vld [vmem:[#allocation4 + $0x348] sm:$0xff]  ;;  %v475_v19 = vld [vmem:[#allocation4 + $0x318] sm:$0xff]  ;;  %v7839_v23 = vpack.c.bf16 %v464_v11, %v456_v10  ;;  %v7843_v24 = vpack.c.bf16 %v466_v15, %v458_v13  ;;  %v472_v27 = vld [vmem:[#allocation4 + $0x300] sm:$0xff] }
  0x3d   :  { %4720 = vmatpush1.bf16.msra.mxu0 %v7815_v57  ;;  %4784 = vmatpush1.bf16.msra.mxu1 %v7819_v58  ;;  %v483_v22 = vld [vmem:[#allocation4 + $0x358] sm:$0xff]  ;;  %v7845_v26 = vpack.c.bf16 %v481_v18, %v473_v17  ;;  %v480_v28 = vld [vmem:[#allocation4 + $0x340] sm:$0xff]  ;;  %v474_v31 = vld [vmem:[#allocation4 + $0x310] sm:$0xff] }
  0x3e   :  { %4722 = vmatprep.subr.bf16.mxu0 %v7821_v59  ;;  %4786 = vmatprep.subr.bf16.mxu1 %v7824_v63  ;;  %v7848_v32 = vpack.c.bf16 %v483_v22, %v475_v19  ;;  %v482_v33 = vld [vmem:[#allocation4 + $0x350] sm:$0xff]  ;;  %v489_v35 = vld [vmem:[#allocation4 + $0x388] sm:$0xff]  ;;  %v491_v37 = vld [vmem:[#allocation4 + $0x398] sm:$0xff]  ;;  %v7854_v41 = vpack.c.bf16 %v480_v28, %v472_v27 }
  0x3f   :  { %v497_v36 = vld [vmem:[#allocation4 + $0x3c8] sm:$0xff]  ;;  %v499_v39 = vld [vmem:[#allocation4 + $0x3d8] sm:$0xff]  ;;  %v488_v43 = vld [vmem:[#allocation4 + $0x380] sm:$0xff]  ;;  %v7859_v44 = vpack.c.bf16 %v482_v33, %v474_v31 }
  0x40   :  { %v60_v40 = vld [vmem:[%s9673_s0 + $0x8] sm:$0xff]  ;;  %v7861_v45 = vpack.c.bf16 %v497_v36, %v489_v35  ;;  %v490_v49 = vld [vmem:[#allocation4 + $0x390] sm:$0xff]  ;;  %v7864_v52 = vpack.c.bf16 %v499_v39, %v491_v37  ;;  %v507_v56 = vld [vmem:[#allocation4 + $0x418] sm:$0xff] }
  0x41   :  { %4724 = vmatpush1.bf16.msra.mxu0 %v7827_v6  ;;  %4788 = vmatpush1.bf16.msra.mxu1 %v7831_v7  ;;  %v496_v48 = vld [vmem:[#allocation4 + $0x3c0] sm:$0xff]  ;;  %v498_v50 = vld [vmem:[#allocation4 + $0x3d0] sm:$0xff]  ;;  %v505_v53 = vld [vmem:[#allocation4 + $0x408] sm:$0xff] }
  0x42   :  { %4726 = vmatprep.subr.bf16.mxu0 %v7833_v9  ;;  %4790 = vmatprep.subr.bf16.mxu1 %v7836_v14  ;;  %v513_v54 = vld [vmem:[#allocation4 + $0x448] sm:$0xff]  ;;  %v515_v60 = vld [vmem:[#allocation4 + $0x458] sm:$0xff]  ;;  %v7873_v61 = vpack.c.bf16 %v496_v48, %v488_v43  ;;  %v504_v62 = vld [vmem:[#allocation4 + $0x400] sm:$0xff]  ;;  %v7878_v0 = vpack.c.bf16 %v498_v50, %v490_v49 }
  0x43   :  { %4647 = vmatmul.mubr.msk.f32.gmra.mrb[2].mxu1 %vm93_vm0, %v60_v40  ;;  %4639 = vmatmul.mubr.msk.f32.gmra.mrb[2].mxu0 %vm93_vm0, %v60_v40  ;;  %v61_v55 = vld [vmem:[%s9673_s0 + $0x10] sm:$0xff]  ;;  %v7880_v2 = vpack.c.bf16 %v513_v54, %v505_v53  ;;  %v512_v3 = vld [vmem:[#allocation4 + $0x440] sm:$0xff]  ;;  %v62_v5 = vld [vmem:[%s9673_s0 + $0x18] sm:$0xff]  ;;  %v7886_v10 = vpack.c.bf16 %v515_v60, %v507_v56 }
  0x44   :  { %194 = vmatprep.mubr.f32.mxu0 %v9682_v1  ;;  %307 = vmatprep.mubr.f32.mxu1 %v9682_v1  ;;  %v506_v4 = vld [vmem:[#allocation4 + $0x410] sm:$0xff]  ;;  %v521_v13 = vld [vmem:[#allocation4 + $0x488] sm:$0xff]  ;;  %v523_v17 = vld [vmem:[#allocation4 + $0x498] sm:$0xff]  ;;  %v7892_v19 = vpack.c.bf16 %v512_v3, %v504_v62 }
  0x45   :  { %4728 = vmatpush1.bf16.msra.mxu0 %v7839_v23  ;;  %4792 = vmatpush1.bf16.msra.mxu1 %v7843_v24  ;;  %9964 = vst [vmem:[#allocation12_spill] sm:$0xff] %v7886_v10  ;;  %v514_v11 = vld [vmem:[#allocation4 + $0x450] sm:$0xff]  ;;  %v529_v15 = vld [vmem:[#allocation4 + $0x4c8] sm:$0xff]  ;;  %v531_v18 = vld [vmem:[#allocation4 + $0x4d8] sm:$0xff] }
  0x46   :  { %4730 = vmatprep.subr.bf16.mxu0 %v7845_v26  ;;  %4794 = vmatprep.subr.bf16.mxu1 %v7848_v32  ;;  %9965 = vst [vmem:[#allocation13_spill] sm:$0xff] %v7892_v19  ;;  %v520_v22 = vld [vmem:[#allocation4 + $0x480] sm:$0xff]  ;;  %v7897_v27 = vpack.c.bf16 %v514_v11, %v506_v4  ;;  %v7899_v28 = vpack.c.bf16 %v529_v15, %v521_v13  ;;  %v522_v33 = vld [vmem:[#allocation4 + $0x490] sm:$0xff]  ;;  %v537_v39 = vld [vmem:[#allocation4 + $0x508] sm:$0xff] }
  0x47   :  { %4648 = vmatmul.mubr.msk.f32.gmra.mrb[4].mxu1 %vm93_vm0, %v61_v55  ;;  %4640 = vmatmul.mubr.msk.f32.gmra.mrb[4].mxu0 %vm93_vm0, %v61_v55  ;;  %v528_v31 = vld [vmem:[#allocation4 + $0x4c0] sm:$0xff]  ;;  %v7905_v36 = vpack.c.bf16 %v531_v18, %v523_v17  ;;  %v530_v37 = vld [vmem:[#allocation4 + $0x4d0] sm:$0xff]  ;;  %v545_v40 = vld [vmem:[#allocation4 + $0x548] sm:$0xff] }
  0x48   :  { %200 = vmatprep.mubr.f32.mxu0 %v9682_v1  ;;  %313 = vmatprep.mubr.f32.mxu1 %v9682_v1  ;;  %9966 = vst [vmem:[#allocation14_spill] sm:$0xff] %v7897_v27  ;;  %9967 = vst [vmem:[#allocation15_spill] sm:$0xff] %v7899_v28  ;;  %v63_v35 = vld [vmem:[%s9673_s0 + $0x20] sm:$0xff]  ;;  %v7911_v49 = vpack.c.bf16 %v528_v31, %v520_v22  ;;  %v7916_v53 = vpack.c.bf16 %v530_v37, %v522_v33  ;;  %v538_v56 = vld [vmem:[#allocation4 + $0x510] sm:$0xff] }
  0x49   :  { %4732 = vmatpush1.bf16.msra.mxu0 %v7854_v41  ;;  %4796 = vmatpush1.bf16.msra.mxu1 %v7859_v44  ;;  %9968 = vst [vmem:[#allocation16_spill] sm:$0xff] %v7905_v36  ;;  %v539_v43 = vld [vmem:[#allocation4 + $0x518] sm:$0xff]  ;;  %v536_v50 = vld [vmem:[#allocation4 + $0x500] sm:$0xff]  ;;  %v7918_v54 = vpack.c.bf16 %v545_v40, %v537_v39  ;;  %v546_v3 = vld [vmem:[#allocation4 + $0x550] sm:$0xff] }
  0x4a   :  { %4734 = vmatprep.subr.bf16.mxu0 %v7861_v45  ;;  %4798 = vmatprep.subr.bf16.mxu1 %v7864_v52  ;;  %v547_v48 = vld [vmem:[#allocation4 + $0x558] sm:$0xff]  ;;  %9969 = vst [vmem:[#allocation17_spill] sm:$0xff] %v7911_v49  ;;  %9970 = vst [vmem:[#allocation18_spill] sm:$0xff] %v7916_v53  ;;  %v544_v55 = vld [vmem:[#allocation4 + $0x540] sm:$0xff]  ;;  %v7935_v18 = vpack.c.bf16 %v546_v3, %v538_v56 }
  0x4b   :  { %4649 = vmatmul.mubr.msk.f32.gmra.mrb[6].mxu1 %vm93_vm0, %v62_v5  ;;  %4641 = vmatmul.mubr.msk.f32.gmra.mrb[6].mxu0 %vm93_vm0, %v62_v5  ;;  %9971 = vst [vmem:[#allocation19_spill] sm:$0xff] %v7918_v54  ;;  %v64_v60 = vld [vmem:[%s9673_s0 + $0x28] sm:$0xff]  ;;  %v7924_v62 = vpack.c.bf16 %v547_v48, %v539_v43  ;;  %v555_v11 = vld [vmem:[#allocation4 + $0x598] sm:$0xff]  ;;  %v7930_v15 = vpack.c.bf16 %v544_v55, %v536_v50  ;;  %v554_v33 = vld [vmem:[#allocation4 + $0x590] sm:$0xff] }
  0x4c   :  { %206 = vmatprep.mubr.f32.mxu0 %v9682_v1  ;;  %319 = vmatprep.mubr.f32.mxu1 %v9682_v1  ;;  %v553_v4 = vld [vmem:[#allocation4 + $0x588] sm:$0xff]  ;;  %v563_v13 = vld [vmem:[#allocation4 + $0x5d8] sm:$0xff]  ;;  %v552_v17 = vld [vmem:[#allocation4 + $0x580] sm:$0xff]  ;;  %9974 = vst [vmem:[#allocation22_spill] sm:$0xff] %v7935_v18 }
  0x4d   :  { %4736 = vmatpush1.bf16.msra.mxu0 %v7873_v61  ;;  %4800 = vmatpush1.bf16.msra.mxu1 %v7878_v0  ;;  %9972 = vst [vmem:[#allocation20_spill] sm:$0xff] %v7924_v62  ;;  %v561_v5 = vld [vmem:[#allocation4 + $0x5c8] sm:$0xff]  ;;  %9973 = vst [vmem:[#allocation21_spill] sm:$0xff] %v7930_v15  ;;  %v560_v31 = vld [vmem:[#allocation4 + $0x5c0] sm:$0xff]  ;;  %v7943_v37 = vpack.c.bf16 %v563_v13, %v555_v11 }
  0x4e   :  { %4738 = vmatprep.subr.bf16.mxu0 %v7880_v2  ;;  %4802 = vmatprep.subr.bf16.mxu1 %v7886_v10  ;;  %v7937_v22 = vpack.c.bf16 %v561_v5, %v553_v4  ;;  %v562_v39 = vld [vmem:[#allocation4 + $0x5d0] sm:$0xff]  ;;  %v569_v40 = vld [vmem:[#allocation4 + $0x608] sm:$0xff]  ;;  %v571_v48 = vld [vmem:[#allocation4 + $0x618] sm:$0xff]  ;;  %v7949_v55 = vpack.c.bf16 %v560_v31, %v552_v17 }
  0x4f   :  { %4650 = vmatmul.mubr.msk.f32.gmra.mrb[8].mxu1 %vm93_vm0, %v63_v35  ;;  %4642 = vmatmul.mubr.msk.f32.gmra.mrb[8].mxu0 %vm93_vm0, %v63_v35  ;;  %v65_v35 = vld [vmem:[%s9673_s0 + $0x30] sm:$0xff]  ;;  %9976 = vst [vmem:[#allocation24_spill] sm:$0xff] %v7943_v37  ;;  %v579_v50 = vld [vmem:[#allocation4 + $0x658] sm:$0xff]  ;;  %v568_v56 = vld [vmem:[#allocation4 + $0x600] sm:$0xff]  ;;  %v7954_v3 = vpack.c.bf16 %v562_v39, %v554_v33  ;;  %v9981_v39 = vmov 0.0  }
  0x50   :  { %212 = vmatprep.mubr.f32.mxu0 %v9682_v1  ;;  %325 = vmatprep.mubr.f32.mxu1 %v9682_v1  ;;  %9975 = vst [vmem:[#allocation23_spill] sm:$0xff] %v7937_v22  ;;  %v577_v43 = vld [vmem:[#allocation4 + $0x648] sm:$0xff]  ;;  %9977 = vst [vmem:[#allocation25_spill] sm:$0xff] %v7949_v55  ;;  %v576_v4 = vld [vmem:[#allocation4 + $0x640] sm:$0xff]  ;;  %v7962_v13 = vpack.c.bf16 %v579_v50, %v571_v48 }
  0x51   :  { %4740 = vmatpush1.bf16.msra.mxu0 %v7892_v19  ;;  %4804 = vmatpush1.bf16.msra.mxu1 %v7897_v27  ;;  %9978 = vst [vmem:[#allocation26_spill] sm:$0xff] %v7954_v3  ;;  %v570_v5 = vld [vmem:[#allocation4 + $0x610] sm:$0xff]  ;;  %v585_v31 = vld [vmem:[#allocation4 + $0x688] sm:$0xff]  ;;  %v595_v33 = vld [vmem:[#allocation4 + $0x6d8] sm:$0xff] }
  0x52   :  { %4742 = vmatprep.subr.bf16.mxu0 %v7899_v28  ;;  %4806 = vmatprep.subr.bf16.mxu1 %v7905_v36  ;;  %v66_v11 = vld [vmem:[%s9673_s0 + $0x38] sm:$0xff]  ;;  %9980 = vst [vmem:[#allocation28_spill] sm:$0xff] %v7962_v13  ;;  %v592_v50 = vld [vmem:[#allocation4 + $0x6c0] sm:$0xff] }
  0x53   :  { %4651 = vmatmul.mubr.msk.f32.gmra.mrb[10].mxu1 %vm93_vm0, %v64_v60  ;;  %4643 = vmatmul.mubr.msk.f32.gmra.mrb[10].mxu0 %vm93_vm0, %v64_v60  ;;  %v7956_v60 = vpack.c.bf16 %v577_v43, %v569_v40  ;;  %v578_v17 = vld [vmem:[#allocation4 + $0x650] sm:$0xff]  ;;  %v7968_v40 = vpack.c.bf16 %v576_v4, %v568_v56  ;;  %v601_v56 = vld [vmem:[#allocation4 + $0x708] sm:$0xff] }
  0x54   :  { %218 = vmatprep.mubr.f32.mxu0 %v9682_v1  ;;  %331 = vmatprep.mubr.f32.mxu1 %v9682_v1  ;;  %v593_v1 = vld [vmem:[#allocation4 + $0x6c8] sm:$0xff]  ;;  %v7973_v43 = vpack.c.bf16 %v578_v17, %v570_v5  ;;  %v600_v17 = vld [vmem:[#allocation4 + $0x700] sm:$0xff] }
  0x55   :  { %4744 = vmatpush1.bf16.msra.mxu0 %v7911_v49  ;;  %4808 = vmatpush1.bf16.msra.mxu1 %v7916_v53  ;;  %9979 = vst [vmem:[#allocation27_spill] sm:$0xff] %v7956_v60  ;;  %9982 = vst [vmem:[#allocation29_spill] sm:$0xff] %v7968_v40  ;;  %v7975_v48 = vpack.c.bf16 %v593_v1, %v585_v31  ;;  %v609_v4 = vld [vmem:[#allocation4 + $0x748] sm:$0xff]  ;;  %v602_v31 = vld [vmem:[#allocation4 + $0x710] sm:$0xff] }
  0x56   :  { %4746 = vmatprep.subr.bf16.mxu0 %v7918_v54  ;;  %4810 = vmatprep.subr.bf16.mxu1 %v7924_v62  ;;  %9983 = vst [vmem:[#allocation30_spill] sm:$0xff] %v7973_v43  ;;  %v7990_v5 = vpack.c.bf16 %v609_v4, %v601_v56  ;;  %v616_v56 = vld [vmem:[#allocation4 + $0x780] sm:$0xff] }
  0x57   :  { %4652 = vmatmul.mubr.msk.f32.gmra.mrb[12].mxu1 %vm93_vm0, %v65_v35  ;;  %4644 = vmatmul.mubr.msk.f32.gmra.mrb[12].mxu0 %vm93_vm0, %v65_v35  ;;  %9984 = vst [vmem:[#allocation31_spill] sm:$0xff] %v7975_v48  ;;  %v584_v35 = vld [vmem:[#allocation4 + $0x680] sm:$0xff] }
  0x58   :  { %224 = vmatprep.mubr.f32.mxu0 %v9981_v39  ;;  %337 = vmatprep.mubr.f32.mxu1 %v9981_v39  ;;  %v7984_v1 = vpack.c.bf16 %v592_v50, %v584_v35  ;;  %9988 = vst [vmem:[#allocation35_spill] sm:$0xff] %v7990_v5  ;;  %v619_v35 = vld [vmem:[#allocation4 + $0x798] sm:$0xff] }
  0x59   :  { %4748 = vmatpush1.bf16.msra.mxu0 %v7930_v15  ;;  %4812 = vmatpush1.bf16.msra.mxu1 %v7935_v18  ;;  %v603_v15 = vld [vmem:[#allocation4 + $0x718] sm:$0xff] }
  0x5a   :  { %4750 = vmatprep.subr.bf16.mxu0 %v7937_v22  ;;  %4814 = vmatprep.subr.bf16.mxu1 %v7943_v37  ;;  %v587_v22 = vld [vmem:[#allocation4 + $0x698] sm:$0xff]  ;;  %v586_v37 = vld [vmem:[#allocation4 + $0x690] sm:$0xff]  ;;  %9986 = vst [vmem:[#allocation33_spill] sm:$0xff] %v7984_v1 }
  0x5b   :  { %4653 = vmatmul.mubr.msk.f32.gmra.mrb[14].mxu1 %vm93_vm0, %v66_v11  ;;  %v7978_v18 = vpack.c.bf16 %v595_v33, %v587_v22  ;;  %4645 = vmatmul.mubr.msk.f32.gmra.mrb[14].mxu0 %vm93_vm0, %v66_v11  ;;  %v608_v11 = vld [vmem:[#allocation4 + $0x740] sm:$0xff]  ;;  %v627_v50 = vld [vmem:[#allocation4 + $0x7d8] sm:$0xff] }
  0x5c   :  { %696 = vmatprep.mubr.f32.mxu0 %v9981_v39  ;;  %767 = vmatprep.mubr.f32.mxu1 %v9981_v39  ;;  %v8005_v4 = vpack.c.bf16 %v627_v50, %v619_v35  ;;  %v382_v35 = vld [vmem:[#allocation4 + $0x30] sm:$0xff] }
  0x5d   :  { %4752 = vmatpush1.bf16.msra.mxu0 %v7949_v55  ;;  %4816 = vmatpush1.bf16.msra.mxu1 %v7954_v3  ;;  %9985 = vst [vmem:[#allocation32_spill] sm:$0xff] %v7978_v18  ;;  %v594_v55 = vld [vmem:[#allocation4 + $0x6d0] sm:$0xff]  ;;  %v611_v3 = vld [vmem:[#allocation4 + $0x758] sm:$0xff] }
  0x5e   :  { %4754 = vmatprep.subr.bf16.mxu0 %v7956_v60  ;;  %4818 = vmatprep.subr.bf16.mxu1 %v7962_v13  ;;  %v7988_v22 = vpack.c.bf16 %v594_v55, %v586_v37  ;;  %v7993_v33 = vpack.c.bf16 %v611_v3, %v603_v15  ;;  %v610_v13 = vld [vmem:[#allocation4 + $0x750] sm:$0xff]  ;;  %v617_v60 = vld [vmem:[#allocation4 + $0x788] sm:$0xff]  ;;  %v624_v15 = vld [vmem:[#allocation4 + $0x7c0] sm:$0xff]  ;;  %9993 = vst [vmem:[#allocation40_spill] sm:$0xff] %v8005_v4 }
  0x5f   :  { %v8000_v37 = vpack.c.bf16 %v610_v13, %v602_v31  ;;  %v618_v3 = vld [vmem:[#allocation4 + $0x790] sm:$0xff]  ;;  %v388_v31 = vld [vmem:[#allocation4 + $0x60] sm:$0xff] }
  0x60   :  { %9987 = vst [vmem:[#allocation34_spill] sm:$0xff] %v7988_v22  ;;  %9989 = vst [vmem:[#allocation36_spill] sm:$0xff] %v7993_v33 }
  0x61   :  { %4756 = vmatpush1.bf16.msra.mxu0 %v7968_v40  ;;  %4820 = vmatpush1.bf16.msra.mxu1 %v7973_v43  ;;  %v625_v40 = vld [vmem:[#allocation4 + $0x7c8] sm:$0xff]  ;;  %v7996_v43 = vpack.c.bf16 %v608_v11, %v600_v17  ;;  %9991 = vst [vmem:[#allocation38_spill] sm:$0xff] %v8000_v37  ;;  %v383_v17 = vld [vmem:[#allocation4 + $0x38] sm:$0xff] }
  0x62   :  { %4758 = vmatprep.subr.bf16.mxu0 %v7975_v48  ;;  %4822 = vmatprep.subr.bf16.mxu1 %v7978_v18  ;;  %v8002_v55 = vpack.c.bf16 %v625_v40, %v617_v60  ;;  %v626_v18 = vld [vmem:[#allocation4 + $0x7d0] sm:$0xff]  ;;  %v381_v48 = vld [vmem:[#allocation4 + $0x28] sm:$0xff]  ;;  %v391_v11 = vld [vmem:[#allocation4 + $0x78] sm:$0xff] }
  0x63   :  { %9990 = vst [vmem:[#allocation37_spill] sm:$0xff] %v7996_v43  ;;  %v8012_v60 = vpack.c.bf16 %v626_v18, %v618_v3  ;;  %v380_v40 = vld [vmem:[#allocation4 + $0x20] sm:$0xff]  ;;  %v8017_v50 = vpack.c.bf16 %v391_v11, %v383_v17  ;;  %v398_v17 = vld [vmem:[#allocation4 + $0xb0] sm:$0xff] }
  0x64   :  { %9992 = vst [vmem:[#allocation39_spill] sm:$0xff] %v8002_v55  ;;  %v404_v3 = vld [vmem:[#allocation4 + $0xe0] sm:$0xff] }
  0x65   :  { %4760 = vmatpush1.bf16.msra.mxu0 %v7984_v1  ;;  %4824 = vmatpush1.bf16.msra.mxu1 %v7988_v22  ;;  %v389_v1 = vld [vmem:[#allocation4 + $0x68] sm:$0xff]  ;;  %v8008_v22 = vpack.c.bf16 %v624_v15, %v616_v56  ;;  %9995 = vst [vmem:[#allocation42_spill] sm:$0xff] %v8012_v60  ;;  %9997 = vst [vmem:[#allocation44_spill] sm:$0xff] %v8017_v50  ;;  %v399_v56 = vld [vmem:[#allocation4 + $0xb8] sm:$0xff] }
  0x66   :  { %4762 = vmatprep.subr.bf16.mxu0 %v7990_v5  ;;  %4826 = vmatprep.subr.bf16.mxu1 %v7993_v33  ;;  %v8014_v13 = vpack.c.bf16 %v389_v1, %v381_v48  ;;  %v390_v33 = vld [vmem:[#allocation4 + $0x70] sm:$0xff]  ;;  %v397_v5 = vld [vmem:[#allocation4 + $0xa8] sm:$0xff]  ;;  %v407_v15 = vld [vmem:[#allocation4 + $0xf8] sm:$0xff] }
  0x67   :  { %9994 = vst [vmem:[#allocation41_spill] sm:$0xff] %v8008_v22  ;;  %v8024_v18 = vpack.c.bf16 %v390_v33, %v382_v35  ;;  %v396_v1 = vld [vmem:[#allocation4 + $0xa0] sm:$0xff]  ;;  %v8029_v11 = vpack.c.bf16 %v407_v15, %v399_v56  ;;  %v414_v15 = vld [vmem:[#allocation4 + $0x130] sm:$0xff] }
  0x68   :  { %9996 = vst [vmem:[#allocation43_spill] sm:$0xff] %v8014_v13  ;;  %v412_v35 = vld [vmem:[#allocation4 + $0x120] sm:$0xff] }
  0x69   :  { %4764 = vmatpush1.bf16.msra.mxu0 %v7996_v43  ;;  %4828 = vmatpush1.bf16.msra.mxu1 %v8000_v37  ;;  %v405_v43 = vld [vmem:[#allocation4 + $0xe8] sm:$0xff]  ;;  %v8020_v37 = vpack.c.bf16 %v388_v31, %v380_v40  ;;  %9999 = vst [vmem:[#allocation46_spill] sm:$0xff] %v8024_v18  ;;  %10001 = vst [vmem:[#allocation48_spill] sm:$0xff] %v8029_v11  ;;  %v415_v40 = vld [vmem:[#allocation4 + $0x138] sm:$0xff] }
  0x6a   :  { %4766 = vmatprep.subr.bf16.mxu0 %v8002_v55  ;;  %4830 = vmatprep.subr.bf16.mxu1 %v8005_v4  ;;  %v8026_v48 = vpack.c.bf16 %v405_v43, %v397_v5  ;;  %v406_v4 = vld [vmem:[#allocation4 + $0xf0] sm:$0xff]  ;;  %v413_v55 = vld [vmem:[#allocation4 + $0x128] sm:$0xff]  ;;  %v423_v31 = vld [vmem:[#allocation4 + $0x178] sm:$0xff]  ;;  %v8034_v43 = vpack.c.bf16 %v404_v3, %v396_v1 }
  0x6b   :  { %9998 = vst [vmem:[#allocation45_spill] sm:$0xff] %v8020_v37  ;;  %v8038_v5 = vpack.c.bf16 %v406_v4, %v398_v17  ;;  %v420_v56 = vld [vmem:[#allocation4 + $0x160] sm:$0xff]  ;;  %v431_v1 = vld [vmem:[#allocation4 + $0x1b8] sm:$0xff] }
  0x6c   :  { %10000 = vst [vmem:[#allocation47_spill] sm:$0xff] %v8026_v48  ;;  %10002 = vst [vmem:[#allocation49_spill] sm:$0xff] %v8034_v43  ;;  %v439_v3 = vld [vmem:[#allocation4 + $0x1f8] sm:$0xff]  ;;  %v428_v17 = vld [vmem:[#allocation4 + $0x1a0] sm:$0xff] }
  0x6d   :  { %4768 = vmatpush1.bf16.msra.mxu0 %v8008_v22  ;;  %4832 = vmatpush1.bf16.msra.mxu1 %v8012_v60  ;;  %v421_v22 = vld [vmem:[#allocation4 + $0x168] sm:$0xff]  ;;  %10003 = vst [vmem:[#allocation50_spill] sm:$0xff] %v8038_v5 }
  0x6e   :  { %4834 = vmatprep.subr.bf16.mxu0 %v8014_v13  ;;  %4898 = vmatprep.subr.bf16.mxu1 %v8017_v50  ;;  %v8040_v33 = vpack.c.bf16 %v421_v22, %v413_v55  ;;  %v8043_v50 = vpack.c.bf16 %v423_v31, %v415_v40  ;;  %v422_v13 = vld [vmem:[#allocation4 + $0x170] sm:$0xff]  ;;  %v429_v60 = vld [vmem:[#allocation4 + $0x1a8] sm:$0xff]  ;;  %v8048_v22 = vpack.c.bf16 %v420_v56, %v412_v35  ;;  %v436_v40 = vld [vmem:[#allocation4 + $0x1e0] sm:$0xff] }
  0x6f   :  { %v8052_v55 = vpack.c.bf16 %v422_v13, %v414_v15  ;;  %v430_v31 = vld [vmem:[#allocation4 + $0x1b0] sm:$0xff]  ;;  %v447_v35 = vld [vmem:[#allocation4 + $0x238] sm:$0xff]  ;;  %v444_v13 = vld [vmem:[#allocation4 + $0x220] sm:$0xff] }
  0x70   :  { %697 = vmatmul.mubr.f32.vlgmr.msra.gmra.mrb[0].mxu0 %v9981_v39  ;;  %768 = vmatmul.mubr.f32.vlgmr.msra.gmra.mrb[0].mxu1 %v9981_v39  ;;  %10004 = vst [vmem:[#allocation51_spill] sm:$0xff] %v8040_v33  ;;  %10005 = vst [vmem:[#allocation52_spill] sm:$0xff] %v8043_v50  ;;  %v455_v56 = vld [vmem:[#allocation4 + $0x278] sm:$0xff]  ;;  %v452_v15 = vld [vmem:[#allocation4 + $0x260] sm:$0xff] }
  0x71   :  { %4836 = vmatpush1.bf16.msra.mxu0 %v8020_v37  ;;  %4900 = vmatpush1.bf16.msra.mxu1 %v8024_v18  ;;  %v437_v37 = vld [vmem:[#allocation4 + $0x1e8] sm:$0xff]  ;;  %10006 = vst [vmem:[#allocation53_spill] sm:$0xff] %v8048_v22  ;;  %10007 = vst [vmem:[#allocation54_spill] sm:$0xff] %v8052_v55 }
  0x72   :  { %4838 = vmatprep.subr.bf16.mxu0 %v8026_v48  ;;  %4902 = vmatprep.subr.bf16.mxu1 %v8029_v11  ;;  %v8054_v4 = vpack.c.bf16 %v437_v37, %v429_v60  ;;  %v8057_v11 = vpack.c.bf16 %v439_v3, %v431_v1  ;;  %v438_v48 = vld [vmem:[#allocation4 + $0x1f0] sm:$0xff]  ;;  %v445_v18 = vld [vmem:[#allocation4 + $0x228] sm:$0xff]  ;;  %v8069_v3 = vpack.c.bf16 %v455_v56, %v447_v35 }
  0x73   :  { %838 = vmatprep.mubr.f32.mxu0 %v9981_v39  ;;  %909 = vmatprep.mubr.f32.mxu1 %v9981_v39  ;;  %v8064_v37 = vpack.c.bf16 %v438_v48, %v430_v31  ;;  %v446_v1 = vld [vmem:[#allocation4 + $0x230] sm:$0xff]  ;;  %v468_v31 = vld [vmem:[#allocation4 + $0x2e0] sm:$0xff] }
  0x74   :  { %10008 = vst [vmem:[#allocation55_spill] sm:$0xff] %v8054_v4  ;;  %10009 = vst [vmem:[#allocation56_spill] sm:$0xff] %v8057_v11  ;;  %v462_v35 = vld [vmem:[#allocation4 + $0x2b0] sm:$0xff] }
  0x75   :  { %4840 = vmatpush1.bf16.msra.mxu0 %v8034_v43  ;;  %4904 = vmatpush1.bf16.msra.mxu1 %v8038_v5  ;;  %v453_v43 = vld [vmem:[#allocation4 + $0x268] sm:$0xff]  ;;  %v8060_v5 = vpack.c.bf16 %v436_v40, %v428_v17  ;;  %10011 = vst [vmem:[#allocation58_spill] sm:$0xff] %v8064_v37  ;;  %10013 = vst [vmem:[#allocation60_spill] sm:$0xff] %v8069_v3  ;;  %v463_v17 = vld [vmem:[#allocation4 + $0x2b8] sm:$0xff] }
  0x76   :  { %4842 = vmatprep.subr.bf16.mxu0 %v8040_v33  ;;  %4906 = vmatprep.subr.bf16.mxu1 %v8043_v50  ;;  %v8066_v60 = vpack.c.bf16 %v453_v43, %v445_v18  ;;  %v454_v50 = vld [vmem:[#allocation4 + $0x270] sm:$0xff]  ;;  %v461_v33 = vld [vmem:[#allocation4 + $0x2a8] sm:$0xff]  ;;  %v471_v40 = vld [vmem:[#allocation4 + $0x2f8] sm:$0xff] }
  0x77   :  { %10010 = vst [vmem:[#allocation57_spill] sm:$0xff] %v8060_v5  ;;  %v8076_v18 = vpack.c.bf16 %v454_v50, %v446_v1  ;;  %v460_v43 = vld [vmem:[#allocation4 + $0x2a0] sm:$0xff]  ;;  %v8081_v56 = vpack.c.bf16 %v471_v40, %v463_v17  ;;  %v478_v17 = vld [vmem:[#allocation4 + $0x330] sm:$0xff] }
  0x78   :  { %10012 = vst [vmem:[#allocation59_spill] sm:$0xff] %v8066_v60  ;;  %v484_v1 = vld [vmem:[#allocation4 + $0x360] sm:$0xff] }
  0x79   :  { %4844 = vmatpush1.bf16.msra.mxu0 %v8048_v22  ;;  %4908 = vmatpush1.bf16.msra.mxu1 %v8052_v55  ;;  %v469_v22 = vld [vmem:[#allocation4 + $0x2e8] sm:$0xff]  ;;  %v8072_v55 = vpack.c.bf16 %v452_v15, %v444_v13  ;;  %10015 = vst [vmem:[#allocation62_spill] sm:$0xff] %v8076_v18  ;;  %10017 = vst [vmem:[#allocation64_spill] sm:$0xff] %v8081_v56  ;;  %v479_v13 = vld [vmem:[#allocation4 + $0x338] sm:$0xff] }
  0x7a   :  { %4846 = vmatprep.subr.bf16.mxu0 %v8054_v4  ;;  %4910 = vmatprep.subr.bf16.mxu1 %v8057_v11  ;;  %v8078_v48 = vpack.c.bf16 %v469_v22, %v461_v33  ;;  %v470_v11 = vld [vmem:[#allocation4 + $0x2f0] sm:$0xff]  ;;  %v477_v4 = vld [vmem:[#allocation4 + $0x328] sm:$0xff]  ;;  %v487_v15 = vld [vmem:[#allocation4 + $0x378] sm:$0xff] }
  0x7b   :  { %10014 = vst [vmem:[#allocation61_spill] sm:$0xff] %v8072_v55  ;;  %v8088_v50 = vpack.c.bf16 %v470_v11, %v462_v35  ;;  %v476_v22 = vld [vmem:[#allocation4 + $0x320] sm:$0xff]  ;;  %v8093_v40 = vpack.c.bf16 %v487_v15, %v479_v13  ;;  %v494_v13 = vld [vmem:[#allocation4 + $0x3b0] sm:$0xff] }
  0x7c   :  { %10016 = vst [vmem:[#allocation63_spill] sm:$0xff] %v8078_v48  ;;  %v500_v35 = vld [vmem:[#allocation4 + $0x3e0] sm:$0xff] }
  0x7d   :  { %4848 = vmatpush1.bf16.msra.mxu0 %v8060_v5  ;;  %4912 = vmatpush1.bf16.msra.mxu1 %v8064_v37  ;;  %v485_v5 = vld [vmem:[#allocation4 + $0x368] sm:$0xff]  ;;  %v8084_v37 = vpack.c.bf16 %v468_v31, %v460_v43  ;;  %10019 = vst [vmem:[#allocation66_spill] sm:$0xff] %v8088_v50  ;;  %10021 = vst [vmem:[#allocation68_spill] sm:$0xff] %v8093_v40  ;;  %v495_v43 = vld [vmem:[#allocation4 + $0x3b8] sm:$0xff] }
  0x7e   :  { %4850 = vmatprep.subr.bf16.mxu0 %v8066_v60  ;;  %4914 = vmatprep.subr.bf16.mxu1 %v8069_v3  ;;  %v8090_v33 = vpack.c.bf16 %v485_v5, %v477_v4  ;;  %v486_v3 = vld [vmem:[#allocation4 + $0x370] sm:$0xff]  ;;  %v493_v60 = vld [vmem:[#allocation4 + $0x3a8] sm:$0xff]  ;;  %v503_v31 = vld [vmem:[#allocation4 + $0x3f8] sm:$0xff] }
  0x7f   :  { %10018 = vst [vmem:[#allocation65_spill] sm:$0xff] %v8084_v37  ;;  %v8100_v11 = vpack.c.bf16 %v486_v3, %v478_v17  ;;  %v492_v4 = vld [vmem:[#allocation4 + $0x3a0] sm:$0xff]  ;;  %v8105_v15 = vpack.c.bf16 %v503_v31, %v495_v43  ;;  %v510_v43 = vld [vmem:[#allocation4 + $0x430] sm:$0xff] }
  0x80   :  { %10020 = vst [vmem:[#allocation67_spill] sm:$0xff] %v8090_v33  ;;  %v508_v3 = vld [vmem:[#allocation4 + $0x420] sm:$0xff] }
  0x81   :  { %4852 = vmatpush1.bf16.msra.mxu0 %v8072_v55  ;;  %4916 = vmatpush1.bf16.msra.mxu1 %v8076_v18  ;;  %v501_v55 = vld [vmem:[#allocation4 + $0x3e8] sm:$0xff]  ;;  %v8096_v18 = vpack.c.bf16 %v484_v1, %v476_v22  ;;  %10023 = vst [vmem:[#allocation70_spill] sm:$0xff] %v8100_v11  ;;  %10025 = vst [vmem:[#allocation72_spill] sm:$0xff] %v8105_v15  ;;  %v511_v22 = vld [vmem:[#allocation4 + $0x438] sm:$0xff] }
  0x82   :  { %4854 = vmatprep.subr.bf16.mxu0 %v8078_v48  ;;  %4918 = vmatprep.subr.bf16.mxu1 %v8081_v56  ;;  %v8102_v5 = vpack.c.bf16 %v501_v55, %v493_v60  ;;  %v502_v56 = vld [vmem:[#allocation4 + $0x3f0] sm:$0xff]  ;;  %v509_v48 = vld [vmem:[#allocation4 + $0x428] sm:$0xff]  ;;  %v519_v1 = vld [vmem:[#allocation4 + $0x478] sm:$0xff] }
  0x83   :  { %10022 = vst [vmem:[#allocation69_spill] sm:$0xff] %v8096_v18  ;;  %v8112_v55 = vpack.c.bf16 %v502_v56, %v494_v13  ;;  %v516_v17 = vld [vmem:[#allocation4 + $0x460] sm:$0xff]  ;;  %v8117_v31 = vpack.c.bf16 %v519_v1, %v511_v22  ;;  %v526_v22 = vld [vmem:[#allocation4 + $0x4b0] sm:$0xff] }
  0x84   :  { %10024 = vst [vmem:[#allocation71_spill] sm:$0xff] %v8102_v5  ;;  %v524_v56 = vld [vmem:[#allocation4 + $0x4a0] sm:$0xff] }
  0x85   :  { %4856 = vmatpush1.bf16.msra.mxu0 %v8084_v37  ;;  %4920 = vmatpush1.bf16.msra.mxu1 %v8088_v50  ;;  %v517_v37 = vld [vmem:[#allocation4 + $0x468] sm:$0xff]  ;;  %v8108_v50 = vpack.c.bf16 %v500_v35, %v492_v4  ;;  %10027 = vst [vmem:[#allocation74_spill] sm:$0xff] %v8112_v55  ;;  %10029 = vst [vmem:[#allocation76_spill] sm:$0xff] %v8117_v31  ;;  %v527_v4 = vld [vmem:[#allocation4 + $0x4b8] sm:$0xff] }
  0x86   :  { %4858 = vmatprep.subr.bf16.mxu0 %v8090_v33  ;;  %4922 = vmatprep.subr.bf16.mxu1 %v8093_v40  ;;  %v8114_v60 = vpack.c.bf16 %v517_v37, %v509_v48  ;;  %v518_v40 = vld [vmem:[#allocation4 + $0x470] sm:$0xff]  ;;  %v525_v33 = vld [vmem:[#allocation4 + $0x4a8] sm:$0xff]  ;;  %v535_v35 = vld [vmem:[#allocation4 + $0x4f8] sm:$0xff] }
  0x87   :  { %10026 = vst [vmem:[#allocation73_spill] sm:$0xff] %v8108_v50  ;;  %v8124_v37 = vpack.c.bf16 %v518_v40, %v510_v43  ;;  %v532_v13 = vld [vmem:[#allocation4 + $0x4e0] sm:$0xff]  ;;  %v8129_v1 = vpack.c.bf16 %v535_v35, %v527_v4  ;;  %v542_v4 = vld [vmem:[#allocation4 + $0x530] sm:$0xff] }
  0x88   :  { %10028 = vst [vmem:[#allocation75_spill] sm:$0xff] %v8114_v60  ;;  %v540_v40 = vld [vmem:[#allocation4 + $0x520] sm:$0xff] }
  0x89   :  { %4860 = vmatpush1.bf16.msra.mxu0 %v8096_v18  ;;  %4924 = vmatpush1.bf16.msra.mxu1 %v8100_v11  ;;  %v533_v18 = vld [vmem:[#allocation4 + $0x4e8] sm:$0xff]  ;;  %v8120_v11 = vpack.c.bf16 %v516_v17, %v508_v3  ;;  %10031 = vst [vmem:[#allocation78_spill] sm:$0xff] %v8124_v37  ;;  %10033 = vst [vmem:[#allocation80_spill] sm:$0xff] %v8129_v1  ;;  %v543_v3 = vld [vmem:[#allocation4 + $0x538] sm:$0xff] }
  0x8a   :  { %4862 = vmatprep.subr.bf16.mxu0 %v8102_v5  ;;  %4926 = vmatprep.subr.bf16.mxu1 %v8105_v15  ;;  %v8126_v48 = vpack.c.bf16 %v533_v18, %v525_v33  ;;  %v534_v15 = vld [vmem:[#allocation4 + $0x4f0] sm:$0xff]  ;;  %v541_v5 = vld [vmem:[#allocation4 + $0x528] sm:$0xff]  ;;  %v551_v17 = vld [vmem:[#allocation4 + $0x578] sm:$0xff] }
  0x8b   :  { %10030 = vst [vmem:[#allocation77_spill] sm:$0xff] %v8120_v11  ;;  %v8136_v18 = vpack.c.bf16 %v534_v15, %v526_v22  ;;  %v548_v43 = vld [vmem:[#allocation4 + $0x560] sm:$0xff]  ;;  %v8141_v35 = vpack.c.bf16 %v551_v17, %v543_v3  ;;  %v558_v3 = vld [vmem:[#allocation4 + $0x5b0] sm:$0xff] }
  0x8c   :  { %10032 = vst [vmem:[#allocation79_spill] sm:$0xff] %v8126_v48  ;;  %v556_v15 = vld [vmem:[#allocation4 + $0x5a0] sm:$0xff] }
  0x8d   :  { %4864 = vmatpush1.bf16.msra.mxu0 %v8108_v50  ;;  %4928 = vmatpush1.bf16.msra.mxu1 %v8112_v55  ;;  %v549_v50 = vld [vmem:[#allocation4 + $0x568] sm:$0xff]  ;;  %v8132_v55 = vpack.c.bf16 %v532_v13, %v524_v56  ;;  %10035 = vst [vmem:[#allocation82_spill] sm:$0xff] %v8136_v18  ;;  %10037 = vst [vmem:[#allocation84_spill] sm:$0xff] %v8141_v35  ;;  %v559_v56 = vld [vmem:[#allocation4 + $0x5b8] sm:$0xff] }
  0x8e   :  { %4866 = vmatprep.subr.bf16.mxu0 %v8114_v60  ;;  %4930 = vmatprep.subr.bf16.mxu1 %v8117_v31  ;;  %v8138_v33 = vpack.c.bf16 %v549_v50, %v541_v5  ;;  %v550_v31 = vld [vmem:[#allocation4 + $0x570] sm:$0xff]  ;;  %v557_v60 = vld [vmem:[#allocation4 + $0x5a8] sm:$0xff]  ;;  %v567_v13 = vld [vmem:[#allocation4 + $0x5f8] sm:$0xff] }
  0x8f   :  { %10034 = vst [vmem:[#allocation81_spill] sm:$0xff] %v8132_v55  ;;  %v8148_v50 = vpack.c.bf16 %v550_v31, %v542_v4  ;;  %v564_v22 = vld [vmem:[#allocation4 + $0x5e0] sm:$0xff]  ;;  %v8153_v17 = vpack.c.bf16 %v567_v13, %v559_v56  ;;  %v574_v13 = vld [vmem:[#allocation4 + $0x630] sm:$0xff] }
  0x90   :  { %10036 = vst [vmem:[#allocation83_spill] sm:$0xff] %v8138_v33  ;;  %v572_v4 = vld [vmem:[#allocation4 + $0x620] sm:$0xff] }
  0x91   :  { %4868 = vmatpush1.bf16.msra.mxu0 %v8120_v11  ;;  %4932 = vmatpush1.bf16.msra.mxu1 %v8124_v37  ;;  %v565_v11 = vld [vmem:[#allocation4 + $0x5e8] sm:$0xff]  ;;  %v8144_v37 = vpack.c.bf16 %v548_v43, %v540_v40  ;;  %10039 = vst [vmem:[#allocation86_spill] sm:$0xff] %v8148_v50  ;;  %10041 = vst [vmem:[#allocation88_spill] sm:$0xff] %v8153_v17  ;;  %v575_v40 = vld [vmem:[#allocation4 + $0x638] sm:$0xff] }
  0x92   :  { %4870 = vmatprep.subr.bf16.mxu0 %v8126_v48  ;;  %4934 = vmatprep.subr.bf16.mxu1 %v8129_v1  ;;  %v8150_v5 = vpack.c.bf16 %v565_v11, %v557_v60  ;;  %v566_v1 = vld [vmem:[#allocation4 + $0x5f0] sm:$0xff]  ;;  %v573_v48 = vld [vmem:[#allocation4 + $0x628] sm:$0xff]  ;;  %v583_v43 = vld [vmem:[#allocation4 + $0x678] sm:$0xff] }
  0x93   :  { %10038 = vst [vmem:[#allocation85_spill] sm:$0xff] %v8144_v37  ;;  %v8160_v11 = vpack.c.bf16 %v566_v1, %v558_v3  ;;  %v8165_v31 = vpack.c.bf16 %v583_v43, %v575_v40  ;;  %v580_v56 = vld [vmem:[#allocation4 + $0x660] sm:$0xff]  ;;  %v582_v1 = vld [vmem:[#allocation4 + $0x670] sm:$0xff]  ;;  %v591_v3 = vld [vmem:[#allocation4 + $0x6b8] sm:$0xff] }
  0x94   :  { %10040 = vst [vmem:[#allocation87_spill] sm:$0xff] %v8150_v5  ;;  %v599_v43 = vld [vmem:[#allocation4 + $0x6f8] sm:$0xff] }
  0x95   :  { %4872 = vmatpush1.bf16.msra.mxu0 %v8132_v55  ;;  %4936 = vmatpush1.bf16.msra.mxu1 %v8136_v18  ;;  %v581_v55 = vld [vmem:[#allocation4 + $0x668] sm:$0xff]  ;;  %v8156_v18 = vpack.c.bf16 %v564_v22, %v556_v15  ;;  %10043 = vst [vmem:[#allocation90_spill] sm:$0xff] %v8160_v11  ;;  %10045 = vst [vmem:[#allocation92_spill] sm:$0xff] %v8165_v31  ;;  %v8171_v15 = vpack.c.bf16 %v580_v56, %v572_v4  ;;  %v590_v4 = vld [vmem:[#allocation4 + $0x6b0] sm:$0xff] }
  0x96   :  { %4874 = vmatprep.subr.bf16.mxu0 %v8138_v33  ;;  %4938 = vmatprep.subr.bf16.mxu1 %v8141_v35  ;;  %v8162_v60 = vpack.c.bf16 %v581_v55, %v573_v48  ;;  %v8173_v55 = vpack.c.bf16 %v582_v1, %v574_v13  ;;  %v589_v48 = vld [vmem:[#allocation4 + $0x6a8] sm:$0xff]  ;;  %v598_v56 = vld [vmem:[#allocation4 + $0x6f0] sm:$0xff] }
  0x97   :  { %10042 = vst [vmem:[#allocation89_spill] sm:$0xff] %v8156_v18  ;;  %10046 = vst [vmem:[#allocation93_spill] sm:$0xff] %v8171_v15  ;;  %v597_v22 = vld [vmem:[#allocation4 + $0x6e8] sm:$0xff]  ;;  %v8184_v13 = vpack.c.bf16 %v598_v56, %v590_v4  ;;  %v606_v4 = vld [vmem:[#allocation4 + $0x730] sm:$0xff] }
  0x98   :  { %10044 = vst [vmem:[#allocation91_spill] sm:$0xff] %v8162_v60  ;;  %10047 = vst [vmem:[#allocation94_spill] sm:$0xff] %v8173_v55  ;;  %v8177_v40 = vpack.c.bf16 %v597_v22, %v589_v48  ;;  %v605_v1 = vld [vmem:[#allocation4 + $0x728] sm:$0xff]  ;;  %v607_v22 = vld [vmem:[#allocation4 + $0x738] sm:$0xff] }
  0x99   :  { %4876 = vmatpush1.bf16.msra.mxu0 %v8144_v37  ;;  %4940 = vmatpush1.bf16.msra.mxu1 %v8148_v50  ;;  %10051 = vst [vmem:[#allocation98_spill] sm:$0xff] %v8184_v13  ;;  %v613_v48 = vld [vmem:[#allocation4 + $0x768] sm:$0xff]  ;;  %v614_v56 = vld [vmem:[#allocation4 + $0x770] sm:$0xff] }
  0x9a   :  { %4878 = vmatprep.subr.bf16.mxu0 %v8150_v5  ;;  %4942 = vmatprep.subr.bf16.mxu1 %v8153_v17  ;;  %10048 = vst [vmem:[#allocation95_spill] sm:$0xff] %v8177_v40 }
  0x9d   :  { %4880 = vmatpush1.bf16.msra.mxu0 %v8156_v18  ;;  %4944 = vmatpush1.bf16.msra.mxu1 %v8160_v11  ;;  %v8179_v11 = vpack.c.bf16 %v599_v43, %v591_v3  ;;  %v615_v3 = vld [vmem:[#allocation4 + $0x778] sm:$0xff] }
  0x9e   :  { %4882 = vmatprep.subr.bf16.mxu0 %v8162_v60  ;;  %4946 = vmatprep.subr.bf16.mxu1 %v8165_v31  ;;  %v588_v60 = vld [vmem:[#allocation4 + $0x6a0] sm:$0xff]  ;;  %v8191_v43 = vpack.c.bf16 %v615_v3, %v607_v22  ;;  %v631_v22 = vld [vmem:[#allocation4 + $0x7f8] sm:$0xff] }
  0x9f   :  { %v596_v31 = vld [vmem:[#allocation4 + $0x6e0] sm:$0xff]  ;;  %10049 = vst [vmem:[#allocation96_spill] sm:$0xff] %v8179_v11 }
  0xa0   :  { %v8181_v18 = vpack.c.bf16 %v596_v31, %v588_v60  ;;  %v604_v60 = vld [vmem:[#allocation4 + $0x720] sm:$0xff]  ;;  %10053 = vst [vmem:[#allocation100_spill] sm:$0xff] %v8191_v43 }
  0xa1   :  { %4884 = vmatpush1.bf16.msra.mxu0 %v8171_v15  ;;  %4948 = vmatpush1.bf16.msra.mxu1 %v8173_v55  ;;  %v8189_v55 = vpack.c.bf16 %v613_v48, %v605_v1  ;;  %v612_v31 = vld [vmem:[#allocation4 + $0x760] sm:$0xff]  ;;  %v629_v1 = vld [vmem:[#allocation4 + $0x7e8] sm:$0xff]  ;;  %v623_v48 = vld [vmem:[#allocation4 + $0x7b8] sm:$0xff] }
  0xa2   :  { %10050 = vst [vmem:[#allocation97_spill] sm:$0xff] %v8181_v18  ;;  %4886 = vmatprep.subr.bf16.mxu0 %v8177_v40  ;;  %4950 = vmatprep.subr.bf16.mxu1 %v8179_v11  ;;  %v8193_v15 = vpack.c.bf16 %v612_v31, %v604_v60  ;;  %v8196_v11 = vpack.c.bf16 %v614_v56, %v606_v4  ;;  %v620_v3 = vld [vmem:[#allocation4 + $0x7a0] sm:$0xff]  ;;  %v622_v4 = vld [vmem:[#allocation4 + $0x7b0] sm:$0xff] }
  0xa3   :  { %10052 = vst [vmem:[#allocation99_spill] sm:$0xff] %v8189_v55  ;;  %v628_v60 = vld [vmem:[#allocation4 + $0x7e0] sm:$0xff]  ;;  %v8203_v31 = vpack.c.bf16 %v631_v22, %v623_v48  ;;  %v630_v56 = vld [vmem:[#allocation4 + $0x7f0] sm:$0xff]  ;;  %v955_v48 = vld [vmem:[#allocation6 + $0x38] sm:$0xff] }
  0xa4   :  { %10054 = vst [vmem:[#allocation101_spill] sm:$0xff] %v8193_v15  ;;  %10055 = vst [vmem:[#allocation102_spill] sm:$0xff] %v8196_v11  ;;  %v8205_v40 = vpack.c.bf16 %v628_v60, %v620_v3  ;;  %v948_v22 = vld [vmem:[#allocation6] sm:$0xff] }
  0xa5   :  { %4888 = vmatpush1.bf16.msra.mxu0 %v8181_v18  ;;  %4952 = vmatpush1.bf16.msra.mxu1 %v8184_v13  ;;  %v621_v13 = vld [vmem:[#allocation4 + $0x7a8] sm:$0xff]  ;;  %10057 = vst [vmem:[#allocation104_spill] sm:$0xff] %v8203_v31  ;;  %v952_v3 = vld [vmem:[#allocation6 + $0x20] sm:$0xff] }
  0xa6   :  { %4890 = vmatprep.subr.bf16.mxu0 %v8189_v55  ;;  %4954 = vmatprep.subr.bf16.mxu1 %v8191_v43  ;;  %v8201_v18 = vpack.c.bf16 %v629_v1, %v621_v13  ;;  %10058 = vst [vmem:[#allocation105_spill] sm:$0xff] %v8205_v40  ;;  %v8208_v43 = vpack.c.bf16 %v630_v56, %v622_v4  ;;  %v953_v13 = vld [vmem:[#allocation6 + $0x28] sm:$0xff]  ;;  %v951_v1 = vld [vmem:[#allocation6 + $0x18] sm:$0xff]  ;;  %v950_v4 = vld [vmem:[#allocation6 + $0x10] sm:$0xff] }
  0xa7   :  { %v8215_v60 = vpack.c.bf16 %v955_v48, %v951_v1  ;;  %v8217_v55 = vpack.c.bf16 %v952_v3, %v948_v22  ;;  %v954_v56 = vld [vmem:[#allocation6 + $0x30] sm:$0xff]  ;;  %v963_v48 = vld [vmem:[#allocation6 + $0x78] sm:$0xff]  ;;  %v956_v22 = vld [vmem:[#allocation6 + $0x40] sm:$0xff] }
  0xa8   :  { %10056 = vst [vmem:[#allocation103_spill] sm:$0xff] %v8201_v18  ;;  %10059 = vst [vmem:[#allocation106_spill] sm:$0xff] %v8208_v43  ;;  %v960_v3 = vld [vmem:[#allocation6 + $0x60] sm:$0xff] }
  0xa9   :  { %4892 = vmatpush1.bf16.msra.mxu0 %v8193_v15  ;;  %4956 = vmatpush1.bf16.msra.mxu1 %v8196_v11  ;;  %v949_v11 = vld [vmem:[#allocation6 + $0x8] sm:$0xff]  ;;  %10061 = vst [vmem:[#allocation108_spill] sm:$0xff] %v8215_v60  ;;  %10062 = vst [vmem:[#allocation109_spill] sm:$0xff] %v8217_v55 }
  0xaa   :  { %4894 = vmatprep.subr.bf16.mxu0 %v8201_v18  ;;  %4958 = vmatprep.subr.bf16.mxu1 %v8203_v31  ;;  %v8213_v15 = vpack.c.bf16 %v953_v13, %v949_v11  ;;  %v957_v11 = vld [vmem:[#allocation6 + $0x48] sm:$0xff] }
  0xab   :  { %v961_v13 = vld [vmem:[#allocation6 + $0x68] sm:$0xff] }
  0xac   :  { %10060 = vst [vmem:[#allocation107_spill] sm:$0xff] %v8213_v15  ;;  %v8227_v1 = vpack.c.bf16 %v961_v13, %v957_v11  ;;  %v965_v11 = vld [vmem:[#allocation6 + $0x88] sm:$0xff] }
  0xad   :  { %4896 = vmatpush1.bf16.msra.mxu0 %v8205_v40  ;;  %4960 = vmatpush1.bf16.msra.mxu1 %v8208_v43  ;;  %v8221_v40 = vpack.c.bf16 %v954_v56, %v950_v4  ;;  %v959_v43 = vld [vmem:[#allocation6 + $0x58] sm:$0xff]  ;;  %v8231_v4 = vpack.c.bf16 %v960_v3, %v956_v22  ;;  %v958_v56 = vld [vmem:[#allocation6 + $0x50] sm:$0xff]  ;;  %v969_v13 = vld [vmem:[#allocation6 + $0xa8] sm:$0xff] }
  0xae   :  { %4962 = vmatprep.subr.bf16.mxu0 %v8213_v15  ;;  %4994 = vmatprep.subr.bf16.mxu1 %v8215_v60  ;;  %10064 = vst [vmem:[#allocation111_spill] sm:$0xff] %v8227_v1  ;;  %v8229_v15 = vpack.c.bf16 %v963_v48, %v959_v43  ;;  %v962_v60 = vld [vmem:[#allocation6 + $0x70] sm:$0xff]  ;;  %v8241_v43 = vpack.c.bf16 %v969_v13, %v965_v11  ;;  %v971_v48 = vld [vmem:[#allocation6 + $0xb8] sm:$0xff]  ;;  %v964_v22 = vld [vmem:[#allocation6 + $0x80] sm:$0xff] }
  0xaf   :  { %10063 = vst [vmem:[#allocation110_spill] sm:$0xff] %v8221_v40  ;;  %10066 = vst [vmem:[#allocation113_spill] sm:$0xff] %v8231_v4  ;;  %v968_v3 = vld [vmem:[#allocation6 + $0xa0] sm:$0xff] }
  0xb0   :  { %839 = vmatmul.mubr.f32.vlgmr.msra.gmra.mrb[16].mxu0 %v9981_v39  ;;  %910 = vmatmul.mubr.f32.vlgmr.msra.gmra.mrb[16].mxu1 %v9981_v39  ;;  %10065 = vst [vmem:[#allocation112_spill] sm:$0xff] %v8229_v15  ;;  %10068 = vst [vmem:[#allocation115_spill] sm:$0xff] %v8241_v43  ;;  %v972_v13 = vld [vmem:[#allocation6 + $0xc0] sm:$0xff] }
  0xb1   :  { %4964 = vmatpush1.bf16.msra.mxu0 %v8217_v55  ;;  %4996 = vmatpush1.bf16.msra.mxu1 %v8221_v40  ;;  %v8236_v55 = vpack.c.bf16 %v962_v60, %v958_v56  ;;  %v967_v40 = vld [vmem:[#allocation6 + $0x98] sm:$0xff]  ;;  %v966_v60 = vld [vmem:[#allocation6 + $0x90] sm:$0xff] }
  0xb2   :  { %1076 = vmatprep.mubr.f32.mxu0 %v9981_v39  ;;  %1147 = vmatprep.mubr.f32.mxu1 %v9981_v39  ;;  %v8243_v31 = vpack.c.bf16 %v971_v48, %v967_v40  ;;  %v8245_v39 = vpack.c.bf16 %v968_v3, %v964_v22  ;;  %v970_v56 = vld [vmem:[#allocation6 + $0xb0] sm:$0xff]  ;;  %v979_v40 = vld [vmem:[#allocation6 + $0xf8] sm:$0xff]  ;;  %v976_v48 = vld [vmem:[#allocation6 + $0xe0] sm:$0xff] }
  0xb3   :  { %4966 = vmatprep.subr.bf16.mxu0 %v8227_v1  ;;  %10067 = vst [vmem:[#allocation114_spill] sm:$0xff] %v8236_v55  ;;  %4998 = vmatprep.subr.bf16.mxu1 %v8229_v15  ;;  %v8248_v15 = vpack.c.bf16 %v970_v56, %v966_v60  ;;  %v977_v1 = vld [vmem:[#allocation6 + $0xe8] sm:$0xff]  ;;  %v8257_v3 = vpack.c.bf16 %v976_v48, %v972_v13  ;;  %v974_v60 = vld [vmem:[#allocation6 + $0xd0] sm:$0xff] }
  0xb4   :  { %10069 = vst [vmem:[#allocation116_spill] sm:$0xff] %v8243_v31  ;;  %10070 = vst [vmem:[#allocation117_spill] sm:$0xff] %v8245_v39  ;;  %v978_v56 = vld [vmem:[#allocation6 + $0xf0] sm:$0xff] }
  0xb5   :  { %4968 = vmatpush1.bf16.msra.mxu0 %v8231_v4  ;;  %5000 = vmatpush1.bf16.msra.mxu1 %v8236_v55  ;;  %10071 = vst [vmem:[#allocation118_spill] sm:$0xff] %v8248_v15  ;;  %v973_v4 = vld [vmem:[#allocation6 + $0xc8] sm:$0xff]  ;;  %v975_v55 = vld [vmem:[#allocation6 + $0xd8] sm:$0xff]  ;;  %10074 = vst [vmem:[#allocation121_spill] sm:$0xff] %v8257_v3 }
  0xb6   :  { %4970 = vmatprep.subr.bf16.mxu0 %v8241_v43  ;;  %5002 = vmatprep.subr.bf16.mxu1 %v8243_v31  ;;  %v8253_v11 = vpack.c.bf16 %v977_v1, %v973_v4  ;;  %v8255_v22 = vpack.c.bf16 %v979_v40, %v975_v55  ;;  %v8260_v31 = vpack.c.bf16 %v978_v56, %v974_v60  ;;  %v985_v43 = vld [vmem:[#allocation6 + $0x128] sm:$0xff]  ;;  %v987_v55 = vld [vmem:[#allocation6 + $0x138] sm:$0xff]  ;;  %v980_v4 = vld [vmem:[#allocation6 + $0x100] sm:$0xff] }
  0xb7   :  { %v984_v40 = vld [vmem:[#allocation6 + $0x120] sm:$0xff]  ;;  %v982_v60 = vld [vmem:[#allocation6 + $0x110] sm:$0xff] }
  0xb8   :  { %10072 = vst [vmem:[#allocation119_spill] sm:$0xff] %v8253_v11  ;;  %10073 = vst [vmem:[#allocation120_spill] sm:$0xff] %v8255_v22  ;;  %v8269_v48 = vpack.c.bf16 %v984_v40, %v980_v4  ;;  %v986_v56 = vld [vmem:[#allocation6 + $0x130] sm:$0xff] }
  0xb9   :  { %4972 = vmatpush1.bf16.msra.mxu0 %v8245_v39  ;;  %5004 = vmatpush1.bf16.msra.mxu1 %v8248_v15  ;;  %10075 = vst [vmem:[#allocation122_spill] sm:$0xff] %v8260_v31  ;;  %v981_v39 = vld [vmem:[#allocation6 + $0x108] sm:$0xff]  ;;  %v983_v15 = vld [vmem:[#allocation6 + $0x118] sm:$0xff] }
  0xba   :  { %4974 = vmatprep.subr.bf16.mxu0 %v8253_v11  ;;  %5006 = vmatprep.subr.bf16.mxu1 %v8255_v22  ;;  %v8265_v1 = vpack.c.bf16 %v985_v43, %v981_v39  ;;  %v8267_v13 = vpack.c.bf16 %v987_v55, %v983_v15  ;;  %10078 = vst [vmem:[#allocation125_spill] sm:$0xff] %v8269_v48  ;;  %v993_v11 = vld [vmem:[#allocation6 + $0x168] sm:$0xff]  ;;  %v995_v15 = vld [vmem:[#allocation6 + $0x178] sm:$0xff]  ;;  %v988_v43 = vld [vmem:[#allocation6 + $0x140] sm:$0xff] }
  0xbb   :  { %v8272_v22 = vpack.c.bf16 %v986_v56, %v982_v60  ;;  %v992_v55 = vld [vmem:[#allocation6 + $0x160] sm:$0xff]  ;;  %v990_v60 = vld [vmem:[#allocation6 + $0x150] sm:$0xff] }
  0xbc   :  { %10076 = vst [vmem:[#allocation123_spill] sm:$0xff] %v8265_v1  ;;  %10077 = vst [vmem:[#allocation124_spill] sm:$0xff] %v8267_v13  ;;  %v8281_v40 = vpack.c.bf16 %v992_v55, %v988_v43  ;;  %v994_v56 = vld [vmem:[#allocation6 + $0x170] sm:$0xff] }
  0xbd   :  { %4976 = vmatpush1.bf16.msra.mxu0 %v8257_v3  ;;  %5008 = vmatpush1.bf16.msra.mxu1 %v8260_v31  ;;  %10079 = vst [vmem:[#allocation126_spill] sm:$0xff] %v8272_v22  ;;  %v989_v3 = vld [vmem:[#allocation6 + $0x148] sm:$0xff]  ;;  %v991_v31 = vld [vmem:[#allocation6 + $0x158] sm:$0xff] }
  0xbe   :  { %4978 = vmatprep.subr.bf16.mxu0 %v8265_v1  ;;  %5010 = vmatprep.subr.bf16.mxu1 %v8267_v13  ;;  %v8277_v39 = vpack.c.bf16 %v993_v11, %v989_v3  ;;  %v8279_v4 = vpack.c.bf16 %v995_v15, %v991_v31  ;;  %10082 = vst [vmem:[#allocation129_spill] sm:$0xff] %v8281_v40  ;;  %v1001_v1 = vld [vmem:[#allocation6 + $0x1a8] sm:$0xff]  ;;  %v1003_v31 = vld [vmem:[#allocation6 + $0x1b8] sm:$0xff]  ;;  %v996_v3 = vld [vmem:[#allocation6 + $0x180] sm:$0xff] }
  0xbf   :  { %v8284_v13 = vpack.c.bf16 %v994_v56, %v990_v60  ;;  %v1000_v15 = vld [vmem:[#allocation6 + $0x1a0] sm:$0xff]  ;;  %v998_v60 = vld [vmem:[#allocation6 + $0x190] sm:$0xff] }
  0xc0   :  { %10080 = vst [vmem:[#allocation127_spill] sm:$0xff] %v8277_v39  ;;  %10081 = vst [vmem:[#allocation128_spill] sm:$0xff] %v8279_v4  ;;  %v8293_v55 = vpack.c.bf16 %v1000_v15, %v996_v3  ;;  %v1002_v56 = vld [vmem:[#allocation6 + $0x1b0] sm:$0xff] }
  0xc1   :  { %4980 = vmatpush1.bf16.msra.mxu0 %v8269_v48  ;;  %5012 = vmatpush1.bf16.msra.mxu1 %v8272_v22  ;;  %10083 = vst [vmem:[#allocation130_spill] sm:$0xff] %v8284_v13  ;;  %v997_v48 = vld [vmem:[#allocation6 + $0x188] sm:$0xff]  ;;  %v999_v22 = vld [vmem:[#allocation6 + $0x198] sm:$0xff] }
  0xc2   :  { %4982 = vmatprep.subr.bf16.mxu0 %v8277_v39  ;;  %5014 = vmatprep.subr.bf16.mxu1 %v8279_v4  ;;  %v8289_v11 = vpack.c.bf16 %v1001_v1, %v997_v48  ;;  %v8291_v43 = vpack.c.bf16 %v1003_v31, %v999_v22  ;;  %10086 = vst [vmem:[#allocation133_spill] sm:$0xff] %v8293_v55  ;;  %v1009_v39 = vld [vmem:[#allocation6 + $0x1e8] sm:$0xff]  ;;  %v1011_v22 = vld [vmem:[#allocation6 + $0x1f8] sm:$0xff]  ;;  %v1004_v48 = vld [vmem:[#allocation6 + $0x1c0] sm:$0xff] }
  0xc3   :  { %v8296_v4 = vpack.c.bf16 %v1002_v56, %v998_v60  ;;  %v1008_v31 = vld [vmem:[#allocation6 + $0x1e0] sm:$0xff]  ;;  %v1006_v60 = vld [vmem:[#allocation6 + $0x1d0] sm:$0xff] }
  0xc4   :  { %10084 = vst [vmem:[#allocation131_spill] sm:$0xff] %v8289_v11  ;;  %10085 = vst [vmem:[#allocation132_spill] sm:$0xff] %v8291_v43  ;;  %v8305_v15 = vpack.c.bf16 %v1008_v31, %v1004_v48  ;;  %v1010_v56 = vld [vmem:[#allocation6 + $0x1f0] sm:$0xff] }
  0xc5   :  { %4984 = vmatpush1.bf16.msra.mxu0 %v8281_v40  ;;  %5016 = vmatpush1.bf16.msra.mxu1 %v8284_v13  ;;  %10087 = vst [vmem:[#allocation134_spill] sm:$0xff] %v8296_v4  ;;  %v1005_v40 = vld [vmem:[#allocation6 + $0x1c8] sm:$0xff]  ;;  %v1007_v13 = vld [vmem:[#allocation6 + $0x1d8] sm:$0xff] }
  0xc6   :  { %4986 = vmatprep.subr.bf16.mxu0 %v8289_v11  ;;  %5018 = vmatprep.subr.bf16.mxu1 %v8291_v43  ;;  %v8301_v1 = vpack.c.bf16 %v1009_v39, %v1005_v40  ;;  %v8303_v3 = vpack.c.bf16 %v1011_v22, %v1007_v13  ;;  %10090 = vst [vmem:[#allocation137_spill] sm:$0xff] %v8305_v15  ;;  %v73_v13 = vlaneseq  ;;  %v71_v22 = vld [vmem:[%s9676_s3] sm:$0xf] }
  0xc7   :  { %v8308_v43 = vpack.c.bf16 %v1010_v56, %v1006_v60 }
  0xc8   :  { %10088 = vst [vmem:[#allocation135_spill] sm:$0xff] %v8301_v1  ;;  %10089 = vst [vmem:[#allocation136_spill] sm:$0xff] %v8303_v3  ;;  %v8315_v39 = vshrl.u32 %v73_v13, 7 }
  0xc9   :  { %4988 = vmatpush1.bf16.msra.mxu0 %v8293_v55  ;;  %5020 = vmatpush1.bf16.msra.mxu1 %v8296_v4  ;;  %10091 = vst [vmem:[#allocation138_spill] sm:$0xff] %v8308_v43 }
  0xca   :  { %4990 = vmatprep.subr.bf16.mxu0 %v8301_v1  ;;  %5022 = vmatprep.subr.bf16.mxu1 %v8303_v3  ;;  %v9907_v40 = vsub.s32 0, %v8315_v39  ;;  %v9908_v48 = vsub.s32 1, %v8315_v39  ;;  %v9915_v13 = vsub.s32 3, %v8315_v39 }
  0xcc   :  { %v8324_v31 = vrot.slane %v71_v22, %v9907_v40  ;;  %v8328_v60 = vrot.slane %v71_v22, %v9908_v48  ;;  %v8335_v40 = vrot.slane %v71_v22, %v9915_v13  ;;  %v9924_v48 = vsub.s32 2, %v8315_v39 }
  0xcd   :  { %4992 = vmatpush1.bf16.msra.mxu0 %v8305_v15  ;;  %5024 = vmatpush1.bf16.msra.mxu1 %v8308_v43 }
  0xce   :  { %5026 = vmatprep.subr.bf16.mxu0 %v7769_v8  ;;  %5090 = vmatprep.subr.bf16.mxu1 %v7774_v12  ;;  %10092 = vst [vmem:[#allocation139_spill] sm:$0xff] %v8324_v31  ;;  %10093 = vst [vmem:[#allocation140_spill] sm:$0xff] %v8328_v60 }
  0xcf   :  { %10094 = vst [vmem:[#allocation141_spill] sm:$0xff] %v8335_v40 }
 0x143   :  { %v698_v56 = vpop.f32.mrb[0].mxu0  ;;  %v769_v8 = vpop.f32.mrb[0].mxu1 }
 0x144   :  { %v7265_v12 = vadd.f32 %v698_v56, %v8324_v31  ;;  %v700_v43 = vpop.f32.mrb[1].mxu0  ;;  %v771_v3 = vpop.f32.mrb[1].mxu1  ;;  %v8341_v56 = vrot.slane %v71_v22, %v9924_v48  ;;  %v10109_v48 = vld [vmem:[#allocation35_spill] sm:$0xff] }
 0x145   :  { %v7266_v15 = vadd.f32 %v700_v43, %v8328_v60  ;;  %v7282_v55 = vadd.f32 %v771_v3, %v8335_v40 }
 0x146   :  { %v4654_v1 = vmul.f32 -1.442695, %v7265_v12  ;;  %v7281_v43 = vadd.f32 %v769_v8, %v8341_v56 }
 0x147   :  { %v4655_v4 = vmul.f32 -1.442695, %v7266_v15  ;;  %v4656_v31 = vmul.f32 -1.442695, %v7282_v55 }
 0x148   :  { %7368 = vpow2.f32 %v4654_v1 }
 0x149   :  { %7370 = vpow2.f32 %v4655_v4 }
 0x14a   :  { %7372 = vpow2.f32 %v4656_v31  ;;  %v10099_v31 = vld [vmem:[#allocation25_spill] sm:$0xff] }
 0x14b   :  { %7374 = vtanh.f32 %v7281_v43  ;;  %v10101_v43 = vld [vmem:[#allocation27_spill] sm:$0xff] }
 0x152   :  { %v7369_v60 = vpop.eup %7368 }
 0x153   :  { %v7371_v12 = vpop.eup %7370  ;;  %v927_v15 = vadd.f32 1.0, %v7369_v60 }
 0x154   :  { %v933_v13 = vadd.f32 1.0, %v7371_v12  ;;  %v7373_v1 = vpop.eup %7372  ;;  %v10102_v12 = vld [vmem:[#allocation28_spill] sm:$0xff] }
 0x155   :  { %7376 = vrcp.f32 %v927_v15  ;;  %v7375_v11 = vpop.eup %7374  ;;  %v940_v40 = vadd.f32 1.0, %v7373_v1  ;;  %v10103_v15 = vld [vmem:[#allocation29_spill] sm:$0xff]  ;;  %v10104_v1 = vld [vmem:[#allocation30_spill] sm:$0xff] }
 0x156   :  { %7378 = vrcp.f32 %v933_v13  ;;  %v10100_v13 = vld [vmem:[#allocation26_spill] sm:$0xff] }
 0x157   :  { %7380 = vrcp.f32 %v940_v40  ;;  %v10098_v40 = vld [vmem:[#allocation24_spill] sm:$0xff] }
 0x15f   :  { %v7377_v4 = vpop.eup %7376 }
 0x160   :  { %v7379_v18 = vpop.eup %7378  ;;  %v944_v3 = vmul.f32 %v7377_v4, %v7375_v11  ;;  %v10097_v11 = vld [vmem:[#allocation23_spill] sm:$0xff] }
 0x161   :  { %v943_v17 = vmul.f32 0.0, %v7379_v18  ;;  %v7381_v8 = vpop.eup %7380  ;;  %v10095_v18 = vld [vmem:[#allocation21_spill] sm:$0xff]  ;;  %v10105_v4 = vld [vmem:[#allocation31_spill] sm:$0xff] }
 0x163   :  { %v8344_v22 = vadd.f32 %v944_v3, %v943_v17  ;;  %v10096_v17 = vld [vmem:[#allocation22_spill] sm:$0xff]  ;;  %v10106_v3 = vld [vmem:[#allocation32_spill] sm:$0xff] }
 0x165   :  { %7382 = vtanh.f32 %v8344_v22 }
 0x16f   :  { %v7383_v55 = vpop.eup %7382 }
 0x170   :  { %v8347_v60 = vmul.f32 %v7383_v55, %v7381_v8  ;;  %v10107_v8 = vld [vmem:[#allocation33_spill] sm:$0xff]  ;;  %v10108_v55 = vld [vmem:[#allocation34_spill] sm:$0xff] }
 0x172   :  { %1077 = vmatmul.mubr.f32.vlgmr.msra.gmra.mrb[16].mxu0 %v8347_v60  ;;  %1148 = vmatmul.mubr.f32.vlgmr.msra.gmra.mrb[16].mxu1 %v8347_v60 }
 0x173   :  { %5028 = vmatpush1.bf16.msra.mxu0 %v7779_v16  ;;  %5092 = vmatpush1.bf16.msra.mxu1 %v7783_v20 }
 0x174   :  { %5030 = vmatprep.subr.bf16.mxu0 %v7785_v21  ;;  %5094 = vmatprep.subr.bf16.mxu1 %v7789_v25 }
 0x177   :  { %5032 = vmatpush1.bf16.msra.mxu0 %v7793_v29  ;;  %5096 = vmatpush1.bf16.msra.mxu1 %v7795_v30 }
 0x178   :  { %5034 = vmatprep.subr.bf16.mxu0 %v7798_v34  ;;  %5098 = vmatprep.subr.bf16.mxu1 %v7800_v38 }
 0x17b   :  { %5036 = vmatpush1.bf16.msra.mxu0 %v7803_v42  ;;  %5100 = vmatpush1.bf16.msra.mxu1 %v7807_v46 }
 0x17c   :  { %5038 = vmatprep.subr.bf16.mxu0 %v7809_v47  ;;  %5102 = vmatprep.subr.bf16.mxu1 %v7812_v51 }
 0x17f   :  { %5040 = vmatpush1.bf16.msra.mxu0 %v7815_v57  ;;  %5104 = vmatpush1.bf16.msra.mxu1 %v7819_v58 }
 0x180   :  { %5042 = vmatprep.subr.bf16.mxu0 %v7821_v59  ;;  %5106 = vmatprep.subr.bf16.mxu1 %v7824_v63 }
 0x183   :  { %5044 = vmatpush1.bf16.msra.mxu0 %v7827_v6  ;;  %5108 = vmatpush1.bf16.msra.mxu1 %v7831_v7 }
 0x184   :  { %5046 = vmatprep.subr.bf16.mxu0 %v7833_v9  ;;  %5110 = vmatprep.subr.bf16.mxu1 %v7836_v14 }
 0x187   :  { %5048 = vmatpush1.bf16.msra.mxu0 %v7839_v23  ;;  %5112 = vmatpush1.bf16.msra.mxu1 %v7843_v24 }
 0x188   :  { %5050 = vmatprep.subr.bf16.mxu0 %v7845_v26  ;;  %5114 = vmatprep.subr.bf16.mxu1 %v7848_v32 }
 0x18b   :  { %5052 = vmatpush1.bf16.msra.mxu0 %v7854_v41  ;;  %5116 = vmatpush1.bf16.msra.mxu1 %v7859_v44 }
 0x18c   :  { %5054 = vmatprep.subr.bf16.mxu0 %v7861_v45  ;;  %5118 = vmatprep.subr.bf16.mxu1 %v7864_v52 }
 0x18f   :  { %5056 = vmatpush1.bf16.msra.mxu0 %v7873_v61  ;;  %5120 = vmatpush1.bf16.msra.mxu1 %v7878_v0 }
 0x190   :  { %5058 = vmatprep.subr.bf16.mxu0 %v7880_v2  ;;  %5122 = vmatprep.subr.bf16.mxu1 %v7886_v10 }
 0x193   :  { %5060 = vmatpush1.bf16.msra.mxu0 %v7892_v19  ;;  %5124 = vmatpush1.bf16.msra.mxu1 %v7897_v27 }
 0x194   :  { %5062 = vmatprep.subr.bf16.mxu0 %v7899_v28  ;;  %5126 = vmatprep.subr.bf16.mxu1 %v7905_v36 }
 0x197   :  { %5064 = vmatpush1.bf16.msra.mxu0 %v7911_v49  ;;  %5128 = vmatpush1.bf16.msra.mxu1 %v7916_v53 }
 0x198   :  { %5066 = vmatprep.subr.bf16.mxu0 %v7918_v54  ;;  %5130 = vmatprep.subr.bf16.mxu1 %v7924_v62 }
 0x19b   :  { %5068 = vmatpush1.bf16.msra.mxu0 %v10095_v18  ;;  %5132 = vmatpush1.bf16.msra.mxu1 %v10096_v17  ;;  %v10122_v17 = vsub.s32 3, %v8315_v39 }
 0x19c   :  { %5070 = vmatprep.subr.bf16.mxu0 %v10097_v11  ;;  %5134 = vmatprep.subr.bf16.mxu1 %v10098_v40 }
 0x19f   :  { %5072 = vmatpush1.bf16.msra.mxu0 %v10099_v31  ;;  %5136 = vmatpush1.bf16.msra.mxu1 %v10100_v13  ;;  %v10110_v31 = vld [vmem:[#allocation36_spill] sm:$0xff]  ;;  %v10111_v13 = vld [vmem:[#allocation37_spill] sm:$0xff] }
 0x1a0   :  { %5074 = vmatprep.subr.bf16.mxu0 %v10101_v43  ;;  %5138 = vmatprep.subr.bf16.mxu1 %v10102_v12  ;;  %v10112_v43 = vld [vmem:[#allocation38_spill] sm:$0xff]  ;;  %v10113_v12 = vld [vmem:[#allocation39_spill] sm:$0xff] }
 0x1a3   :  { %5076 = vmatpush1.bf16.msra.mxu0 %v10103_v15  ;;  %5140 = vmatpush1.bf16.msra.mxu1 %v10104_v1  ;;  %v10114_v15 = vld [vmem:[#allocation40_spill] sm:$0xff]  ;;  %v10115_v1 = vld [vmem:[#allocation41_spill] sm:$0xff] }
 0x1a4   :  { %5078 = vmatprep.subr.bf16.mxu0 %v10105_v4  ;;  %5142 = vmatprep.subr.bf16.mxu1 %v10106_v3  ;;  %v10116_v4 = vld [vmem:[#allocation42_spill] sm:$0xff]  ;;  %v10117_v3 = vld [vmem:[#allocation43_spill] sm:$0xff] }
 0x1a7   :  { %5080 = vmatpush1.bf16.msra.mxu0 %v10107_v8  ;;  %5144 = vmatpush1.bf16.msra.mxu1 %v10108_v55  ;;  %v10118_v8 = vld [vmem:[#allocation44_spill] sm:$0xff] }
 0x1a8   :  { %5082 = vmatprep.subr.bf16.mxu0 %v10109_v48  ;;  %5146 = vmatprep.subr.bf16.mxu1 %v10110_v31  ;;  %v1154_v31 = vld [vmem:[%s9678_s5] sm:$0xf] }
 0x1a9   :  { %v8430_v18 = vrot.slane %v1154_v31, %v10122_v17 }
 0x1ab   :  { %5084 = vmatpush1.bf16.msra.mxu0 %v10111_v13  ;;  %5148 = vmatpush1.bf16.msra.mxu1 %v10112_v43  ;;  %v10119_v13 = vsub.s32 0, %v8315_v39  ;;  %10123 = vst [vmem:[#allocation143_spill] sm:$0xff] %v8430_v18 }
 0x1ac   :  { %5086 = vmatprep.subr.bf16.mxu0 %v10113_v12  ;;  %5150 = vmatprep.subr.bf16.mxu1 %v10114_v15  ;;  %v10121_v12 = vsub.s32 1, %v8315_v39 }
 0x1ad   :  { %v8420_v48 = vrot.slane %v1154_v31, %v10119_v13 }
 0x1ae   :  { %v8424_v43 = vrot.slane %v1154_v31, %v10121_v12  ;;  %v10124_v12 = vsub.s32 2, %v8315_v39 }
 0x1af   :  { %5088 = vmatpush1.bf16.msra.mxu0 %v10115_v1  ;;  %5152 = vmatpush1.bf16.msra.mxu1 %v10116_v4  ;;  %10120 = vst [vmem:[#allocation142_spill] sm:$0xff] %v8420_v48 }
 0x1b0   :  { %5154 = vmatprep.subr.bf16.mxu0 %v10117_v3  ;;  %5218 = vmatprep.subr.bf16.mxu1 %v10118_v8  ;;  %v8435_v62 = vrot.slane %v1154_v31, %v10124_v12  ;;  %v10127_v12 = vld [vmem:[#allocation47_spill] sm:$0xff] }
 0x245   :  { %v1078_v15 = vpop.f32.mrb[16].mxu0  ;;  %v1149_v1 = vpop.f32.mrb[16].mxu1 }
 0x246   :  { %v1176_v4 = vadd.f32 %v8420_v48, %v1078_v15  ;;  %v1080_v55 = vpop.f32.mrb[17].mxu0  ;;  %v1151_v3 = vpop.f32.mrb[17].mxu1  ;;  %v1178_v15 = vadd.f32 %v8435_v62, %v1149_v1 }
 0x247   :  { %v1177_v8 = vadd.f32 %v8424_v43, %v1080_v55  ;;  %v1179_v13 = vadd.f32 %v8430_v18, %v1151_v3 }
 0x248   :  { %v4657_v40 = vmul.f32 -1.442695, %v1176_v4 }
 0x249   :  { %v4658_v11 = vmul.f32 -1.442695, %v1177_v8  ;;  %v4659_v54 = vmul.f32 -1.442695, %v1179_v13 }
 0x24a   :  { %7384 = vpow2.f32 %v4657_v40 }
 0x24b   :  { %7386 = vpow2.f32 %v4658_v11 }
 0x24c   :  { %7388 = vpow2.f32 %v4659_v54  ;;  %v10126_v54 = vld [vmem:[#allocation46_spill] sm:$0xff] }
 0x24d   :  { %7390 = vtanh.f32 %v1178_v15  ;;  %v10129_v15 = vld [vmem:[#allocation49_spill] sm:$0xff] }
 0x254   :  { %v7385_v48 = vpop.eup %7384 }
 0x255   :  { %v7387_v53 = vpop.eup %7386  ;;  %v1183_v55 = vadd.f32 1.0, %v7385_v48 }
 0x256   :  { %v1189_v4 = vadd.f32 1.0, %v7387_v53  ;;  %v7389_v17 = vpop.eup %7388  ;;  %v10125_v53 = vld [vmem:[#allocation45_spill] sm:$0xff] }
 0x257   :  { %7392 = vrcp.f32 %v1183_v55  ;;  %v7391_v40 = vpop.eup %7390  ;;  %v1196_v18 = vadd.f32 1.0, %v7389_v17  ;;  %v10130_v55 = vld [vmem:[#allocation50_spill] sm:$0xff]  ;;  %v10132_v17 = vld [vmem:[#allocation52_spill] sm:$0xff] }
 0x258   :  { %7394 = vrcp.f32 %v1189_v4  ;;  %v10131_v4 = vld [vmem:[#allocation51_spill] sm:$0xff] }
 0x259   :  { %7396 = vrcp.f32 %v1196_v18  ;;  %v10128_v18 = vld [vmem:[#allocation48_spill] sm:$0xff] }
 0x261   :  { %v7393_v11 = vpop.eup %7392 }
 0x262   :  { %v7395_v8 = vpop.eup %7394  ;;  %v1200_v3 = vmul.f32 %v7393_v11, %v7391_v40  ;;  %v10133_v40 = vld [vmem:[#allocation53_spill] sm:$0xff]  ;;  %v10134_v11 = vld [vmem:[#allocation54_spill] sm:$0xff] }
 0x263   :  { %v1199_v39 = vmul.f32 0.0, %v7395_v8  ;;  %v7397_v1 = vpop.eup %7396  ;;  %v10135_v8 = vld [vmem:[#allocation55_spill] sm:$0xff] }
 0x265   :  { %v8438_v31 = vadd.f32 %v1200_v3, %v1199_v39  ;;  %v10136_v3 = vld [vmem:[#allocation56_spill] sm:$0xff]  ;;  %v10137_v39 = vld [vmem:[#allocation57_spill] sm:$0xff] }
 0x267   :  { %7398 = vtanh.f32 %v8438_v31 }
 0x271   :  { %v7399_v13 = vpop.eup %7398 }
 0x272   :  { %v1203_v48 = vmul.f32 %v7399_v13, %v7397_v1  ;;  %v10138_v1 = vld [vmem:[#allocation58_spill] sm:$0xff]  ;;  %v10139_v13 = vld [vmem:[#allocation59_spill] sm:$0xff] }
 0x274   :  { %1268 = vmatprep.mubr.f32.mxu0 %v1203_v48  ;;  %1339 = vmatprep.mubr.f32.mxu1 %v1203_v48 }
 0x275   :  { %1269 = vmatmul.mubr.f32.vlgmr.msra.gmra.mrb[2].mxu0 %v8347_v60  ;;  %1340 = vmatmul.mubr.f32.vlgmr.msra.gmra.mrb[2].mxu1 %v8347_v60 }
 0x276   :  { %5156 = vmatpush1.bf16.msra.mxu0 %v10125_v53  ;;  %5220 = vmatpush1.bf16.msra.mxu1 %v10126_v54 }
 0x277   :  { %1410 = vmatprep.mubr.f32.mxu0 %v1203_v48  ;;  %1481 = vmatprep.mubr.f32.mxu1 %v1203_v48  ;;  %v10140_v48 = vld [vmem:[#allocation60_spill] sm:$0xff] }
 0x278   :  { %5158 = vmatprep.subr.bf16.mxu0 %v10127_v12  ;;  %5222 = vmatprep.subr.bf16.mxu1 %v10128_v18 }
 0x27a   :  { %5160 = vmatpush1.bf16.msra.mxu0 %v10129_v15  ;;  %5224 = vmatpush1.bf16.msra.mxu1 %v10130_v55  ;;  %v10141_v55 = vld [vmem:[#allocation61_spill] sm:$0xff] }
 0x27b   :  { %5162 = vmatprep.subr.bf16.mxu0 %v10131_v4  ;;  %5226 = vmatprep.subr.bf16.mxu1 %v10132_v17  ;;  %v10142_v4 = vld [vmem:[#allocation62_spill] sm:$0xff]  ;;  %v10143_v17 = vld [vmem:[#allocation63_spill] sm:$0xff] }
 0x27e   :  { %5164 = vmatpush1.bf16.msra.mxu0 %v10133_v40  ;;  %5228 = vmatpush1.bf16.msra.mxu1 %v10134_v11  ;;  %v10144_v40 = vld [vmem:[#allocation64_spill] sm:$0xff]  ;;  %v10145_v11 = vld [vmem:[#allocation65_spill] sm:$0xff] }
 0x27f   :  { %5166 = vmatprep.subr.bf16.mxu0 %v10135_v8  ;;  %5230 = vmatprep.subr.bf16.mxu1 %v10136_v3  ;;  %v10146_v8 = vld [vmem:[#allocation66_spill] sm:$0xff]  ;;  %v10147_v3 = vld [vmem:[#allocation67_spill] sm:$0xff] }
 0x282   :  { %5168 = vmatpush1.bf16.msra.mxu0 %v10137_v39  ;;  %5232 = vmatpush1.bf16.msra.mxu1 %v10138_v1  ;;  %v10148_v39 = vld [vmem:[#allocation68_spill] sm:$0xff]  ;;  %v10149_v1 = vld [vmem:[#allocation69_spill] sm:$0xff] }
 0x283   :  { %5170 = vmatprep.subr.bf16.mxu0 %v10139_v13  ;;  %5234 = vmatprep.subr.bf16.mxu1 %v10140_v48  ;;  %v10150_v13 = vld [vmem:[#allocation70_spill] sm:$0xff]  ;;  %v10151_v48 = vld [vmem:[#allocation71_spill] sm:$0xff] }
 0x286   :  { %5172 = vmatpush1.bf16.msra.mxu0 %v10141_v55  ;;  %5236 = vmatpush1.bf16.msra.mxu1 %v10142_v4  ;;  %v10152_v55 = vld [vmem:[#allocation72_spill] sm:$0xff]  ;;  %v10153_v4 = vld [vmem:[#allocation73_spill] sm:$0xff] }
 0x287   :  { %5174 = vmatprep.subr.bf16.mxu0 %v10143_v17  ;;  %5238 = vmatprep.subr.bf16.mxu1 %v10144_v40  ;;  %v10154_v17 = vld [vmem:[#allocation74_spill] sm:$0xff]  ;;  %v10155_v40 = vld [vmem:[#allocation75_spill] sm:$0xff] }
 0x28a   :  { %5176 = vmatpush1.bf16.msra.mxu0 %v10145_v11  ;;  %5240 = vmatpush1.bf16.msra.mxu1 %v10146_v8  ;;  %v10156_v11 = vld [vmem:[#allocation76_spill] sm:$0xff]  ;;  %v10157_v8 = vld [vmem:[#allocation77_spill] sm:$0xff] }
 0x28b   :  { %5178 = vmatprep.subr.bf16.mxu0 %v10147_v3  ;;  %5242 = vmatprep.subr.bf16.mxu1 %v10148_v39  ;;  %v10158_v3 = vld [vmem:[#allocation78_spill] sm:$0xff]  ;;  %v10159_v39 = vld [vmem:[#allocation79_spill] sm:$0xff] }
 0x28e   :  { %5180 = vmatpush1.bf16.msra.mxu0 %v10149_v1  ;;  %5244 = vmatpush1.bf16.msra.mxu1 %v10150_v13  ;;  %v10160_v1 = vld [vmem:[#allocation80_spill] sm:$0xff]  ;;  %v10161_v13 = vld [vmem:[#allocation81_spill] sm:$0xff] }
 0x28f   :  { %5182 = vmatprep.subr.bf16.mxu0 %v10151_v48  ;;  %5246 = vmatprep.subr.bf16.mxu1 %v10152_v55  ;;  %v10162_v48 = vld [vmem:[#allocation82_spill] sm:$0xff] }
 0x292   :  { %5184 = vmatpush1.bf16.msra.mxu0 %v10153_v4  ;;  %5248 = vmatpush1.bf16.msra.mxu1 %v10154_v17 }
 0x293   :  { %5186 = vmatprep.subr.bf16.mxu0 %v10155_v40  ;;  %5250 = vmatprep.subr.bf16.mxu1 %v10156_v11  ;;  %v10218_v40 = vld [vmem:[#allocation140_spill] sm:$0xff] }
 0x296   :  { %5188 = vmatpush1.bf16.msra.mxu0 %v10157_v8  ;;  %5252 = vmatpush1.bf16.msra.mxu1 %v10158_v3  ;;  %v10163_v8 = vld [vmem:[#allocation88_spill] sm:$0xff]  ;;  %v10164_v3 = vld [vmem:[#allocation89_spill] sm:$0xff] }
 0x297   :  { %5190 = vmatprep.subr.bf16.mxu0 %v10159_v39  ;;  %5254 = vmatprep.subr.bf16.mxu1 %v10160_v1  ;;  %v10165_v39 = vld [vmem:[#allocation90_spill] sm:$0xff]  ;;  %v10166_v1 = vld [vmem:[#allocation91_spill] sm:$0xff] }
 0x29a   :  { %5192 = vmatpush1.bf16.msra.mxu0 %v10161_v13  ;;  %5256 = vmatpush1.bf16.msra.mxu1 %v10162_v48  ;;  %v10167_v13 = vld [vmem:[#allocation92_spill] sm:$0xff]  ;;  %v10168_v48 = vld [vmem:[#allocation93_spill] sm:$0xff] }
 0x29b   :  { %5194 = vmatprep.subr.bf16.mxu0 %v8138_v33  ;;  %5258 = vmatprep.subr.bf16.mxu1 %v8141_v35  ;;  %v10169_v33 = vld [vmem:[#allocation94_spill] sm:$0xff]  ;;  %v10170_v35 = vld [vmem:[#allocation95_spill] sm:$0xff] }
 0x29e   :  { %5196 = vmatpush1.bf16.msra.mxu0 %v8144_v37  ;;  %5260 = vmatpush1.bf16.msra.mxu1 %v8148_v50  ;;  %v10171_v37 = vld [vmem:[#allocation96_spill] sm:$0xff]  ;;  %v10172_v50 = vld [vmem:[#allocation97_spill] sm:$0xff] }
 0x29f   :  { %5198 = vmatprep.subr.bf16.mxu0 %v8150_v5  ;;  %5262 = vmatprep.subr.bf16.mxu1 %v10163_v8  ;;  %v10173_v5 = vld [vmem:[#allocation98_spill] sm:$0xff]  ;;  %v10174_v8 = vld [vmem:[#allocation99_spill] sm:$0xff] }
 0x2a2   :  { %5200 = vmatpush1.bf16.msra.mxu0 %v10164_v3  ;;  %5264 = vmatpush1.bf16.msra.mxu1 %v10165_v39  ;;  %v10175_v3 = vld [vmem:[#allocation100_spill] sm:$0xff]  ;;  %v10176_v39 = vld [vmem:[#allocation101_spill] sm:$0xff] }
 0x2a3   :  { %5202 = vmatprep.subr.bf16.mxu0 %v10166_v1  ;;  %5266 = vmatprep.subr.bf16.mxu1 %v10167_v13  ;;  %v10177_v1 = vld [vmem:[#allocation102_spill] sm:$0xff]  ;;  %v10178_v13 = vld [vmem:[#allocation103_spill] sm:$0xff] }
 0x2a6   :  { %5204 = vmatpush1.bf16.msra.mxu0 %v10168_v48  ;;  %5268 = vmatpush1.bf16.msra.mxu1 %v10169_v33  ;;  %v10179_v48 = vld [vmem:[#allocation104_spill] sm:$0xff]  ;;  %v10180_v33 = vld [vmem:[#allocation105_spill] sm:$0xff] }
 0x2a7   :  { %5206 = vmatprep.subr.bf16.mxu0 %v10170_v35  ;;  %5270 = vmatprep.subr.bf16.mxu1 %v10171_v37  ;;  %v10181_v35 = vld [vmem:[#allocation106_spill] sm:$0xff]  ;;  %v10182_v37 = vld [vmem:[#allocation107_spill] sm:$0xff] }
 0x2aa   :  { %5208 = vmatpush1.bf16.msra.mxu0 %v10172_v50  ;;  %5272 = vmatpush1.bf16.msra.mxu1 %v10173_v5  ;;  %v10183_v50 = vld [vmem:[#allocation108_spill] sm:$0xff]  ;;  %v10217_v5 = vld [vmem:[#allocation139_spill] sm:$0xff] }
 0x2ab   :  { %5210 = vmatprep.subr.bf16.mxu0 %v10174_v8  ;;  %5274 = vmatprep.subr.bf16.mxu1 %v10175_v3  ;;  %v10184_v3 = vld [vmem:[#allocation109_spill] sm:$0xff]  ;;  %v10198_v8 = vld [vmem:[#allocation122_spill] sm:$0xff] }
 0x2ae   :  { %5212 = vmatpush1.bf16.msra.mxu0 %v10176_v39  ;;  %5276 = vmatpush1.bf16.msra.mxu1 %v10177_v1  ;;  %v10185_v39 = vld [vmem:[#allocation110_spill] sm:$0xff]  ;;  %v10186_v1 = vld [vmem:[#allocation111_spill] sm:$0xff] }
 0x2af   :  { %5214 = vmatprep.subr.bf16.mxu0 %v10178_v13  ;;  %5278 = vmatprep.subr.bf16.mxu1 %v10179_v48  ;;  %v10187_v13 = vld [vmem:[#allocation112_spill] sm:$0xff]  ;;  %v10188_v48 = vmov 0.0  }
 0x2b2   :  { %5216 = vmatpush1.bf16.msra.mxu0 %v10180_v33  ;;  %5280 = vmatpush1.bf16.msra.mxu1 %v10181_v35  ;;  %v10189_v35 = vld [vmem:[#allocation113_spill] sm:$0xff]  ;;  %v10192_v33 = vld [vmem:[#allocation116_spill] sm:$0xff] }
 0x2b3   :  { %5282 = vmatprep.subr.bf16.mxu0 %v10182_v37  ;;  %5314 = vmatprep.subr.bf16.mxu1 %v10183_v50  ;;  %v10190_v37 = vld [vmem:[#allocation114_spill] sm:$0xff]  ;;  %v10191_v50 = vld [vmem:[#allocation115_spill] sm:$0xff] }
 0x2b5   :  { %1411 = vmatmul.mubr.f32.vlgmr.msra.gmra.mrb[18].mxu0 %v8347_v60  ;;  %1482 = vmatmul.mubr.f32.vlgmr.msra.gmra.mrb[18].mxu1 %v8347_v60  ;;  %v10193_v60 = vld [vmem:[#allocation117_spill] sm:$0xff] }
 0x2b6   :  { %5284 = vmatpush1.bf16.msra.mxu0 %v10184_v3  ;;  %5316 = vmatpush1.bf16.msra.mxu1 %v10185_v39  ;;  %v10194_v3 = vld [vmem:[#allocation118_spill] sm:$0xff]  ;;  %v10195_v39 = vld [vmem:[#allocation119_spill] sm:$0xff] }
 0x2b7   :  { %5286 = vmatprep.subr.bf16.mxu0 %v10186_v1  ;;  %5318 = vmatprep.subr.bf16.mxu1 %v10187_v13  ;;  %v10196_v1 = vld [vmem:[#allocation120_spill] sm:$0xff]  ;;  %v10197_v13 = vld [vmem:[#allocation121_spill] sm:$0xff] }
 0x2b8   :  { %1584 = vmatprep.mubr.f32.mxu0 %v10188_v48  ;;  %1655 = vmatprep.mubr.f32.mxu1 %v10188_v48  ;;  %v10199_v48 = vld [vmem:[#allocation123_spill] sm:$0xff] }
 0x2ba   :  { %5288 = vmatpush1.bf16.msra.mxu0 %v10189_v35  ;;  %5320 = vmatpush1.bf16.msra.mxu1 %v10190_v37  ;;  %v10200_v35 = vld [vmem:[#allocation124_spill] sm:$0xff]  ;;  %v10201_v37 = vld [vmem:[#allocation125_spill] sm:$0xff] }
 0x2bb   :  { %5290 = vmatprep.subr.bf16.mxu0 %v10191_v50  ;;  %5322 = vmatprep.subr.bf16.mxu1 %v10192_v33  ;;  %v10202_v50 = vld [vmem:[#allocation126_spill] sm:$0xff]  ;;  %v10203_v33 = vld [vmem:[#allocation127_spill] sm:$0xff] }
 0x2be   :  { %5292 = vmatpush1.bf16.msra.mxu0 %v10193_v60  ;;  %5324 = vmatpush1.bf16.msra.mxu1 %v10194_v3  ;;  %v10204_v60 = vld [vmem:[#allocation128_spill] sm:$0xff]  ;;  %v10205_v3 = vld [vmem:[#allocation129_spill] sm:$0xff] }
 0x2bf   :  { %5294 = vmatprep.subr.bf16.mxu0 %v10195_v39  ;;  %5326 = vmatprep.subr.bf16.mxu1 %v10196_v1  ;;  %v10206_v39 = vld [vmem:[#allocation130_spill] sm:$0xff]  ;;  %v10207_v1 = vld [vmem:[#allocation131_spill] sm:$0xff] }
 0x2c2   :  { %5296 = vmatpush1.bf16.msra.mxu0 %v10197_v13  ;;  %5328 = vmatpush1.bf16.msra.mxu1 %v10198_v8  ;;  %v10208_v13 = vld [vmem:[#allocation132_spill] sm:$0xff]  ;;  %v10209_v8 = vld [vmem:[#allocation133_spill] sm:$0xff] }
 0x2c3   :  { %5298 = vmatprep.subr.bf16.mxu0 %v10199_v48  ;;  %5330 = vmatprep.subr.bf16.mxu1 %v10200_v35  ;;  %v10210_v48 = vld [vmem:[#allocation134_spill] sm:$0xff]  ;;  %v10211_v35 = vld [vmem:[#allocation135_spill] sm:$0xff] }
 0x2c6   :  { %5300 = vmatpush1.bf16.msra.mxu0 %v10201_v37  ;;  %5332 = vmatpush1.bf16.msra.mxu1 %v10202_v50  ;;  %v10212_v37 = vld [vmem:[#allocation136_spill] sm:$0xff]  ;;  %v10213_v50 = vld [vmem:[#allocation137_spill] sm:$0xff] }
 0x2c7   :  { %5302 = vmatprep.subr.bf16.mxu0 %v10203_v33  ;;  %5334 = vmatprep.subr.bf16.mxu1 %v10204_v60  ;;  %v10214_v33 = vld [vmem:[#allocation138_spill] sm:$0xff] }
 0x2c8   :  { %v10215_v60 = vld [vmem:[#allocation10_spill] sm:$0xff] }
 0x2ca   :  { %5304 = vmatpush1.bf16.msra.mxu0 %v10205_v3  ;;  %5336 = vmatpush1.bf16.msra.mxu1 %v10206_v39  ;;  %v10216_v3 = vld [vmem:[#allocation11_spill] sm:$0xff] }
 0x2cb   :  { %5306 = vmatprep.subr.bf16.mxu0 %v10207_v1  ;;  %5338 = vmatprep.subr.bf16.mxu1 %v10208_v13 }
 0x2ce   :  { %5308 = vmatpush1.bf16.msra.mxu0 %v10209_v8  ;;  %5340 = vmatpush1.bf16.msra.mxu1 %v10210_v48 }
 0x2cf   :  { %5310 = vmatprep.subr.bf16.mxu0 %v10211_v35  ;;  %5342 = vmatprep.subr.bf16.mxu1 %v10212_v37  ;;  %v10219_v37 = vld [vmem:[#allocation141_spill] sm:$0xff] }
 0x2d2   :  { %5312 = vmatpush1.bf16.msra.mxu0 %v10213_v50  ;;  %5344 = vmatpush1.bf16.msra.mxu1 %v10214_v33 }
 0x2d3   :  { %5346 = vmatprep.subr.bf16.mxu0 %v10215_v60  ;;  %5410 = vmatprep.subr.bf16.mxu1 %v10216_v3 }
 0x348   :  { %v1270_v39 = vpop.f32.mrb[2].mxu0  ;;  %v1341_v1 = vpop.f32.mrb[2].mxu1 }
 0x349   :  { %v7267_v13 = vadd.f32 %v1270_v39, %v10217_v5  ;;  %v1272_v11 = vpop.f32.mrb[3].mxu0  ;;  %v1343_v8 = vpop.f32.mrb[3].mxu1  ;;  %v7283_v33 = vadd.f32 %v1341_v1, %v8341_v56 }
 0x34a   :  { %v7268_v48 = vadd.f32 %v1272_v11, %v10218_v40  ;;  %v7284_v50 = vadd.f32 %v1343_v8, %v10219_v37 }
 0x34b   :  { %v4660_v17 = vmul.f32 -1.442695, %v7267_v13 }
 0x34c   :  { %v4661_v35 = vmul.f32 -1.442695, %v7268_v48  ;;  %v4662_v4 = vmul.f32 -1.442695, %v7284_v50 }
 0x34d   :  { %7400 = vpow2.f32 %v4660_v17 }
 0x34e   :  { %7402 = vpow2.f32 %v4661_v35 }
 0x34f   :  { %7404 = vpow2.f32 %v4662_v4 }
 0x350   :  { %7406 = vtanh.f32 %v7283_v33  ;;  %v10220_v33 = vld [vmem:[#allocation18_spill] sm:$0xff] }
 0x357   :  { %v7401_v60 = vpop.eup %7400 }
 0x358   :  { %v7403_v55 = vpop.eup %7402  ;;  %v1499_v3 = vadd.f32 1.0, %v7401_v60  ;;  %v10226_v60 = vld [vmem:[#allocation24_spill] sm:$0xff] }
 0x359   :  { %v1505_v15 = vadd.f32 1.0, %v7403_v55  ;;  %v7405_v39 = vpop.eup %7404  ;;  %v10224_v55 = vld [vmem:[#allocation22_spill] sm:$0xff] }
 0x35a   :  { %7408 = vrcp.f32 %v1499_v3  ;;  %v7407_v5 = vpop.eup %7406  ;;  %v1512_v17 = vadd.f32 1.0, %v7405_v39  ;;  %v10225_v3 = vld [vmem:[#allocation23_spill] sm:$0xff]  ;;  %v10227_v39 = vld [vmem:[#allocation25_spill] sm:$0xff] }
 0x35b   :  { %7410 = vrcp.f32 %v1505_v15  ;;  %v10223_v15 = vld [vmem:[#allocation21_spill] sm:$0xff] }
 0x35c   :  { %7412 = vrcp.f32 %v1512_v17  ;;  %v10231_v17 = vld [vmem:[#allocation29_spill] sm:$0xff] }
 0x364   :  { %v7409_v11 = vpop.eup %7408 }
 0x365   :  { %v7411_v13 = vpop.eup %7410  ;;  %v1516_v48 = vmul.f32 %v7409_v11, %v7407_v5  ;;  %v10221_v5 = vld [vmem:[#allocation19_spill] sm:$0xff]  ;;  %v10228_v11 = vld [vmem:[#allocation26_spill] sm:$0xff] }
 0x366   :  { %v1515_v35 = vmul.f32 %v7411_v13, %v8344_v22  ;;  %v7413_v50 = vpop.eup %7412  ;;  %v10222_v22 = vld [vmem:[#allocation20_spill] sm:$0xff]  ;;  %v10229_v13 = vld [vmem:[#allocation27_spill] sm:$0xff] }
 0x368   :  { %v8548_v8 = vadd.f32 %v1516_v48, %v1515_v35  ;;  %v10230_v48 = vld [vmem:[#allocation28_spill] sm:$0xff]  ;;  %v10232_v35 = vld [vmem:[#allocation30_spill] sm:$0xff] }
 0x36a   :  { %7414 = vtanh.f32 %v8548_v8 }
 0x374   :  { %v7415_v1 = vpop.eup %7414 }
 0x375   :  { %v8551_v4 = vmul.f32 %v7415_v1, %v7413_v50  ;;  %v10233_v50 = vld [vmem:[#allocation31_spill] sm:$0xff]  ;;  %v10234_v1 = vld [vmem:[#allocation32_spill] sm:$0xff] }
 0x377   :  { %1585 = vmatmul.mubr.f32.vlgmr.msra.gmra.mrb[18].mxu0 %v8551_v4  ;;  %1656 = vmatmul.mubr.f32.vlgmr.msra.gmra.mrb[18].mxu1 %v8551_v4 }
 0x378   :  { %5348 = vmatpush1.bf16.msra.mxu0 %v7779_v16  ;;  %5412 = vmatpush1.bf16.msra.mxu1 %v7783_v20 }
 0x379   :  { %5350 = vmatprep.subr.bf16.mxu0 %v7785_v21  ;;  %5414 = vmatprep.subr.bf16.mxu1 %v7789_v25 }
 0x37c   :  { %5352 = vmatpush1.bf16.msra.mxu0 %v7793_v29  ;;  %5416 = vmatpush1.bf16.msra.mxu1 %v7795_v30 }
 0x37d   :  { %5354 = vmatprep.subr.bf16.mxu0 %v7798_v34  ;;  %5418 = vmatprep.subr.bf16.mxu1 %v7800_v38 }
 0x380   :  { %5356 = vmatpush1.bf16.msra.mxu0 %v7803_v42  ;;  %5420 = vmatpush1.bf16.msra.mxu1 %v7807_v46 }
 0x381   :  { %5358 = vmatprep.subr.bf16.mxu0 %v7809_v47  ;;  %5422 = vmatprep.subr.bf16.mxu1 %v7812_v51 }
 0x384   :  { %5360 = vmatpush1.bf16.msra.mxu0 %v7815_v57  ;;  %5424 = vmatpush1.bf16.msra.mxu1 %v7819_v58 }
 0x385   :  { %5362 = vmatprep.subr.bf16.mxu0 %v7821_v59  ;;  %5426 = vmatprep.subr.bf16.mxu1 %v7824_v63 }
 0x388   :  { %5364 = vmatpush1.bf16.msra.mxu0 %v7827_v6  ;;  %5428 = vmatpush1.bf16.msra.mxu1 %v7831_v7 }
 0x389   :  { %5366 = vmatprep.subr.bf16.mxu0 %v7833_v9  ;;  %5430 = vmatprep.subr.bf16.mxu1 %v7836_v14 }
 0x38c   :  { %5368 = vmatpush1.bf16.msra.mxu0 %v7839_v23  ;;  %5432 = vmatpush1.bf16.msra.mxu1 %v7843_v24 }
 0x38d   :  { %5370 = vmatprep.subr.bf16.mxu0 %v7845_v26  ;;  %5434 = vmatprep.subr.bf16.mxu1 %v7848_v32 }
 0x390   :  { %5372 = vmatpush1.bf16.msra.mxu0 %v7854_v41  ;;  %5436 = vmatpush1.bf16.msra.mxu1 %v7859_v44 }
 0x391   :  { %5374 = vmatprep.subr.bf16.mxu0 %v7861_v45  ;;  %5438 = vmatprep.subr.bf16.mxu1 %v7864_v52 }
 0x394   :  { %5376 = vmatpush1.bf16.msra.mxu0 %v7873_v61  ;;  %5440 = vmatpush1.bf16.msra.mxu1 %v7878_v0 }
 0x395   :  { %5378 = vmatprep.subr.bf16.mxu0 %v7880_v2  ;;  %5442 = vmatprep.subr.bf16.mxu1 %v7886_v10 }
 0x398   :  { %5380 = vmatpush1.bf16.msra.mxu0 %v7892_v19  ;;  %5444 = vmatpush1.bf16.msra.mxu1 %v7897_v27 }
 0x399   :  { %5382 = vmatprep.subr.bf16.mxu0 %v7899_v28  ;;  %5446 = vmatprep.subr.bf16.mxu1 %v7905_v36 }
 0x39c   :  { %5384 = vmatpush1.bf16.msra.mxu0 %v7911_v49  ;;  %5448 = vmatpush1.bf16.msra.mxu1 %v10220_v33 }
 0x39d   :  { %5386 = vmatprep.subr.bf16.mxu0 %v10221_v5  ;;  %5450 = vmatprep.subr.bf16.mxu1 %v10222_v22 }
 0x3a0   :  { %5388 = vmatpush1.bf16.msra.mxu0 %v10223_v15  ;;  %5452 = vmatpush1.bf16.msra.mxu1 %v10224_v55  ;;  %v10235_v55 = vld [vmem:[#allocation33_spill] sm:$0xff]  ;;  %v10247_v15 = vld [vmem:[#allocation142_spill] sm:$0xff] }
 0x3a1   :  { %5390 = vmatprep.subr.bf16.mxu0 %v10225_v3  ;;  %5454 = vmatprep.subr.bf16.mxu1 %v10226_v60  ;;  %v10236_v3 = vld [vmem:[#allocation34_spill] sm:$0xff]  ;;  %v10237_v60 = vld [vmem:[#allocation35_spill] sm:$0xff] }
 0x3a4   :  { %5392 = vmatpush1.bf16.msra.mxu0 %v10227_v39  ;;  %5456 = vmatpush1.bf16.msra.mxu1 %v10228_v11  ;;  %v10238_v39 = vld [vmem:[#allocation36_spill] sm:$0xff]  ;;  %v10239_v11 = vld [vmem:[#allocation37_spill] sm:$0xff] }
 0x3a5   :  { %5394 = vmatprep.subr.bf16.mxu0 %v10229_v13  ;;  %5458 = vmatprep.subr.bf16.mxu1 %v10230_v48  ;;  %v10240_v13 = vld [vmem:[#allocation38_spill] sm:$0xff]  ;;  %v10241_v48 = vld [vmem:[#allocation39_spill] sm:$0xff] }
 0x3a8   :  { %5396 = vmatpush1.bf16.msra.mxu0 %v10231_v17  ;;  %5460 = vmatpush1.bf16.msra.mxu1 %v10232_v35  ;;  %v10242_v17 = vld [vmem:[#allocation40_spill] sm:$0xff]  ;;  %v10243_v35 = vld [vmem:[#allocation41_spill] sm:$0xff] }
 0x3a9   :  { %5398 = vmatprep.subr.bf16.mxu0 %v10233_v50  ;;  %5462 = vmatprep.subr.bf16.mxu1 %v10234_v1  ;;  %v10244_v50 = vld [vmem:[#allocation42_spill] sm:$0xff]  ;;  %v10245_v1 = vld [vmem:[#allocation43_spill] sm:$0xff] }
 0x3ac   :  { %5400 = vmatpush1.bf16.msra.mxu0 %v10235_v55  ;;  %5464 = vmatpush1.bf16.msra.mxu1 %v10236_v3  ;;  %v10246_v55 = vld [vmem:[#allocation44_spill] sm:$0xff] }
 0x3ad   :  { %5402 = vmatprep.subr.bf16.mxu0 %v10237_v60  ;;  %5466 = vmatprep.subr.bf16.mxu1 %v10238_v39 }
 0x3b0   :  { %5404 = vmatpush1.bf16.msra.mxu0 %v10239_v11  ;;  %5468 = vmatpush1.bf16.msra.mxu1 %v10240_v13 }
 0x3b1   :  { %5406 = vmatprep.subr.bf16.mxu0 %v10241_v48  ;;  %5470 = vmatprep.subr.bf16.mxu1 %v10242_v17  ;;  %v10248_v17 = vld [vmem:[#allocation143_spill] sm:$0xff] }
 0x3b4   :  { %5408 = vmatpush1.bf16.msra.mxu0 %v10243_v35  ;;  %5472 = vmatpush1.bf16.msra.mxu1 %v10244_v50 }
 0x3b5   :  { %5474 = vmatprep.subr.bf16.mxu0 %v10245_v1  ;;  %5538 = vmatprep.subr.bf16.mxu1 %v10246_v55 }
 0x44a   :  { %v1586_v3 = vpop.f32.mrb[18].mxu0  ;;  %v1657_v60 = vpop.f32.mrb[18].mxu1 }
 0x44b   :  { %v1662_v39 = vadd.f32 %v1586_v3, %v10247_v15  ;;  %v1588_v22 = vpop.f32.mrb[19].mxu0  ;;  %v1659_v11 = vpop.f32.mrb[19].mxu1  ;;  %v1664_v50 = vadd.f32 %v1657_v60, %v8435_v62 }
 0x44c   :  { %v1663_v13 = vadd.f32 %v1588_v22, %v8424_v43  ;;  %v1665_v35 = vadd.f32 %v1659_v11, %v10248_v17 }
 0x44d   :  { %v4663_v5 = vmul.f32 -1.442695, %v1662_v39 }
 0x44e   :  { %v4664_v48 = vmul.f32 -1.442695, %v1663_v13  ;;  %v4665_v33 = vmul.f32 -1.442695, %v1665_v35 }
 0x44f   :  { %7416 = vpow2.f32 %v4663_v5 }
 0x450   :  { %7418 = vpow2.f32 %v4664_v48 }
 0x451   :  { %7420 = vpow2.f32 %v4665_v33 }
 0x452   :  { %7422 = vtanh.f32 %v1664_v50  ;;  %v10254_v50 = vld [vmem:[#allocation54_spill] sm:$0xff] }
 0x459   :  { %v7417_v1 = vpop.eup %7416 }
 0x45a   :  { %v7419_v49 = vpop.eup %7418  ;;  %v1669_v55 = vadd.f32 1.0, %v7417_v1  ;;  %v10255_v1 = vld [vmem:[#allocation55_spill] sm:$0xff] }
 0x45b   :  { %v1675_v36 = vadd.f32 1.0, %v7419_v49  ;;  %v7421_v3 = vpop.eup %7420  ;;  %v10250_v49 = vld [vmem:[#allocation50_spill] sm:$0xff] }
 0x45c   :  { %7424 = vrcp.f32 %v1669_v55  ;;  %v7423_v15 = vpop.eup %7422  ;;  %v1682_v5 = vadd.f32 1.0, %v7421_v3  ;;  %v10253_v55 = vld [vmem:[#allocation53_spill] sm:$0xff]  ;;  %v10256_v3 = vld [vmem:[#allocation56_spill] sm:$0xff] }
 0x45d   :  { %7426 = vrcp.f32 %v1675_v36  ;;  %v10249_v36 = vld [vmem:[#allocation49_spill] sm:$0xff] }
 0x45e   :  { %7428 = vrcp.f32 %v1682_v5  ;;  %v10260_v5 = vld [vmem:[#allocation60_spill] sm:$0xff] }
 0x466   :  { %v7425_v22 = vpop.eup %7424 }
 0x467   :  { %v7427_v39 = vpop.eup %7426  ;;  %v1686_v13 = vmul.f32 %v7425_v22, %v7423_v15  ;;  %v10252_v15 = vld [vmem:[#allocation52_spill] sm:$0xff]  ;;  %v10257_v22 = vld [vmem:[#allocation57_spill] sm:$0xff] }
 0x468   :  { %v1685_v48 = vmul.f32 %v7427_v39, %v8438_v31  ;;  %v7429_v60 = vpop.eup %7428  ;;  %v10251_v31 = vld [vmem:[#allocation51_spill] sm:$0xff]  ;;  %v10258_v39 = vld [vmem:[#allocation58_spill] sm:$0xff] }
 0x46a   :  { %v8624_v11 = vadd.f32 %v1686_v13, %v1685_v48  ;;  %v10259_v13 = vld [vmem:[#allocation59_spill] sm:$0xff]  ;;  %v10261_v48 = vld [vmem:[#allocation61_spill] sm:$0xff] }
 0x46c   :  { %7430 = vtanh.f32 %v8624_v11 }
 0x476   :  { %v7431_v35 = vpop.eup %7430 }
 0x477   :  { %v1689_v33 = vmul.f32 %v7431_v35, %v7429_v60  ;;  %v10262_v60 = vld [vmem:[#allocation62_spill] sm:$0xff]  ;;  %v10263_v35 = vld [vmem:[#allocation63_spill] sm:$0xff] }
 0x479   :  { %1754 = vmatprep.mubr.f32.mxu0 %v1689_v33  ;;  %1825 = vmatprep.mubr.f32.mxu1 %v1689_v33 }
 0x47a   :  { %1755 = vmatmul.mubr.f32.vlgmr.msra.gmra.mrb[4].mxu0 %v8551_v4  ;;  %1826 = vmatmul.mubr.f32.vlgmr.msra.gmra.mrb[4].mxu1 %v8551_v4 }
 0x47b   :  { %5476 = vmatpush1.bf16.msra.mxu0 %v10125_v53  ;;  %5540 = vmatpush1.bf16.msra.mxu1 %v10126_v54 }
 0x47c   :  { %1896 = vmatprep.mubr.f32.mxu0 %v1689_v33  ;;  %1967 = vmatprep.mubr.f32.mxu1 %v1689_v33  ;;  %v10264_v33 = vld [vmem:[#allocation64_spill] sm:$0xff] }
 0x47d   :  { %5478 = vmatprep.subr.bf16.mxu0 %v10127_v12  ;;  %5542 = vmatprep.subr.bf16.mxu1 %v10128_v18 }
 0x47f   :  { %5480 = vmatpush1.bf16.msra.mxu0 %v10249_v36  ;;  %5544 = vmatpush1.bf16.msra.mxu1 %v10250_v49 }
 0x480   :  { %5482 = vmatprep.subr.bf16.mxu0 %v10251_v31  ;;  %5546 = vmatprep.subr.bf16.mxu1 %v10252_v15 }
 0x483   :  { %5484 = vmatpush1.bf16.msra.mxu0 %v10253_v55  ;;  %5548 = vmatpush1.bf16.msra.mxu1 %v10254_v50  ;;  %v10265_v50 = vld [vmem:[#allocation65_spill] sm:$0xff] }
 0x484   :  { %5486 = vmatprep.subr.bf16.mxu0 %v10255_v1  ;;  %5550 = vmatprep.subr.bf16.mxu1 %v10256_v3  ;;  %v10266_v1 = vld [vmem:[#allocation66_spill] sm:$0xff]  ;;  %v10267_v3 = vld [vmem:[#allocation67_spill] sm:$0xff] }
 0x487   :  { %5488 = vmatpush1.bf16.msra.mxu0 %v10257_v22  ;;  %5552 = vmatpush1.bf16.msra.mxu1 %v10258_v39  ;;  %v10268_v22 = vld [vmem:[#allocation68_spill] sm:$0xff]  ;;  %v10269_v39 = vld [vmem:[#allocation69_spill] sm:$0xff] }
 0x488   :  { %5490 = vmatprep.subr.bf16.mxu0 %v10259_v13  ;;  %5554 = vmatprep.subr.bf16.mxu1 %v10260_v5  ;;  %v10270_v13 = vld [vmem:[#allocation70_spill] sm:$0xff]  ;;  %v10271_v5 = vld [vmem:[#allocation71_spill] sm:$0xff] }
 0x48b   :  { %5492 = vmatpush1.bf16.msra.mxu0 %v10261_v48  ;;  %5556 = vmatpush1.bf16.msra.mxu1 %v10262_v60  ;;  %v10272_v48 = vld [vmem:[#allocation72_spill] sm:$0xff]  ;;  %v10273_v60 = vld [vmem:[#allocation73_spill] sm:$0xff] }
 0x48c   :  { %5494 = vmatprep.subr.bf16.mxu0 %v10263_v35  ;;  %5558 = vmatprep.subr.bf16.mxu1 %v10264_v33  ;;  %v10274_v35 = vld [vmem:[#allocation74_spill] sm:$0xff]  ;;  %v10275_v33 = vld [vmem:[#allocation75_spill] sm:$0xff] }
 0x48f   :  { %5496 = vmatpush1.bf16.msra.mxu0 %v10265_v50  ;;  %5560 = vmatpush1.bf16.msra.mxu1 %v10266_v1  ;;  %v10276_v50 = vld [vmem:[#allocation76_spill] sm:$0xff]  ;;  %v10277_v1 = vld [vmem:[#allocation77_spill] sm:$0xff] }
 0x490   :  { %5498 = vmatprep.subr.bf16.mxu0 %v10267_v3  ;;  %5562 = vmatprep.subr.bf16.mxu1 %v10268_v22  ;;  %v10278_v3 = vld [vmem:[#allocation78_spill] sm:$0xff]  ;;  %v10279_v22 = vld [vmem:[#allocation79_spill] sm:$0xff] }
 0x493   :  { %5500 = vmatpush1.bf16.msra.mxu0 %v10269_v39  ;;  %5564 = vmatpush1.bf16.msra.mxu1 %v10270_v13  ;;  %v10280_v39 = vld [vmem:[#allocation80_spill] sm:$0xff]  ;;  %v10281_v13 = vld [vmem:[#allocation81_spill] sm:$0xff] }
 0x494   :  { %5502 = vmatprep.subr.bf16.mxu0 %v10271_v5  ;;  %5566 = vmatprep.subr.bf16.mxu1 %v10272_v48  ;;  %v10282_v5 = vld [vmem:[#allocation82_spill] sm:$0xff]  ;;  %v10283_v48 = vld [vmem:[#allocation83_spill] sm:$0xff] }
 0x497   :  { %5504 = vmatpush1.bf16.msra.mxu0 %v10273_v60  ;;  %5568 = vmatpush1.bf16.msra.mxu1 %v10274_v35  ;;  %v10284_v60 = vld [vmem:[#allocation84_spill] sm:$0xff]  ;;  %v10285_v35 = vld [vmem:[#allocation85_spill] sm:$0xff] }
 0x498   :  { %5506 = vmatprep.subr.bf16.mxu0 %v10275_v33  ;;  %5570 = vmatprep.subr.bf16.mxu1 %v10276_v50  ;;  %v10286_v33 = vld [vmem:[#allocation86_spill] sm:$0xff]  ;;  %v10287_v50 = vld [vmem:[#allocation87_spill] sm:$0xff] }
 0x49b   :  { %5508 = vmatpush1.bf16.msra.mxu0 %v10277_v1  ;;  %5572 = vmatpush1.bf16.msra.mxu1 %v10278_v3  ;;  %v10288_v1 = vld [vmem:[#allocation88_spill] sm:$0xff]  ;;  %v10289_v3 = vld [vmem:[#allocation89_spill] sm:$0xff] }
 0x49c   :  { %5510 = vmatprep.subr.bf16.mxu0 %v10279_v22  ;;  %5574 = vmatprep.subr.bf16.mxu1 %v10280_v39  ;;  %v10290_v22 = vld [vmem:[#allocation90_spill] sm:$0xff]  ;;  %v10291_v39 = vld [vmem:[#allocation91_spill] sm:$0xff] }
 0x49f   :  { %5512 = vmatpush1.bf16.msra.mxu0 %v10281_v13  ;;  %5576 = vmatpush1.bf16.msra.mxu1 %v10282_v5  ;;  %v10292_v13 = vld [vmem:[#allocation92_spill] sm:$0xff]  ;;  %v10293_v5 = vld [vmem:[#allocation93_spill] sm:$0xff] }
 0x4a0   :  { %5514 = vmatprep.subr.bf16.mxu0 %v10283_v48  ;;  %5578 = vmatprep.subr.bf16.mxu1 %v10284_v60  ;;  %v10294_v48 = vld [vmem:[#allocation94_spill] sm:$0xff]  ;;  %v10295_v60 = vld [vmem:[#allocation95_spill] sm:$0xff] }
 0x4a3   :  { %5516 = vmatpush1.bf16.msra.mxu0 %v10285_v35  ;;  %5580 = vmatpush1.bf16.msra.mxu1 %v10286_v33  ;;  %v10296_v35 = vld [vmem:[#allocation96_spill] sm:$0xff]  ;;  %v10297_v33 = vld [vmem:[#allocation97_spill] sm:$0xff] }
 0x4a4   :  { %5518 = vmatprep.subr.bf16.mxu0 %v10287_v50  ;;  %5582 = vmatprep.subr.bf16.mxu1 %v10288_v1  ;;  %v10298_v50 = vld [vmem:[#allocation98_spill] sm:$0xff]  ;;  %v10299_v1 = vld [vmem:[#allocation99_spill] sm:$0xff] }
 0x4a7   :  { %5520 = vmatpush1.bf16.msra.mxu0 %v10289_v3  ;;  %5584 = vmatpush1.bf16.msra.mxu1 %v10290_v22  ;;  %v10300_v3 = vld [vmem:[#allocation100_spill] sm:$0xff]  ;;  %v10301_v22 = vld [vmem:[#allocation101_spill] sm:$0xff] }
 0x4a8   :  { %5522 = vmatprep.subr.bf16.mxu0 %v10291_v39  ;;  %5586 = vmatprep.subr.bf16.mxu1 %v10292_v13  ;;  %v10302_v39 = vld [vmem:[#allocation102_spill] sm:$0xff]  ;;  %v10303_v13 = vld [vmem:[#allocation103_spill] sm:$0xff] }
 0x4ab   :  { %5524 = vmatpush1.bf16.msra.mxu0 %v10293_v5  ;;  %5588 = vmatpush1.bf16.msra.mxu1 %v10294_v48  ;;  %v10304_v5 = vld [vmem:[#allocation104_spill] sm:$0xff]  ;;  %v10305_v48 = vld [vmem:[#allocation105_spill] sm:$0xff] }
 0x4ac   :  { %5526 = vmatprep.subr.bf16.mxu0 %v10295_v60  ;;  %5590 = vmatprep.subr.bf16.mxu1 %v10296_v35  ;;  %v10306_v60 = vld [vmem:[#allocation106_spill] sm:$0xff]  ;;  %v10307_v35 = vld [vmem:[#allocation107_spill] sm:$0xff] }
 0x4af   :  { %5528 = vmatpush1.bf16.msra.mxu0 %v10297_v33  ;;  %5592 = vmatpush1.bf16.msra.mxu1 %v10298_v50  ;;  %v10308_v33 = vld [vmem:[#allocation108_spill] sm:$0xff]  ;;  %v10342_v50 = vld [vmem:[#allocation139_spill] sm:$0xff] }
 0x4b0   :  { %5530 = vmatprep.subr.bf16.mxu0 %v10299_v1  ;;  %5594 = vmatprep.subr.bf16.mxu1 %v10300_v3  ;;  %v10309_v3 = vld [vmem:[#allocation109_spill] sm:$0xff]  ;;  %v10323_v1 = vld [vmem:[#allocation122_spill] sm:$0xff] }
 0x4b3   :  { %5532 = vmatpush1.bf16.msra.mxu0 %v10301_v22  ;;  %5596 = vmatpush1.bf16.msra.mxu1 %v10302_v39  ;;  %v10310_v22 = vld [vmem:[#allocation110_spill] sm:$0xff]  ;;  %v10311_v39 = vld [vmem:[#allocation111_spill] sm:$0xff] }
 0x4b4   :  { %5534 = vmatprep.subr.bf16.mxu0 %v10303_v13  ;;  %5598 = vmatprep.subr.bf16.mxu1 %v10304_v5  ;;  %v10312_v13 = vld [vmem:[#allocation112_spill] sm:$0xff]  ;;  %v10313_v5 = vmov 0.0  }
 0x4b7   :  { %5536 = vmatpush1.bf16.msra.mxu0 %v10305_v48  ;;  %5600 = vmatpush1.bf16.msra.mxu1 %v10306_v60  ;;  %v10314_v60 = vld [vmem:[#allocation113_spill] sm:$0xff]  ;;  %v10317_v48 = vld [vmem:[#allocation116_spill] sm:$0xff] }
 0x4b8   :  { %5602 = vmatprep.subr.bf16.mxu0 %v10307_v35  ;;  %5634 = vmatprep.subr.bf16.mxu1 %v10308_v33  ;;  %v10315_v35 = vld [vmem:[#allocation114_spill] sm:$0xff]  ;;  %v10316_v33 = vld [vmem:[#allocation115_spill] sm:$0xff] }
 0x4ba   :  { %1897 = vmatmul.mubr.f32.vlgmr.msra.gmra.mrb[20].mxu0 %v8551_v4  ;;  %1968 = vmatmul.mubr.f32.vlgmr.msra.gmra.mrb[20].mxu1 %v8551_v4  ;;  %v10318_v4 = vld [vmem:[#allocation117_spill] sm:$0xff] }
 0x4bb   :  { %5604 = vmatpush1.bf16.msra.mxu0 %v10309_v3  ;;  %5636 = vmatpush1.bf16.msra.mxu1 %v10310_v22  ;;  %v10319_v3 = vld [vmem:[#allocation118_spill] sm:$0xff]  ;;  %v10320_v22 = vld [vmem:[#allocation119_spill] sm:$0xff] }
 0x4bc   :  { %5606 = vmatprep.subr.bf16.mxu0 %v10311_v39  ;;  %5638 = vmatprep.subr.bf16.mxu1 %v10312_v13  ;;  %v10321_v39 = vld [vmem:[#allocation120_spill] sm:$0xff]  ;;  %v10322_v13 = vld [vmem:[#allocation121_spill] sm:$0xff] }
 0x4bd   :  { %2070 = vmatprep.mubr.f32.mxu0 %v10313_v5  ;;  %2141 = vmatprep.mubr.f32.mxu1 %v10313_v5  ;;  %v10324_v5 = vld [vmem:[#allocation123_spill] sm:$0xff] }
 0x4bf   :  { %5608 = vmatpush1.bf16.msra.mxu0 %v10314_v60  ;;  %5640 = vmatpush1.bf16.msra.mxu1 %v10315_v35  ;;  %v10325_v60 = vld [vmem:[#allocation124_spill] sm:$0xff]  ;;  %v10326_v35 = vld [vmem:[#allocation125_spill] sm:$0xff] }
 0x4c0   :  { %5610 = vmatprep.subr.bf16.mxu0 %v10316_v33  ;;  %5642 = vmatprep.subr.bf16.mxu1 %v10317_v48  ;;  %v10327_v33 = vld [vmem:[#allocation126_spill] sm:$0xff]  ;;  %v10328_v48 = vld [vmem:[#allocation127_spill] sm:$0xff] }
 0x4c3   :  { %5612 = vmatpush1.bf16.msra.mxu0 %v10318_v4  ;;  %5644 = vmatpush1.bf16.msra.mxu1 %v10319_v3  ;;  %v10329_v4 = vld [vmem:[#allocation128_spill] sm:$0xff]  ;;  %v10330_v3 = vld [vmem:[#allocation129_spill] sm:$0xff] }
 0x4c4   :  { %5614 = vmatprep.subr.bf16.mxu0 %v10320_v22  ;;  %5646 = vmatprep.subr.bf16.mxu1 %v10321_v39  ;;  %v10331_v22 = vld [vmem:[#allocation130_spill] sm:$0xff]  ;;  %v10332_v39 = vld [vmem:[#allocation131_spill] sm:$0xff] }
 0x4c7   :  { %5616 = vmatpush1.bf16.msra.mxu0 %v10322_v13  ;;  %5648 = vmatpush1.bf16.msra.mxu1 %v10323_v1  ;;  %v10333_v13 = vld [vmem:[#allocation132_spill] sm:$0xff]  ;;  %v10334_v1 = vld [vmem:[#allocation133_spill] sm:$0xff] }
 0x4c8   :  { %5618 = vmatprep.subr.bf16.mxu0 %v10324_v5  ;;  %5650 = vmatprep.subr.bf16.mxu1 %v10325_v60  ;;  %v10335_v5 = vld [vmem:[#allocation134_spill] sm:$0xff]  ;;  %v10336_v60 = vld [vmem:[#allocation135_spill] sm:$0xff] }
 0x4cb   :  { %5620 = vmatpush1.bf16.msra.mxu0 %v10326_v35  ;;  %5652 = vmatpush1.bf16.msra.mxu1 %v10327_v33  ;;  %v10337_v35 = vld [vmem:[#allocation136_spill] sm:$0xff]  ;;  %v10338_v33 = vld [vmem:[#allocation137_spill] sm:$0xff] }
 0x4cc   :  { %5622 = vmatprep.subr.bf16.mxu0 %v10328_v48  ;;  %5654 = vmatprep.subr.bf16.mxu1 %v10329_v4  ;;  %v10339_v48 = vld [vmem:[#allocation138_spill] sm:$0xff] }
 0x4cd   :  { %v10340_v4 = vld [vmem:[#allocation10_spill] sm:$0xff] }
 0x4cf   :  { %5624 = vmatpush1.bf16.msra.mxu0 %v10330_v3  ;;  %5656 = vmatpush1.bf16.msra.mxu1 %v10331_v22  ;;  %v10341_v3 = vld [vmem:[#allocation11_spill] sm:$0xff] }
 0x4d0   :  { %5626 = vmatprep.subr.bf16.mxu0 %v10332_v39  ;;  %5658 = vmatprep.subr.bf16.mxu1 %v10333_v13 }
 0x4d3   :  { %5628 = vmatpush1.bf16.msra.mxu0 %v10334_v1  ;;  %5660 = vmatpush1.bf16.msra.mxu1 %v10335_v5 }
 0x4d4   :  { %5630 = vmatprep.subr.bf16.mxu0 %v10336_v60  ;;  %5662 = vmatprep.subr.bf16.mxu1 %v10337_v35 }
 0x4d7   :  { %5632 = vmatpush1.bf16.msra.mxu0 %v10338_v33  ;;  %5664 = vmatpush1.bf16.msra.mxu1 %v10339_v48 }
 0x4d8   :  { %5666 = vmatprep.subr.bf16.mxu0 %v10340_v4  ;;  %5730 = vmatprep.subr.bf16.mxu1 %v10341_v3 }
 0x54d   :  { %v1756_v22 = vpop.f32.mrb[4].mxu0  ;;  %v1827_v39 = vpop.f32.mrb[4].mxu1 }
 0x54e   :  { %v7269_v13 = vadd.f32 %v1756_v22, %v10342_v50  ;;  %v1758_v55 = vpop.f32.mrb[5].mxu0  ;;  %v1829_v1 = vpop.f32.mrb[5].mxu1  ;;  %v7285_v48 = vadd.f32 %v1827_v39, %v8341_v56 }
 0x54f   :  { %v7270_v5 = vadd.f32 %v1758_v55, %v10218_v40  ;;  %v7286_v33 = vadd.f32 %v1829_v1, %v10219_v37 }
 0x550   :  { %v4666_v15 = vmul.f32 -1.442695, %v7269_v13 }
 0x551   :  { %v4667_v60 = vmul.f32 -1.442695, %v7270_v5  ;;  %v4668_v35 = vmul.f32 -1.442695, %v7286_v33 }
 0x552   :  { %7432 = vpow2.f32 %v4666_v15 }
 0x553   :  { %7434 = vpow2.f32 %v4667_v60 }
 0x554   :  { %7436 = vpow2.f32 %v4668_v35 }
 0x555   :  { %7438 = vtanh.f32 %v7285_v48  ;;  %v10348_v48 = vld [vmem:[#allocation21_spill] sm:$0xff] }
 0x55c   :  { %v7433_v4 = vpop.eup %7432 }
 0x55d   :  { %v7435_v31 = vpop.eup %7434  ;;  %v1985_v3 = vadd.f32 1.0, %v7433_v4  ;;  %v10349_v4 = vld [vmem:[#allocation22_spill] sm:$0xff] }
 0x55e   :  { %v1991_v49 = vadd.f32 1.0, %v7435_v31  ;;  %v7437_v22 = vpop.eup %7436  ;;  %v10345_v31 = vld [vmem:[#allocation18_spill] sm:$0xff] }
 0x55f   :  { %7440 = vrcp.f32 %v1985_v3  ;;  %v7439_v50 = vpop.eup %7438  ;;  %v1998_v15 = vadd.f32 1.0, %v7437_v22  ;;  %v10347_v3 = vld [vmem:[#allocation20_spill] sm:$0xff]  ;;  %v10350_v22 = vld [vmem:[#allocation23_spill] sm:$0xff] }
 0x560   :  { %7442 = vrcp.f32 %v1991_v49  ;;  %v10344_v49 = vld [vmem:[#allocation17_spill] sm:$0xff] }
 0x561   :  { %7444 = vrcp.f32 %v1998_v15  ;;  %v10354_v15 = vld [vmem:[#allocation27_spill] sm:$0xff] }
 0x569   :  { %v7441_v55 = vpop.eup %7440 }
 0x56a   :  { %v7443_v13 = vpop.eup %7442  ;;  %v2002_v5 = vmul.f32 %v7441_v55, %v7439_v50  ;;  %v10346_v50 = vld [vmem:[#allocation19_spill] sm:$0xff]  ;;  %v10351_v55 = vld [vmem:[#allocation24_spill] sm:$0xff] }
 0x56b   :  { %v2001_v60 = vmul.f32 %v7443_v13, %v8548_v8  ;;  %v7445_v39 = vpop.eup %7444  ;;  %v10343_v8 = vld [vmem:[#allocation16_spill] sm:$0xff]  ;;  %v10352_v13 = vld [vmem:[#allocation25_spill] sm:$0xff] }
 0x56d   :  { %v8734_v1 = vadd.f32 %v2002_v5, %v2001_v60  ;;  %v10353_v5 = vld [vmem:[#allocation26_spill] sm:$0xff]  ;;  %v10355_v60 = vld [vmem:[#allocation28_spill] sm:$0xff] }
 0x56f   :  { %7446 = vtanh.f32 %v8734_v1 }
 0x579   :  { %v7447_v33 = vpop.eup %7446 }
 0x57a   :  { %v8737_v35 = vmul.f32 %v7447_v33, %v7445_v39  ;;  %v10356_v39 = vld [vmem:[#allocation29_spill] sm:$0xff]  ;;  %v10357_v33 = vld [vmem:[#allocation30_spill] sm:$0xff] }
 0x57c   :  { %2071 = vmatmul.mubr.f32.vlgmr.msra.gmra.mrb[20].mxu0 %v8737_v35  ;;  %2142 = vmatmul.mubr.f32.vlgmr.msra.gmra.mrb[20].mxu1 %v8737_v35 }
 0x57d   :  { %5668 = vmatpush1.bf16.msra.mxu0 %v7779_v16  ;;  %5732 = vmatpush1.bf16.msra.mxu1 %v7783_v20 }
 0x57e   :  { %5670 = vmatprep.subr.bf16.mxu0 %v7785_v21  ;;  %5734 = vmatprep.subr.bf16.mxu1 %v7789_v25 }
 0x581   :  { %5672 = vmatpush1.bf16.msra.mxu0 %v7793_v29  ;;  %5736 = vmatpush1.bf16.msra.mxu1 %v7795_v30 }
 0x582   :  { %5674 = vmatprep.subr.bf16.mxu0 %v7798_v34  ;;  %5738 = vmatprep.subr.bf16.mxu1 %v7800_v38 }
 0x585   :  { %5676 = vmatpush1.bf16.msra.mxu0 %v7803_v42  ;;  %5740 = vmatpush1.bf16.msra.mxu1 %v7807_v46 }
 0x586   :  { %5678 = vmatprep.subr.bf16.mxu0 %v7809_v47  ;;  %5742 = vmatprep.subr.bf16.mxu1 %v7812_v51 }
 0x589   :  { %5680 = vmatpush1.bf16.msra.mxu0 %v7815_v57  ;;  %5744 = vmatpush1.bf16.msra.mxu1 %v7819_v58 }
 0x58a   :  { %5682 = vmatprep.subr.bf16.mxu0 %v7821_v59  ;;  %5746 = vmatprep.subr.bf16.mxu1 %v7824_v63 }
 0x58d   :  { %5684 = vmatpush1.bf16.msra.mxu0 %v7827_v6  ;;  %5748 = vmatpush1.bf16.msra.mxu1 %v7831_v7 }
 0x58e   :  { %5686 = vmatprep.subr.bf16.mxu0 %v7833_v9  ;;  %5750 = vmatprep.subr.bf16.mxu1 %v7836_v14 }
 0x591   :  { %5688 = vmatpush1.bf16.msra.mxu0 %v7839_v23  ;;  %5752 = vmatpush1.bf16.msra.mxu1 %v7843_v24 }
 0x592   :  { %5690 = vmatprep.subr.bf16.mxu0 %v7845_v26  ;;  %5754 = vmatprep.subr.bf16.mxu1 %v7848_v32 }
 0x595   :  { %5692 = vmatpush1.bf16.msra.mxu0 %v7854_v41  ;;  %5756 = vmatpush1.bf16.msra.mxu1 %v7859_v44 }
 0x596   :  { %5694 = vmatprep.subr.bf16.mxu0 %v7861_v45  ;;  %5758 = vmatprep.subr.bf16.mxu1 %v7864_v52 }
 0x599   :  { %5696 = vmatpush1.bf16.msra.mxu0 %v7873_v61  ;;  %5760 = vmatpush1.bf16.msra.mxu1 %v7878_v0 }
 0x59a   :  { %5698 = vmatprep.subr.bf16.mxu0 %v7880_v2  ;;  %5762 = vmatprep.subr.bf16.mxu1 %v7886_v10 }
 0x59d   :  { %5700 = vmatpush1.bf16.msra.mxu0 %v7892_v19  ;;  %5764 = vmatpush1.bf16.msra.mxu1 %v7897_v27 }
 0x59e   :  { %5702 = vmatprep.subr.bf16.mxu0 %v7899_v28  ;;  %5766 = vmatprep.subr.bf16.mxu1 %v10343_v8 }
 0x5a1   :  { %5704 = vmatpush1.bf16.msra.mxu0 %v10344_v49  ;;  %5768 = vmatpush1.bf16.msra.mxu1 %v10345_v31 }
 0x5a2   :  { %5706 = vmatprep.subr.bf16.mxu0 %v10346_v50  ;;  %5770 = vmatprep.subr.bf16.mxu1 %v10347_v3  ;;  %v10358_v3 = vld [vmem:[#allocation31_spill] sm:$0xff]  ;;  %v10372_v50 = vld [vmem:[#allocation142_spill] sm:$0xff] }
 0x5a5   :  { %5708 = vmatpush1.bf16.msra.mxu0 %v10348_v48  ;;  %5772 = vmatpush1.bf16.msra.mxu1 %v10349_v4  ;;  %v10359_v48 = vld [vmem:[#allocation32_spill] sm:$0xff]  ;;  %v10360_v4 = vld [vmem:[#allocation33_spill] sm:$0xff] }
 0x5a6   :  { %5710 = vmatprep.subr.bf16.mxu0 %v10350_v22  ;;  %5774 = vmatprep.subr.bf16.mxu1 %v10351_v55  ;;  %v10361_v22 = vld [vmem:[#allocation34_spill] sm:$0xff]  ;;  %v10362_v55 = vld [vmem:[#allocation35_spill] sm:$0xff] }
 0x5a9   :  { %5712 = vmatpush1.bf16.msra.mxu0 %v10352_v13  ;;  %5776 = vmatpush1.bf16.msra.mxu1 %v10353_v5  ;;  %v10363_v13 = vld [vmem:[#allocation36_spill] sm:$0xff]  ;;  %v10364_v5 = vld [vmem:[#allocation37_spill] sm:$0xff] }
 0x5aa   :  { %5714 = vmatprep.subr.bf16.mxu0 %v10354_v15  ;;  %5778 = vmatprep.subr.bf16.mxu1 %v10355_v60  ;;  %v10365_v15 = vld [vmem:[#allocation38_spill] sm:$0xff]  ;;  %v10366_v60 = vld [vmem:[#allocation39_spill] sm:$0xff] }
 0x5ad   :  { %5716 = vmatpush1.bf16.msra.mxu0 %v10356_v39  ;;  %5780 = vmatpush1.bf16.msra.mxu1 %v10357_v33  ;;  %v10367_v39 = vld [vmem:[#allocation40_spill] sm:$0xff]  ;;  %v10368_v33 = vld [vmem:[#allocation41_spill] sm:$0xff] }
 0x5ae   :  { %5718 = vmatprep.subr.bf16.mxu0 %v10358_v3  ;;  %5782 = vmatprep.subr.bf16.mxu1 %v10359_v48  ;;  %v10369_v3 = vld [vmem:[#allocation42_spill] sm:$0xff]  ;;  %v10370_v48 = vld [vmem:[#allocation43_spill] sm:$0xff] }
 0x5b1   :  { %5720 = vmatpush1.bf16.msra.mxu0 %v10360_v4  ;;  %5784 = vmatpush1.bf16.msra.mxu1 %v10361_v22  ;;  %v10371_v4 = vld [vmem:[#allocation44_spill] sm:$0xff] }
 0x5b2   :  { %5722 = vmatprep.subr.bf16.mxu0 %v10362_v55  ;;  %5786 = vmatprep.subr.bf16.mxu1 %v10363_v13 }
 0x5b5   :  { %5724 = vmatpush1.bf16.msra.mxu0 %v10364_v5  ;;  %5788 = vmatpush1.bf16.msra.mxu1 %v10365_v15 }
 0x5b6   :  { %5726 = vmatprep.subr.bf16.mxu0 %v10366_v60  ;;  %5790 = vmatprep.subr.bf16.mxu1 %v10367_v39 }
 0x5b9   :  { %5728 = vmatpush1.bf16.msra.mxu0 %v10368_v33  ;;  %5792 = vmatpush1.bf16.msra.mxu1 %v10369_v3 }
 0x5ba   :  { %5794 = vmatprep.subr.bf16.mxu0 %v10370_v48  ;;  %5858 = vmatprep.subr.bf16.mxu1 %v10371_v4 }
 0x64f   :  { %v2072_v22 = vpop.f32.mrb[20].mxu0  ;;  %v2143_v55 = vpop.f32.mrb[20].mxu1 }
 0x650   :  { %v2148_v13 = vadd.f32 %v2072_v22, %v10372_v50  ;;  %v2074_v31 = vpop.f32.mrb[21].mxu0  ;;  %v2145_v5 = vpop.f32.mrb[21].mxu1  ;;  %v2150_v3 = vadd.f32 %v2143_v55, %v8435_v62 }
 0x651   :  { %v2149_v15 = vadd.f32 %v2074_v31, %v8424_v43  ;;  %v2151_v33 = vadd.f32 %v2145_v5, %v10248_v17 }
 0x652   :  { %v4669_v49 = vmul.f32 -1.442695, %v2148_v13 }
 0x653   :  { %v4670_v60 = vmul.f32 -1.442695, %v2149_v15  ;;  %v4671_v39 = vmul.f32 -1.442695, %v2151_v33  ;;  %v10379_v33 = vld [vmem:[#allocation56_spill] sm:$0xff] }
 0x654   :  { %7448 = vpow2.f32 %v4669_v49 }
 0x655   :  { %7450 = vpow2.f32 %v4670_v60 }
 0x656   :  { %7452 = vpow2.f32 %v4671_v39 }
 0x657   :  { %7454 = vtanh.f32 %v2150_v3  ;;  %v10377_v3 = vld [vmem:[#allocation54_spill] sm:$0xff] }
 0x65e   :  { %v7449_v48 = vpop.eup %7448 }
 0x65f   :  { %v7451_v8 = vpop.eup %7450  ;;  %v2155_v4 = vadd.f32 1.0, %v7449_v48 }
 0x660   :  { %v2161_v28 = vadd.f32 1.0, %v7451_v8  ;;  %v7453_v22 = vpop.eup %7452  ;;  %v10375_v8 = vld [vmem:[#allocation52_spill] sm:$0xff] }
 0x661   :  { %7456 = vrcp.f32 %v2155_v4  ;;  %v7455_v50 = vpop.eup %7454  ;;  %v2168_v49 = vadd.f32 1.0, %v7453_v22  ;;  %v10378_v4 = vld [vmem:[#allocation55_spill] sm:$0xff]  ;;  %v10380_v22 = vld [vmem:[#allocation57_spill] sm:$0xff] }
 0x662   :  { %7458 = vrcp.f32 %v2161_v28  ;;  %v10373_v28 = vld [vmem:[#allocation50_spill] sm:$0xff] }
 0x663   :  { %7460 = vrcp.f32 %v2168_v49  ;;  %v10384_v49 = vld [vmem:[#allocation61_spill] sm:$0xff] }
 0x66b   :  { %v7457_v31 = vpop.eup %7456 }
 0x66c   :  { %v7459_v13 = vpop.eup %7458  ;;  %v2172_v15 = vmul.f32 %v7457_v31, %v7455_v50  ;;  %v10376_v50 = vld [vmem:[#allocation53_spill] sm:$0xff]  ;;  %v10381_v31 = vld [vmem:[#allocation58_spill] sm:$0xff] }
 0x66d   :  { %v2171_v60 = vmul.f32 %v7459_v13, %v8624_v11  ;;  %v7461_v55 = vpop.eup %7460  ;;  %v10374_v11 = vld [vmem:[#allocation51_spill] sm:$0xff] }
 0x66e   :  { %v10382_v13 = vld [vmem:[#allocation59_spill] sm:$0xff] }
 0x66f   :  { %v8810_v5 = vadd.f32 %v2172_v15, %v2171_v60  ;;  %v10383_v15 = vld [vmem:[#allocation60_spill] sm:$0xff]  ;;  %v10385_v60 = vld [vmem:[#allocation62_spill] sm:$0xff] }
 0x671   :  { %7462 = vtanh.f32 %v8810_v5 }
 0x67b   :  { %v7463_v48 = vpop.eup %7462 }
 0x67c   :  { %v2175_v39 = vmul.f32 %v7463_v48, %v7461_v55  ;;  %v10386_v55 = vld [vmem:[#allocation63_spill] sm:$0xff]  ;;  %v10387_v48 = vld [vmem:[#allocation64_spill] sm:$0xff] }
 0x67e   :  { %2240 = vmatprep.mubr.f32.mxu0 %v2175_v39  ;;  %2311 = vmatprep.mubr.f32.mxu1 %v2175_v39 }
 0x67f   :  { %2241 = vmatmul.mubr.f32.vlgmr.msra.gmra.mrb[6].mxu0 %v8737_v35  ;;  %2312 = vmatmul.mubr.f32.vlgmr.msra.gmra.mrb[6].mxu1 %v8737_v35 }
 0x680   :  { %5796 = vmatpush1.bf16.msra.mxu0 %v10125_v53  ;;  %5860 = vmatpush1.bf16.msra.mxu1 %v10126_v54 }
 0x681   :  { %2382 = vmatprep.mubr.f32.mxu0 %v2175_v39  ;;  %2453 = vmatprep.mubr.f32.mxu1 %v2175_v39  ;;  %v10388_v39 = vld [vmem:[#allocation65_spill] sm:$0xff] }
 0x682   :  { %5798 = vmatprep.subr.bf16.mxu0 %v10127_v12  ;;  %5862 = vmatprep.subr.bf16.mxu1 %v10128_v18 }
 0x684   :  { %5800 = vmatpush1.bf16.msra.mxu0 %v10249_v36  ;;  %5864 = vmatpush1.bf16.msra.mxu1 %v10373_v28 }
 0x685   :  { %5802 = vmatprep.subr.bf16.mxu0 %v10374_v11  ;;  %5866 = vmatprep.subr.bf16.mxu1 %v10375_v8 }
 0x688   :  { %5804 = vmatpush1.bf16.msra.mxu0 %v10376_v50  ;;  %5868 = vmatpush1.bf16.msra.mxu1 %v10377_v3 }
 0x689   :  { %5806 = vmatprep.subr.bf16.mxu0 %v10378_v4  ;;  %5870 = vmatprep.subr.bf16.mxu1 %v10379_v33  ;;  %v10389_v4 = vld [vmem:[#allocation66_spill] sm:$0xff]  ;;  %v10390_v33 = vld [vmem:[#allocation67_spill] sm:$0xff] }
 0x68c   :  { %5808 = vmatpush1.bf16.msra.mxu0 %v10380_v22  ;;  %5872 = vmatpush1.bf16.msra.mxu1 %v10381_v31  ;;  %v10391_v22 = vld [vmem:[#allocation68_spill] sm:$0xff]  ;;  %v10392_v31 = vld [vmem:[#allocation69_spill] sm:$0xff] }
 0x68d   :  { %5810 = vmatprep.subr.bf16.mxu0 %v10382_v13  ;;  %5874 = vmatprep.subr.bf16.mxu1 %v10383_v15  ;;  %v10393_v13 = vld [vmem:[#allocation70_spill] sm:$0xff]  ;;  %v10394_v15 = vld [vmem:[#allocation71_spill] sm:$0xff] }
 0x690   :  { %5812 = vmatpush1.bf16.msra.mxu0 %v10384_v49  ;;  %5876 = vmatpush1.bf16.msra.mxu1 %v10385_v60  ;;  %v10395_v49 = vld [vmem:[#allocation72_spill] sm:$0xff]  ;;  %v10396_v60 = vld [vmem:[#allocation73_spill] sm:$0xff] }
 0x691   :  { %5814 = vmatprep.subr.bf16.mxu0 %v10386_v55  ;;  %5878 = vmatprep.subr.bf16.mxu1 %v10387_v48  ;;  %v10397_v55 = vld [vmem:[#allocation74_spill] sm:$0xff]  ;;  %v10398_v48 = vld [vmem:[#allocation75_spill] sm:$0xff] }
 0x694   :  { %5816 = vmatpush1.bf16.msra.mxu0 %v10388_v39  ;;  %5880 = vmatpush1.bf16.msra.mxu1 %v10389_v4  ;;  %v10399_v39 = vld [vmem:[#allocation76_spill] sm:$0xff]  ;;  %v10400_v4 = vld [vmem:[#allocation77_spill] sm:$0xff] }
 0x695   :  { %5818 = vmatprep.subr.bf16.mxu0 %v10390_v33  ;;  %5882 = vmatprep.subr.bf16.mxu1 %v10391_v22  ;;  %v10401_v33 = vld [vmem:[#allocation78_spill] sm:$0xff]  ;;  %v10402_v22 = vld [vmem:[#allocation79_spill] sm:$0xff] }
 0x698   :  { %5820 = vmatpush1.bf16.msra.mxu0 %v10392_v31  ;;  %5884 = vmatpush1.bf16.msra.mxu1 %v10393_v13  ;;  %v10403_v31 = vld [vmem:[#allocation80_spill] sm:$0xff]  ;;  %v10404_v13 = vld [vmem:[#allocation81_spill] sm:$0xff] }
 0x699   :  { %5822 = vmatprep.subr.bf16.mxu0 %v10394_v15  ;;  %5886 = vmatprep.subr.bf16.mxu1 %v10395_v49  ;;  %v10405_v15 = vld [vmem:[#allocation82_spill] sm:$0xff]  ;;  %v10406_v49 = vld [vmem:[#allocation83_spill] sm:$0xff] }
 0x69c   :  { %5824 = vmatpush1.bf16.msra.mxu0 %v10396_v60  ;;  %5888 = vmatpush1.bf16.msra.mxu1 %v10397_v55  ;;  %v10407_v60 = vld [vmem:[#allocation84_spill] sm:$0xff]  ;;  %v10408_v55 = vld [vmem:[#allocation85_spill] sm:$0xff] }
 0x69d   :  { %5826 = vmatprep.subr.bf16.mxu0 %v10398_v48  ;;  %5890 = vmatprep.subr.bf16.mxu1 %v10399_v39  ;;  %v10409_v48 = vld [vmem:[#allocation86_spill] sm:$0xff]  ;;  %v10410_v39 = vld [vmem:[#allocation87_spill] sm:$0xff] }
 0x6a0   :  { %5828 = vmatpush1.bf16.msra.mxu0 %v10400_v4  ;;  %5892 = vmatpush1.bf16.msra.mxu1 %v10401_v33  ;;  %v10411_v4 = vld [vmem:[#allocation88_spill] sm:$0xff]  ;;  %v10412_v33 = vld [vmem:[#allocation89_spill] sm:$0xff] }
 0x6a1   :  { %5830 = vmatprep.subr.bf16.mxu0 %v10402_v22  ;;  %5894 = vmatprep.subr.bf16.mxu1 %v10403_v31  ;;  %v10413_v22 = vld [vmem:[#allocation90_spill] sm:$0xff]  ;;  %v10414_v31 = vld [vmem:[#allocation91_spill] sm:$0xff] }
 0x6a4   :  { %5832 = vmatpush1.bf16.msra.mxu0 %v10404_v13  ;;  %5896 = vmatpush1.bf16.msra.mxu1 %v10405_v15  ;;  %v10415_v13 = vld [vmem:[#allocation92_spill] sm:$0xff]  ;;  %v10416_v15 = vld [vmem:[#allocation93_spill] sm:$0xff] }
 0x6a5   :  { %5834 = vmatprep.subr.bf16.mxu0 %v10406_v49  ;;  %5898 = vmatprep.subr.bf16.mxu1 %v10407_v60  ;;  %v10417_v49 = vld [vmem:[#allocation94_spill] sm:$0xff]  ;;  %v10418_v60 = vld [vmem:[#allocation95_spill] sm:$0xff] }
 0x6a8   :  { %5836 = vmatpush1.bf16.msra.mxu0 %v10408_v55  ;;  %5900 = vmatpush1.bf16.msra.mxu1 %v10409_v48  ;;  %v10419_v55 = vld [vmem:[#allocation96_spill] sm:$0xff]  ;;  %v10420_v48 = vld [vmem:[#allocation97_spill] sm:$0xff] }
 0x6a9   :  { %5838 = vmatprep.subr.bf16.mxu0 %v10410_v39  ;;  %5902 = vmatprep.subr.bf16.mxu1 %v10411_v4  ;;  %v10421_v39 = vld [vmem:[#allocation98_spill] sm:$0xff]  ;;  %v10422_v4 = vld [vmem:[#allocation99_spill] sm:$0xff] }
 0x6ac   :  { %5840 = vmatpush1.bf16.msra.mxu0 %v10412_v33  ;;  %5904 = vmatpush1.bf16.msra.mxu1 %v10413_v22  ;;  %v10423_v33 = vld [vmem:[#allocation100_spill] sm:$0xff]  ;;  %v10424_v22 = vld [vmem:[#allocation101_spill] sm:$0xff] }
 0x6ad   :  { %5842 = vmatprep.subr.bf16.mxu0 %v10414_v31  ;;  %5906 = vmatprep.subr.bf16.mxu1 %v10415_v13  ;;  %v10425_v31 = vld [vmem:[#allocation102_spill] sm:$0xff]  ;;  %v10426_v13 = vld [vmem:[#allocation103_spill] sm:$0xff] }
 0x6b0   :  { %5844 = vmatpush1.bf16.msra.mxu0 %v10416_v15  ;;  %5908 = vmatpush1.bf16.msra.mxu1 %v10417_v49  ;;  %v10427_v15 = vld [vmem:[#allocation104_spill] sm:$0xff]  ;;  %v10428_v49 = vld [vmem:[#allocation105_spill] sm:$0xff] }
 0x6b1   :  { %5846 = vmatprep.subr.bf16.mxu0 %v10418_v60  ;;  %5910 = vmatprep.subr.bf16.mxu1 %v10419_v55  ;;  %v10429_v60 = vld [vmem:[#allocation106_spill] sm:$0xff]  ;;  %v10430_v55 = vld [vmem:[#allocation107_spill] sm:$0xff] }
 0x6b4   :  { %5848 = vmatpush1.bf16.msra.mxu0 %v10420_v48  ;;  %5912 = vmatpush1.bf16.msra.mxu1 %v10421_v39  ;;  %v10431_v48 = vld [vmem:[#allocation108_spill] sm:$0xff]  ;;  %v10465_v39 = vld [vmem:[#allocation139_spill] sm:$0xff] }
 0x6b5   :  { %5850 = vmatprep.subr.bf16.mxu0 %v10422_v4  ;;  %5914 = vmatprep.subr.bf16.mxu1 %v10423_v33  ;;  %v10432_v33 = vld [vmem:[#allocation109_spill] sm:$0xff]  ;;  %v10446_v4 = vld [vmem:[#allocation122_spill] sm:$0xff] }
 0x6b8   :  { %5852 = vmatpush1.bf16.msra.mxu0 %v10424_v22  ;;  %5916 = vmatpush1.bf16.msra.mxu1 %v10425_v31  ;;  %v10433_v22 = vld [vmem:[#allocation110_spill] sm:$0xff]  ;;  %v10434_v31 = vld [vmem:[#allocation111_spill] sm:$0xff] }
 0x6b9   :  { %5854 = vmatprep.subr.bf16.mxu0 %v10426_v13  ;;  %5918 = vmatprep.subr.bf16.mxu1 %v10427_v15  ;;  %v10435_v13 = vld [vmem:[#allocation112_spill] sm:$0xff]  ;;  %v10436_v15 = vmov 0.0  }
 0x6bc   :  { %5856 = vmatpush1.bf16.msra.mxu0 %v10428_v49  ;;  %5920 = vmatpush1.bf16.msra.mxu1 %v10429_v60  ;;  %v10437_v60 = vld [vmem:[#allocation113_spill] sm:$0xff]  ;;  %v10440_v49 = vld [vmem:[#allocation116_spill] sm:$0xff] }
 0x6bd   :  { %5922 = vmatprep.subr.bf16.mxu0 %v10430_v55  ;;  %5954 = vmatprep.subr.bf16.mxu1 %v10431_v48  ;;  %v10438_v55 = vld [vmem:[#allocation114_spill] sm:$0xff]  ;;  %v10439_v48 = vld [vmem:[#allocation115_spill] sm:$0xff] }
 0x6bf   :  { %2383 = vmatmul.mubr.f32.vlgmr.msra.gmra.mrb[22].mxu0 %v8737_v35  ;;  %2454 = vmatmul.mubr.f32.vlgmr.msra.gmra.mrb[22].mxu1 %v8737_v35  ;;  %v10441_v35 = vld [vmem:[#allocation117_spill] sm:$0xff] }
 0x6c0   :  { %5924 = vmatpush1.bf16.msra.mxu0 %v10432_v33  ;;  %5956 = vmatpush1.bf16.msra.mxu1 %v10433_v22  ;;  %v10442_v33 = vld [vmem:[#allocation118_spill] sm:$0xff]  ;;  %v10443_v22 = vld [vmem:[#allocation119_spill] sm:$0xff] }
 0x6c1   :  { %5926 = vmatprep.subr.bf16.mxu0 %v10434_v31  ;;  %5958 = vmatprep.subr.bf16.mxu1 %v10435_v13  ;;  %v10444_v31 = vld [vmem:[#allocation120_spill] sm:$0xff]  ;;  %v10445_v13 = vld [vmem:[#allocation121_spill] sm:$0xff] }
 0x6c2   :  { %2556 = vmatprep.mubr.f32.mxu0 %v10436_v15  ;;  %2627 = vmatprep.mubr.f32.mxu1 %v10436_v15  ;;  %v10447_v15 = vld [vmem:[#allocation123_spill] sm:$0xff] }
 0x6c4   :  { %5928 = vmatpush1.bf16.msra.mxu0 %v10437_v60  ;;  %5960 = vmatpush1.bf16.msra.mxu1 %v10438_v55  ;;  %v10448_v60 = vld [vmem:[#allocation124_spill] sm:$0xff]  ;;  %v10449_v55 = vld [vmem:[#allocation125_spill] sm:$0xff] }
 0x6c5   :  { %5930 = vmatprep.subr.bf16.mxu0 %v10439_v48  ;;  %5962 = vmatprep.subr.bf16.mxu1 %v10440_v49  ;;  %v10450_v48 = vld [vmem:[#allocation126_spill] sm:$0xff]  ;;  %v10451_v49 = vld [vmem:[#allocation127_spill] sm:$0xff] }
 0x6c8   :  { %5932 = vmatpush1.bf16.msra.mxu0 %v10441_v35  ;;  %5964 = vmatpush1.bf16.msra.mxu1 %v10442_v33  ;;  %v10452_v35 = vld [vmem:[#allocation128_spill] sm:$0xff]  ;;  %v10453_v33 = vld [vmem:[#allocation129_spill] sm:$0xff] }
 0x6c9   :  { %5934 = vmatprep.subr.bf16.mxu0 %v10443_v22  ;;  %5966 = vmatprep.subr.bf16.mxu1 %v10444_v31  ;;  %v10454_v22 = vld [vmem:[#allocation130_spill] sm:$0xff]  ;;  %v10455_v31 = vld [vmem:[#allocation131_spill] sm:$0xff] }
 0x6cc   :  { %5936 = vmatpush1.bf16.msra.mxu0 %v10445_v13  ;;  %5968 = vmatpush1.bf16.msra.mxu1 %v10446_v4  ;;  %v10456_v13 = vld [vmem:[#allocation132_spill] sm:$0xff]  ;;  %v10457_v4 = vld [vmem:[#allocation133_spill] sm:$0xff] }
 0x6cd   :  { %5938 = vmatprep.subr.bf16.mxu0 %v10447_v15  ;;  %5970 = vmatprep.subr.bf16.mxu1 %v10448_v60  ;;  %v10458_v15 = vld [vmem:[#allocation134_spill] sm:$0xff]  ;;  %v10459_v60 = vld [vmem:[#allocation135_spill] sm:$0xff] }
 0x6d0   :  { %5940 = vmatpush1.bf16.msra.mxu0 %v10449_v55  ;;  %5972 = vmatpush1.bf16.msra.mxu1 %v10450_v48  ;;  %v10460_v55 = vld [vmem:[#allocation136_spill] sm:$0xff]  ;;  %v10461_v48 = vld [vmem:[#allocation137_spill] sm:$0xff] }
 0x6d1   :  { %5942 = vmatprep.subr.bf16.mxu0 %v10451_v49  ;;  %5974 = vmatprep.subr.bf16.mxu1 %v10452_v35  ;;  %v10462_v49 = vld [vmem:[#allocation138_spill] sm:$0xff] }
 0x6d2   :  { %v10463_v35 = vld [vmem:[#allocation10_spill] sm:$0xff] }
 0x6d4   :  { %5944 = vmatpush1.bf16.msra.mxu0 %v10453_v33  ;;  %5976 = vmatpush1.bf16.msra.mxu1 %v10454_v22  ;;  %v10464_v33 = vld [vmem:[#allocation11_spill] sm:$0xff] }
 0x6d5   :  { %5946 = vmatprep.subr.bf16.mxu0 %v10455_v31  ;;  %5978 = vmatprep.subr.bf16.mxu1 %v10456_v13 }
 0x6d8   :  { %5948 = vmatpush1.bf16.msra.mxu0 %v10457_v4  ;;  %5980 = vmatpush1.bf16.msra.mxu1 %v10458_v15 }
 0x6d9   :  { %5950 = vmatprep.subr.bf16.mxu0 %v10459_v60  ;;  %5982 = vmatprep.subr.bf16.mxu1 %v10460_v55 }
 0x6dc   :  { %5952 = vmatpush1.bf16.msra.mxu0 %v10461_v48  ;;  %5984 = vmatpush1.bf16.msra.mxu1 %v10462_v49 }
 0x6dd   :  { %5986 = vmatprep.subr.bf16.mxu0 %v10463_v35  ;;  %6050 = vmatprep.subr.bf16.mxu1 %v10464_v33 }
 0x752   :  { %v2242_v22 = vpop.f32.mrb[6].mxu0  ;;  %v2313_v31 = vpop.f32.mrb[6].mxu1 }
 0x753   :  { %v7271_v13 = vadd.f32 %v2242_v22, %v10465_v39  ;;  %v2244_v3 = vpop.f32.mrb[7].mxu0  ;;  %v2315_v4 = vpop.f32.mrb[7].mxu1  ;;  %v7287_v49 = vadd.f32 %v2313_v31, %v8341_v56 }
 0x754   :  { %v7272_v15 = vadd.f32 %v2244_v3, %v10218_v40  ;;  %v7288_v48 = vadd.f32 %v2315_v4, %v10219_v37 }
 0x755   :  { %v4672_v50 = vmul.f32 -1.442695, %v7271_v13 }
 0x756   :  { %v4673_v60 = vmul.f32 -1.442695, %v7272_v15  ;;  %v4674_v55 = vmul.f32 -1.442695, %v7288_v48 }
 0x757   :  { %7464 = vpow2.f32 %v4672_v50 }
 0x758   :  { %7466 = vpow2.f32 %v4673_v60 }
 0x759   :  { %7468 = vpow2.f32 %v4674_v55 }
 0x75a   :  { %7470 = vtanh.f32 %v7287_v49  ;;  %v10470_v49 = vld [vmem:[#allocation19_spill] sm:$0xff] }
 0x761   :  { %v7465_v35 = vpop.eup %7464 }
 0x762   :  { %v7467_v8 = vpop.eup %7466  ;;  %v2471_v33 = vadd.f32 1.0, %v7465_v35  ;;  %v10472_v35 = vld [vmem:[#allocation21_spill] sm:$0xff] }
 0x763   :  { %v2477_v11 = vadd.f32 1.0, %v7467_v8  ;;  %v7469_v22 = vpop.eup %7468  ;;  %v10468_v8 = vld [vmem:[#allocation17_spill] sm:$0xff] }
 0x764   :  { %7472 = vrcp.f32 %v2471_v33  ;;  %v7471_v39 = vpop.eup %7470  ;;  %v2484_v50 = vadd.f32 1.0, %v7469_v22  ;;  %v10469_v33 = vld [vmem:[#allocation18_spill] sm:$0xff] }
 0x765   :  { %7474 = vrcp.f32 %v2477_v11  ;;  %v10467_v11 = vld [vmem:[#allocation16_spill] sm:$0xff]  ;;  %v10473_v22 = vld [vmem:[#allocation22_spill] sm:$0xff] }
 0x766   :  { %7476 = vrcp.f32 %v2484_v50  ;;  %v10477_v50 = vld [vmem:[#allocation26_spill] sm:$0xff] }
 0x76e   :  { %v7473_v3 = vpop.eup %7472 }
 0x76f   :  { %v7475_v13 = vpop.eup %7474  ;;  %v2488_v15 = vmul.f32 %v7473_v3, %v7471_v39  ;;  %v10471_v39 = vld [vmem:[#allocation20_spill] sm:$0xff]  ;;  %v10474_v3 = vld [vmem:[#allocation23_spill] sm:$0xff] }
 0x770   :  { %v2487_v60 = vmul.f32 %v7475_v13, %v8734_v1  ;;  %v7477_v31 = vpop.eup %7476  ;;  %v10466_v1 = vld [vmem:[#allocation15_spill] sm:$0xff]  ;;  %v10475_v13 = vld [vmem:[#allocation24_spill] sm:$0xff] }
 0x772   :  { %v8920_v4 = vadd.f32 %v2488_v15, %v2487_v60  ;;  %v10476_v15 = vld [vmem:[#allocation25_spill] sm:$0xff]  ;;  %v10478_v60 = vld [vmem:[#allocation27_spill] sm:$0xff] }
 0x774   :  { %7478 = vtanh.f32 %v8920_v4 }
 0x77e   :  { %v7479_v48 = vpop.eup %7478 }
 0x77f   :  { %v8923_v55 = vmul.f32 %v7479_v48, %v7477_v31  ;;  %v10479_v31 = vld [vmem:[#allocation28_spill] sm:$0xff]  ;;  %v10480_v48 = vld [vmem:[#allocation29_spill] sm:$0xff] }
 0x781   :  { %2557 = vmatmul.mubr.f32.vlgmr.msra.gmra.mrb[22].mxu0 %v8923_v55  ;;  %2628 = vmatmul.mubr.f32.vlgmr.msra.gmra.mrb[22].mxu1 %v8923_v55 }
 0x782   :  { %5988 = vmatpush1.bf16.msra.mxu0 %v7779_v16  ;;  %6052 = vmatpush1.bf16.msra.mxu1 %v7783_v20 }
 0x783   :  { %5990 = vmatprep.subr.bf16.mxu0 %v7785_v21  ;;  %6054 = vmatprep.subr.bf16.mxu1 %v7789_v25 }
 0x786   :  { %5992 = vmatpush1.bf16.msra.mxu0 %v7793_v29  ;;  %6056 = vmatpush1.bf16.msra.mxu1 %v7795_v30 }
 0x787   :  { %5994 = vmatprep.subr.bf16.mxu0 %v7798_v34  ;;  %6058 = vmatprep.subr.bf16.mxu1 %v7800_v38 }
 0x78a   :  { %5996 = vmatpush1.bf16.msra.mxu0 %v7803_v42  ;;  %6060 = vmatpush1.bf16.msra.mxu1 %v7807_v46 }
 0x78b   :  { %5998 = vmatprep.subr.bf16.mxu0 %v7809_v47  ;;  %6062 = vmatprep.subr.bf16.mxu1 %v7812_v51 }
 0x78e   :  { %6000 = vmatpush1.bf16.msra.mxu0 %v7815_v57  ;;  %6064 = vmatpush1.bf16.msra.mxu1 %v7819_v58 }
 0x78f   :  { %6002 = vmatprep.subr.bf16.mxu0 %v7821_v59  ;;  %6066 = vmatprep.subr.bf16.mxu1 %v7824_v63 }
 0x792   :  { %6004 = vmatpush1.bf16.msra.mxu0 %v7827_v6  ;;  %6068 = vmatpush1.bf16.msra.mxu1 %v7831_v7 }
 0x793   :  { %6006 = vmatprep.subr.bf16.mxu0 %v7833_v9  ;;  %6070 = vmatprep.subr.bf16.mxu1 %v7836_v14 }
 0x796   :  { %6008 = vmatpush1.bf16.msra.mxu0 %v7839_v23  ;;  %6072 = vmatpush1.bf16.msra.mxu1 %v7843_v24 }
 0x797   :  { %6010 = vmatprep.subr.bf16.mxu0 %v7845_v26  ;;  %6074 = vmatprep.subr.bf16.mxu1 %v7848_v32 }
 0x79a   :  { %6012 = vmatpush1.bf16.msra.mxu0 %v7854_v41  ;;  %6076 = vmatpush1.bf16.msra.mxu1 %v7859_v44 }
 0x79b   :  { %6014 = vmatprep.subr.bf16.mxu0 %v7861_v45  ;;  %6078 = vmatprep.subr.bf16.mxu1 %v7864_v52 }
 0x79e   :  { %6016 = vmatpush1.bf16.msra.mxu0 %v7873_v61  ;;  %6080 = vmatpush1.bf16.msra.mxu1 %v7878_v0 }
 0x79f   :  { %6018 = vmatprep.subr.bf16.mxu0 %v7880_v2  ;;  %6082 = vmatprep.subr.bf16.mxu1 %v7886_v10 }
 0x7a2   :  { %6020 = vmatpush1.bf16.msra.mxu0 %v7892_v19  ;;  %6084 = vmatpush1.bf16.msra.mxu1 %v7897_v27 }
 0x7a3   :  { %6022 = vmatprep.subr.bf16.mxu0 %v10466_v1  ;;  %6086 = vmatprep.subr.bf16.mxu1 %v10467_v11 }
 0x7a6   :  { %6024 = vmatpush1.bf16.msra.mxu0 %v10468_v8  ;;  %6088 = vmatpush1.bf16.msra.mxu1 %v10469_v33  ;;  %v10496_v33 = vld [vmem:[#allocation142_spill] sm:$0xff] }
 0x7a7   :  { %6026 = vmatprep.subr.bf16.mxu0 %v10470_v49  ;;  %6090 = vmatprep.subr.bf16.mxu1 %v10471_v39  ;;  %v10481_v49 = vld [vmem:[#allocation30_spill] sm:$0xff]  ;;  %v10482_v39 = vld [vmem:[#allocation31_spill] sm:$0xff] }
 0x7aa   :  { %6028 = vmatpush1.bf16.msra.mxu0 %v10472_v35  ;;  %6092 = vmatpush1.bf16.msra.mxu1 %v10473_v22  ;;  %v10483_v35 = vld [vmem:[#allocation32_spill] sm:$0xff]  ;;  %v10484_v22 = vld [vmem:[#allocation33_spill] sm:$0xff] }
 0x7ab   :  { %6030 = vmatprep.subr.bf16.mxu0 %v10474_v3  ;;  %6094 = vmatprep.subr.bf16.mxu1 %v10475_v13  ;;  %v10485_v3 = vld [vmem:[#allocation34_spill] sm:$0xff]  ;;  %v10486_v13 = vld [vmem:[#allocation35_spill] sm:$0xff] }
 0x7ae   :  { %6032 = vmatpush1.bf16.msra.mxu0 %v10476_v15  ;;  %6096 = vmatpush1.bf16.msra.mxu1 %v10477_v50  ;;  %v10487_v15 = vld [vmem:[#allocation36_spill] sm:$0xff]  ;;  %v10488_v50 = vld [vmem:[#allocation37_spill] sm:$0xff] }
 0x7af   :  { %6034 = vmatprep.subr.bf16.mxu0 %v10478_v60  ;;  %6098 = vmatprep.subr.bf16.mxu1 %v10479_v31  ;;  %v10489_v60 = vld [vmem:[#allocation38_spill] sm:$0xff]  ;;  %v10490_v31 = vld [vmem:[#allocation39_spill] sm:$0xff] }
 0x7b2   :  { %6036 = vmatpush1.bf16.msra.mxu0 %v10480_v48  ;;  %6100 = vmatpush1.bf16.msra.mxu1 %v10481_v49  ;;  %v10491_v48 = vld [vmem:[#allocation40_spill] sm:$0xff]  ;;  %v10492_v49 = vld [vmem:[#allocation41_spill] sm:$0xff] }
 0x7b3   :  { %6038 = vmatprep.subr.bf16.mxu0 %v10482_v39  ;;  %6102 = vmatprep.subr.bf16.mxu1 %v10483_v35  ;;  %v10493_v39 = vld [vmem:[#allocation42_spill] sm:$0xff]  ;;  %v10494_v35 = vld [vmem:[#allocation43_spill] sm:$0xff] }
 0x7b6   :  { %6040 = vmatpush1.bf16.msra.mxu0 %v10484_v22  ;;  %6104 = vmatpush1.bf16.msra.mxu1 %v10485_v3  ;;  %v10495_v22 = vld [vmem:[#allocation44_spill] sm:$0xff] }
 0x7b7   :  { %6042 = vmatprep.subr.bf16.mxu0 %v10486_v13  ;;  %6106 = vmatprep.subr.bf16.mxu1 %v10487_v15 }
 0x7ba   :  { %6044 = vmatpush1.bf16.msra.mxu0 %v10488_v50  ;;  %6108 = vmatpush1.bf16.msra.mxu1 %v10489_v60 }
 0x7bb   :  { %6046 = vmatprep.subr.bf16.mxu0 %v10490_v31  ;;  %6110 = vmatprep.subr.bf16.mxu1 %v10491_v48 }
 0x7be   :  { %6048 = vmatpush1.bf16.msra.mxu0 %v10492_v49  ;;  %6112 = vmatpush1.bf16.msra.mxu1 %v10493_v39 }
 0x7bf   :  { %6114 = vmatprep.subr.bf16.mxu0 %v10494_v35  ;;  %6178 = vmatprep.subr.bf16.mxu1 %v10495_v22 }
 0x854   :  { %v2558_v3 = vpop.f32.mrb[22].mxu0  ;;  %v2629_v13 = vpop.f32.mrb[22].mxu1 }
 0x855   :  { %v2634_v15 = vadd.f32 %v2558_v3, %v10496_v33  ;;  %v2560_v8 = vpop.f32.mrb[23].mxu0  ;;  %v2631_v50 = vpop.f32.mrb[23].mxu1  ;;  %v2636_v39 = vadd.f32 %v2629_v13, %v8435_v62 }
 0x856   :  { %v2635_v60 = vadd.f32 %v2560_v8, %v8424_v43  ;;  %v2637_v49 = vadd.f32 %v2631_v50, %v10248_v17 }
 0x857   :  { %v4675_v11 = vmul.f32 -1.442695, %v2634_v15 }
 0x858   :  { %v4676_v31 = vmul.f32 -1.442695, %v2635_v60  ;;  %v4677_v48 = vmul.f32 -1.442695, %v2637_v49 }
 0x859   :  { %7480 = vpow2.f32 %v4675_v11 }
 0x85a   :  { %7482 = vpow2.f32 %v4676_v31 }
 0x85b   :  { %7484 = vpow2.f32 %v4677_v48  ;;  %v10503_v48 = vld [vmem:[#allocation57_spill] sm:$0xff] }
 0x85c   :  { %7486 = vtanh.f32 %v2636_v39  ;;  %v10501_v39 = vld [vmem:[#allocation55_spill] sm:$0xff] }
 0x863   :  { %v7481_v35 = vpop.eup %7480 }
 0x864   :  { %v7483_v1 = vpop.eup %7482  ;;  %v2641_v22 = vadd.f32 1.0, %v7481_v35 }
 0x865   :  { %v2647_v27 = vadd.f32 1.0, %v7483_v1  ;;  %v7485_v3 = vpop.eup %7484  ;;  %v10499_v1 = vld [vmem:[#allocation53_spill] sm:$0xff] }
 0x866   :  { %7488 = vrcp.f32 %v2641_v22  ;;  %v7487_v33 = vpop.eup %7486  ;;  %v2654_v11 = vadd.f32 1.0, %v7485_v3  ;;  %v10502_v22 = vld [vmem:[#allocation56_spill] sm:$0xff]  ;;  %v10504_v3 = vld [vmem:[#allocation58_spill] sm:$0xff] }
 0x867   :  { %7490 = vrcp.f32 %v2647_v27  ;;  %v10497_v27 = vld [vmem:[#allocation51_spill] sm:$0xff] }
 0x868   :  { %7492 = vrcp.f32 %v2654_v11  ;;  %v10508_v11 = vld [vmem:[#allocation62_spill] sm:$0xff] }
 0x870   :  { %v7489_v8 = vpop.eup %7488 }
 0x871   :  { %v7491_v15 = vpop.eup %7490  ;;  %v2658_v60 = vmul.f32 %v7489_v8, %v7487_v33  ;;  %v10500_v33 = vld [vmem:[#allocation54_spill] sm:$0xff]  ;;  %v10505_v8 = vld [vmem:[#allocation59_spill] sm:$0xff] }
 0x872   :  { %v2657_v31 = vmul.f32 %v7491_v15, %v8810_v5  ;;  %v7493_v49 = vpop.eup %7492  ;;  %v10498_v5 = vld [vmem:[#allocation52_spill] sm:$0xff] }
 0x873   :  { %v10506_v15 = vld [vmem:[#allocation60_spill] sm:$0xff] }
 0x874   :  { %v8996_v50 = vadd.f32 %v2658_v60, %v2657_v31  ;;  %v10507_v60 = vld [vmem:[#allocation61_spill] sm:$0xff]  ;;  %v10509_v31 = vld [vmem:[#allocation63_spill] sm:$0xff] }
 0x876   :  { %7494 = vtanh.f32 %v8996_v50 }
 0x880   :  { %v7495_v35 = vpop.eup %7494 }
 0x881   :  { %v2661_v13 = vmul.f32 %v7495_v35, %v7493_v49  ;;  %v10510_v49 = vld [vmem:[#allocation64_spill] sm:$0xff]  ;;  %v10511_v35 = vld [vmem:[#allocation65_spill] sm:$0xff] }
 0x883   :  { %2726 = vmatprep.mubr.f32.mxu0 %v2661_v13  ;;  %2797 = vmatprep.mubr.f32.mxu1 %v2661_v13 }
 0x884   :  { %2727 = vmatmul.mubr.f32.vlgmr.msra.gmra.mrb[8].mxu0 %v8923_v55  ;;  %2798 = vmatmul.mubr.f32.vlgmr.msra.gmra.mrb[8].mxu1 %v8923_v55 }
 0x885   :  { %6116 = vmatpush1.bf16.msra.mxu0 %v10125_v53  ;;  %6180 = vmatpush1.bf16.msra.mxu1 %v10126_v54 }
 0x886   :  { %2868 = vmatprep.mubr.f32.mxu0 %v2661_v13  ;;  %2939 = vmatprep.mubr.f32.mxu1 %v2661_v13  ;;  %v10512_v13 = vld [vmem:[#allocation66_spill] sm:$0xff] }
 0x887   :  { %6118 = vmatprep.subr.bf16.mxu0 %v10127_v12  ;;  %6182 = vmatprep.subr.bf16.mxu1 %v10128_v18 }
 0x889   :  { %6120 = vmatpush1.bf16.msra.mxu0 %v10249_v36  ;;  %6184 = vmatpush1.bf16.msra.mxu1 %v10373_v28 }
 0x88a   :  { %6122 = vmatprep.subr.bf16.mxu0 %v10497_v27  ;;  %6186 = vmatprep.subr.bf16.mxu1 %v10498_v5 }
 0x88d   :  { %6124 = vmatpush1.bf16.msra.mxu0 %v10499_v1  ;;  %6188 = vmatpush1.bf16.msra.mxu1 %v10500_v33 }
 0x88e   :  { %6126 = vmatprep.subr.bf16.mxu0 %v10501_v39  ;;  %6190 = vmatprep.subr.bf16.mxu1 %v10502_v22  ;;  %v10513_v22 = vld [vmem:[#allocation67_spill] sm:$0xff] }
 0x891   :  { %6128 = vmatpush1.bf16.msra.mxu0 %v10503_v48  ;;  %6192 = vmatpush1.bf16.msra.mxu1 %v10504_v3  ;;  %v10514_v48 = vld [vmem:[#allocation68_spill] sm:$0xff]  ;;  %v10515_v3 = vld [vmem:[#allocation69_spill] sm:$0xff] }
 0x892   :  { %6130 = vmatprep.subr.bf16.mxu0 %v10505_v8  ;;  %6194 = vmatprep.subr.bf16.mxu1 %v10506_v15  ;;  %v10516_v8 = vld [vmem:[#allocation70_spill] sm:$0xff]  ;;  %v10517_v15 = vld [vmem:[#allocation71_spill] sm:$0xff] }
 0x895   :  { %6132 = vmatpush1.bf16.msra.mxu0 %v10507_v60  ;;  %6196 = vmatpush1.bf16.msra.mxu1 %v10508_v11  ;;  %v10518_v60 = vld [vmem:[#allocation72_spill] sm:$0xff]  ;;  %v10519_v11 = vld [vmem:[#allocation73_spill] sm:$0xff] }
 0x896   :  { %6134 = vmatprep.subr.bf16.mxu0 %v10509_v31  ;;  %6198 = vmatprep.subr.bf16.mxu1 %v10510_v49  ;;  %v10520_v31 = vld [vmem:[#allocation74_spill] sm:$0xff]  ;;  %v10521_v49 = vld [vmem:[#allocation75_spill] sm:$0xff] }
 0x899   :  { %6136 = vmatpush1.bf16.msra.mxu0 %v10511_v35  ;;  %6200 = vmatpush1.bf16.msra.mxu1 %v10512_v13  ;;  %v10522_v35 = vld [vmem:[#allocation76_spill] sm:$0xff]  ;;  %v10523_v13 = vld [vmem:[#allocation77_spill] sm:$0xff] }
 0x89a   :  { %6138 = vmatprep.subr.bf16.mxu0 %v10513_v22  ;;  %6202 = vmatprep.subr.bf16.mxu1 %v10514_v48  ;;  %v10524_v22 = vld [vmem:[#allocation78_spill] sm:$0xff]  ;;  %v10525_v48 = vld [vmem:[#allocation79_spill] sm:$0xff] }
 0x89d   :  { %6140 = vmatpush1.bf16.msra.mxu0 %v10515_v3  ;;  %6204 = vmatpush1.bf16.msra.mxu1 %v10516_v8  ;;  %v10526_v3 = vld [vmem:[#allocation80_spill] sm:$0xff]  ;;  %v10527_v8 = vld [vmem:[#allocation81_spill] sm:$0xff] }
 0x89e   :  { %6142 = vmatprep.subr.bf16.mxu0 %v10517_v15  ;;  %6206 = vmatprep.subr.bf16.mxu1 %v10518_v60  ;;  %v10528_v15 = vld [vmem:[#allocation82_spill] sm:$0xff]  ;;  %v10529_v60 = vld [vmem:[#allocation83_spill] sm:$0xff] }
 0x8a1   :  { %6144 = vmatpush1.bf16.msra.mxu0 %v10519_v11  ;;  %6208 = vmatpush1.bf16.msra.mxu1 %v10520_v31  ;;  %v10530_v11 = vld [vmem:[#allocation84_spill] sm:$0xff]  ;;  %v10531_v31 = vld [vmem:[#allocation85_spill] sm:$0xff] }
 0x8a2   :  { %6146 = vmatprep.subr.bf16.mxu0 %v10521_v49  ;;  %6210 = vmatprep.subr.bf16.mxu1 %v10522_v35  ;;  %v10532_v49 = vld [vmem:[#allocation86_spill] sm:$0xff]  ;;  %v10533_v35 = vld [vmem:[#allocation87_spill] sm:$0xff] }
 0x8a5   :  { %6148 = vmatpush1.bf16.msra.mxu0 %v10523_v13  ;;  %6212 = vmatpush1.bf16.msra.mxu1 %v10524_v22  ;;  %v10534_v13 = vld [vmem:[#allocation88_spill] sm:$0xff]  ;;  %v10535_v22 = vld [vmem:[#allocation89_spill] sm:$0xff] }
 0x8a6   :  { %6150 = vmatprep.subr.bf16.mxu0 %v10525_v48  ;;  %6214 = vmatprep.subr.bf16.mxu1 %v10526_v3  ;;  %v10536_v48 = vld [vmem:[#allocation90_spill] sm:$0xff]  ;;  %v10537_v3 = vld [vmem:[#allocation91_spill] sm:$0xff] }
 0x8a9   :  { %6152 = vmatpush1.bf16.msra.mxu0 %v10527_v8  ;;  %6216 = vmatpush1.bf16.msra.mxu1 %v10528_v15  ;;  %v10538_v8 = vld [vmem:[#allocation92_spill] sm:$0xff]  ;;  %v10539_v15 = vld [vmem:[#allocation93_spill] sm:$0xff] }
 0x8aa   :  { %6154 = vmatprep.subr.bf16.mxu0 %v10529_v60  ;;  %6218 = vmatprep.subr.bf16.mxu1 %v10530_v11  ;;  %v10540_v60 = vld [vmem:[#allocation94_spill] sm:$0xff]  ;;  %v10541_v11 = vld [vmem:[#allocation95_spill] sm:$0xff] }
 0x8ad   :  { %6156 = vmatpush1.bf16.msra.mxu0 %v10531_v31  ;;  %6220 = vmatpush1.bf16.msra.mxu1 %v10532_v49  ;;  %v10542_v31 = vld [vmem:[#allocation96_spill] sm:$0xff]  ;;  %v10543_v49 = vld [vmem:[#allocation97_spill] sm:$0xff] }
 0x8ae   :  { %6158 = vmatprep.subr.bf16.mxu0 %v10533_v35  ;;  %6222 = vmatprep.subr.bf16.mxu1 %v10534_v13  ;;  %v10544_v35 = vld [vmem:[#allocation98_spill] sm:$0xff]  ;;  %v10545_v13 = vld [vmem:[#allocation99_spill] sm:$0xff] }
 0x8b1   :  { %6160 = vmatpush1.bf16.msra.mxu0 %v10535_v22  ;;  %6224 = vmatpush1.bf16.msra.mxu1 %v10536_v48  ;;  %v10546_v22 = vld [vmem:[#allocation100_spill] sm:$0xff]  ;;  %v10547_v48 = vld [vmem:[#allocation101_spill] sm:$0xff] }
 0x8b2   :  { %6162 = vmatprep.subr.bf16.mxu0 %v10537_v3  ;;  %6226 = vmatprep.subr.bf16.mxu1 %v10538_v8  ;;  %v10548_v3 = vld [vmem:[#allocation102_spill] sm:$0xff]  ;;  %v10549_v8 = vld [vmem:[#allocation103_spill] sm:$0xff] }
 0x8b5   :  { %6164 = vmatpush1.bf16.msra.mxu0 %v10539_v15  ;;  %6228 = vmatpush1.bf16.msra.mxu1 %v10540_v60  ;;  %v10550_v15 = vld [vmem:[#allocation104_spill] sm:$0xff]  ;;  %v10551_v60 = vld [vmem:[#allocation105_spill] sm:$0xff] }
 0x8b6   :  { %6166 = vmatprep.subr.bf16.mxu0 %v10541_v11  ;;  %6230 = vmatprep.subr.bf16.mxu1 %v10542_v31  ;;  %v10552_v11 = vld [vmem:[#allocation106_spill] sm:$0xff]  ;;  %v10553_v31 = vld [vmem:[#allocation107_spill] sm:$0xff] }
 0x8b9   :  { %6168 = vmatpush1.bf16.msra.mxu0 %v10543_v49  ;;  %6232 = vmatpush1.bf16.msra.mxu1 %v10544_v35  ;;  %v10554_v49 = vld [vmem:[#allocation108_spill] sm:$0xff]  ;;  %v10588_v35 = vld [vmem:[#allocation139_spill] sm:$0xff] }
 0x8ba   :  { %6170 = vmatprep.subr.bf16.mxu0 %v10545_v13  ;;  %6234 = vmatprep.subr.bf16.mxu1 %v10546_v22  ;;  %v10555_v22 = vld [vmem:[#allocation109_spill] sm:$0xff]  ;;  %v10569_v13 = vld [vmem:[#allocation122_spill] sm:$0xff] }
 0x8bd   :  { %6172 = vmatpush1.bf16.msra.mxu0 %v10547_v48  ;;  %6236 = vmatpush1.bf16.msra.mxu1 %v10548_v3  ;;  %v10556_v48 = vld [vmem:[#allocation110_spill] sm:$0xff]  ;;  %v10557_v3 = vld [vmem:[#allocation111_spill] sm:$0xff] }
 0x8be   :  { %6174 = vmatprep.subr.bf16.mxu0 %v10549_v8  ;;  %6238 = vmatprep.subr.bf16.mxu1 %v10550_v15  ;;  %v10558_v8 = vld [vmem:[#allocation112_spill] sm:$0xff]  ;;  %v10559_v15 = vmov 0.0  }
 0x8c1   :  { %6176 = vmatpush1.bf16.msra.mxu0 %v10551_v60  ;;  %6240 = vmatpush1.bf16.msra.mxu1 %v10552_v11  ;;  %v10560_v11 = vld [vmem:[#allocation113_spill] sm:$0xff]  ;;  %v10563_v60 = vld [vmem:[#allocation116_spill] sm:$0xff] }
 0x8c2   :  { %6242 = vmatprep.subr.bf16.mxu0 %v10553_v31  ;;  %6274 = vmatprep.subr.bf16.mxu1 %v10554_v49  ;;  %v10561_v31 = vld [vmem:[#allocation114_spill] sm:$0xff]  ;;  %v10562_v49 = vld [vmem:[#allocation115_spill] sm:$0xff] }
 0x8c4   :  { %2869 = vmatmul.mubr.f32.vlgmr.msra.gmra.mrb[24].mxu0 %v8923_v55  ;;  %2940 = vmatmul.mubr.f32.vlgmr.msra.gmra.mrb[24].mxu1 %v8923_v55  ;;  %v10564_v55 = vld [vmem:[#allocation117_spill] sm:$0xff] }
 0x8c5   :  { %6244 = vmatpush1.bf16.msra.mxu0 %v10555_v22  ;;  %6276 = vmatpush1.bf16.msra.mxu1 %v10556_v48  ;;  %v10565_v22 = vld [vmem:[#allocation118_spill] sm:$0xff]  ;;  %v10566_v48 = vld [vmem:[#allocation119_spill] sm:$0xff] }
 0x8c6   :  { %6246 = vmatprep.subr.bf16.mxu0 %v10557_v3  ;;  %6278 = vmatprep.subr.bf16.mxu1 %v10558_v8  ;;  %v10567_v3 = vld [vmem:[#allocation120_spill] sm:$0xff]  ;;  %v10568_v8 = vld [vmem:[#allocation121_spill] sm:$0xff] }
 0x8c7   :  { %3042 = vmatprep.mubr.f32.mxu0 %v10559_v15  ;;  %3113 = vmatprep.mubr.f32.mxu1 %v10559_v15  ;;  %v10570_v15 = vld [vmem:[#allocation123_spill] sm:$0xff] }
 0x8c9   :  { %6248 = vmatpush1.bf16.msra.mxu0 %v10560_v11  ;;  %6280 = vmatpush1.bf16.msra.mxu1 %v10561_v31  ;;  %v10571_v11 = vld [vmem:[#allocation124_spill] sm:$0xff]  ;;  %v10572_v31 = vld [vmem:[#allocation125_spill] sm:$0xff] }
 0x8ca   :  { %6250 = vmatprep.subr.bf16.mxu0 %v10562_v49  ;;  %6282 = vmatprep.subr.bf16.mxu1 %v10563_v60  ;;  %v10573_v49 = vld [vmem:[#allocation126_spill] sm:$0xff]  ;;  %v10574_v60 = vld [vmem:[#allocation127_spill] sm:$0xff] }
 0x8cd   :  { %6252 = vmatpush1.bf16.msra.mxu0 %v10564_v55  ;;  %6284 = vmatpush1.bf16.msra.mxu1 %v10565_v22  ;;  %v10575_v55 = vld [vmem:[#allocation128_spill] sm:$0xff]  ;;  %v10576_v22 = vld [vmem:[#allocation129_spill] sm:$0xff] }
 0x8ce   :  { %6254 = vmatprep.subr.bf16.mxu0 %v10566_v48  ;;  %6286 = vmatprep.subr.bf16.mxu1 %v10567_v3  ;;  %v10577_v48 = vld [vmem:[#allocation130_spill] sm:$0xff]  ;;  %v10578_v3 = vld [vmem:[#allocation131_spill] sm:$0xff] }
 0x8d1   :  { %6256 = vmatpush1.bf16.msra.mxu0 %v10568_v8  ;;  %6288 = vmatpush1.bf16.msra.mxu1 %v10569_v13  ;;  %v10579_v8 = vld [vmem:[#allocation132_spill] sm:$0xff]  ;;  %v10580_v13 = vld [vmem:[#allocation133_spill] sm:$0xff] }
 0x8d2   :  { %6258 = vmatprep.subr.bf16.mxu0 %v10570_v15  ;;  %6290 = vmatprep.subr.bf16.mxu1 %v10571_v11  ;;  %v10581_v15 = vld [vmem:[#allocation134_spill] sm:$0xff]  ;;  %v10582_v11 = vld [vmem:[#allocation135_spill] sm:$0xff] }
 0x8d5   :  { %6260 = vmatpush1.bf16.msra.mxu0 %v10572_v31  ;;  %6292 = vmatpush1.bf16.msra.mxu1 %v10573_v49  ;;  %v10583_v31 = vld [vmem:[#allocation136_spill] sm:$0xff]  ;;  %v10584_v49 = vld [vmem:[#allocation137_spill] sm:$0xff] }
 0x8d6   :  { %6262 = vmatprep.subr.bf16.mxu0 %v10574_v60  ;;  %6294 = vmatprep.subr.bf16.mxu1 %v10575_v55  ;;  %v10585_v60 = vld [vmem:[#allocation138_spill] sm:$0xff] }
 0x8d7   :  { %v10586_v55 = vld [vmem:[#allocation10_spill] sm:$0xff] }
 0x8d9   :  { %6264 = vmatpush1.bf16.msra.mxu0 %v10576_v22  ;;  %6296 = vmatpush1.bf16.msra.mxu1 %v10577_v48  ;;  %v10587_v22 = vld [vmem:[#allocation11_spill] sm:$0xff] }
 0x8da   :  { %6266 = vmatprep.subr.bf16.mxu0 %v10578_v3  ;;  %6298 = vmatprep.subr.bf16.mxu1 %v10579_v8 }
 0x8dd   :  { %6268 = vmatpush1.bf16.msra.mxu0 %v10580_v13  ;;  %6300 = vmatpush1.bf16.msra.mxu1 %v10581_v15 }
 0x8de   :  { %6270 = vmatprep.subr.bf16.mxu0 %v10582_v11  ;;  %6302 = vmatprep.subr.bf16.mxu1 %v10583_v31 }
 0x8e1   :  { %6272 = vmatpush1.bf16.msra.mxu0 %v10584_v49  ;;  %6304 = vmatpush1.bf16.msra.mxu1 %v10585_v60 }
 0x8e2   :  { %6306 = vmatprep.subr.bf16.mxu0 %v10586_v55  ;;  %6370 = vmatprep.subr.bf16.mxu1 %v10587_v22 }
 0x957   :  { %v2728_v48 = vpop.f32.mrb[8].mxu0  ;;  %v2799_v3 = vpop.f32.mrb[8].mxu1 }
 0x958   :  { %v7273_v8 = vadd.f32 %v2728_v48, %v10588_v35  ;;  %v2730_v39 = vpop.f32.mrb[9].mxu0  ;;  %v2801_v13 = vpop.f32.mrb[9].mxu1  ;;  %v7289_v60 = vadd.f32 %v2799_v3, %v8341_v56 }
 0x959   :  { %v7274_v15 = vadd.f32 %v2730_v39, %v10218_v40  ;;  %v7290_v49 = vadd.f32 %v2801_v13, %v10219_v37 }
 0x95a   :  { %v4678_v33 = vmul.f32 -1.442695, %v7273_v8 }
 0x95b   :  { %v4679_v11 = vmul.f32 -1.442695, %v7274_v15  ;;  %v4680_v31 = vmul.f32 -1.442695, %v7290_v49 }
 0x95c   :  { %7496 = vpow2.f32 %v4678_v33 }
 0x95d   :  { %7498 = vpow2.f32 %v4679_v11 }
 0x95e   :  { %7500 = vpow2.f32 %v4680_v31 }
 0x95f   :  { %7502 = vtanh.f32 %v7289_v60  ;;  %v10593_v60 = vld [vmem:[#allocation18_spill] sm:$0xff] }
 0x966   :  { %v7497_v55 = vpop.eup %7496 }
 0x967   :  { %v7499_v1 = vpop.eup %7498  ;;  %v2957_v22 = vadd.f32 1.0, %v7497_v55  ;;  %v10595_v55 = vld [vmem:[#allocation20_spill] sm:$0xff] }
 0x968   :  { %v2963_v5 = vadd.f32 1.0, %v7499_v1  ;;  %v7501_v48 = vpop.eup %7500  ;;  %v10591_v1 = vld [vmem:[#allocation16_spill] sm:$0xff] }
 0x969   :  { %7504 = vrcp.f32 %v2957_v22  ;;  %v7503_v35 = vpop.eup %7502  ;;  %v2970_v33 = vadd.f32 1.0, %v7501_v48  ;;  %v10592_v22 = vld [vmem:[#allocation17_spill] sm:$0xff] }
 0x96a   :  { %7506 = vrcp.f32 %v2963_v5  ;;  %v10590_v5 = vld [vmem:[#allocation15_spill] sm:$0xff]  ;;  %v10596_v48 = vld [vmem:[#allocation21_spill] sm:$0xff] }
 0x96b   :  { %7508 = vrcp.f32 %v2970_v33  ;;  %v10600_v33 = vld [vmem:[#allocation25_spill] sm:$0xff] }
 0x973   :  { %v7505_v39 = vpop.eup %7504 }
 0x974   :  { %v7507_v8 = vpop.eup %7506  ;;  %v2974_v15 = vmul.f32 %v7505_v39, %v7503_v35  ;;  %v10594_v35 = vld [vmem:[#allocation19_spill] sm:$0xff]  ;;  %v10597_v39 = vld [vmem:[#allocation22_spill] sm:$0xff] }
 0x975   :  { %v2973_v11 = vmul.f32 %v7507_v8, %v8920_v4  ;;  %v7509_v3 = vpop.eup %7508  ;;  %v10589_v4 = vld [vmem:[#allocation14_spill] sm:$0xff]  ;;  %v10598_v8 = vld [vmem:[#allocation23_spill] sm:$0xff] }
 0x977   :  { %v9106_v13 = vadd.f32 %v2974_v15, %v2973_v11  ;;  %v10599_v15 = vld [vmem:[#allocation24_spill] sm:$0xff]  ;;  %v10601_v11 = vld [vmem:[#allocation26_spill] sm:$0xff] }
 0x979   :  { %7510 = vtanh.f32 %v9106_v13 }
 0x983   :  { %v7511_v49 = vpop.eup %7510 }
 0x984   :  { %v9109_v31 = vmul.f32 %v7511_v49, %v7509_v3  ;;  %v10602_v3 = vld [vmem:[#allocation27_spill] sm:$0xff]  ;;  %v10603_v49 = vld [vmem:[#allocation28_spill] sm:$0xff] }
 0x986   :  { %3043 = vmatmul.mubr.f32.vlgmr.msra.gmra.mrb[24].mxu0 %v9109_v31  ;;  %3114 = vmatmul.mubr.f32.vlgmr.msra.gmra.mrb[24].mxu1 %v9109_v31 }
 0x987   :  { %6308 = vmatpush1.bf16.msra.mxu0 %v7779_v16  ;;  %6372 = vmatpush1.bf16.msra.mxu1 %v7783_v20 }
 0x988   :  { %6310 = vmatprep.subr.bf16.mxu0 %v7785_v21  ;;  %6374 = vmatprep.subr.bf16.mxu1 %v7789_v25 }
 0x98b   :  { %6312 = vmatpush1.bf16.msra.mxu0 %v7793_v29  ;;  %6376 = vmatpush1.bf16.msra.mxu1 %v7795_v30 }
 0x98c   :  { %6314 = vmatprep.subr.bf16.mxu0 %v7798_v34  ;;  %6378 = vmatprep.subr.bf16.mxu1 %v7800_v38 }
 0x98f   :  { %6316 = vmatpush1.bf16.msra.mxu0 %v7803_v42  ;;  %6380 = vmatpush1.bf16.msra.mxu1 %v7807_v46 }
 0x990   :  { %6318 = vmatprep.subr.bf16.mxu0 %v7809_v47  ;;  %6382 = vmatprep.subr.bf16.mxu1 %v7812_v51 }
 0x993   :  { %6320 = vmatpush1.bf16.msra.mxu0 %v7815_v57  ;;  %6384 = vmatpush1.bf16.msra.mxu1 %v7819_v58 }
 0x994   :  { %6322 = vmatprep.subr.bf16.mxu0 %v7821_v59  ;;  %6386 = vmatprep.subr.bf16.mxu1 %v7824_v63 }
 0x997   :  { %6324 = vmatpush1.bf16.msra.mxu0 %v7827_v6  ;;  %6388 = vmatpush1.bf16.msra.mxu1 %v7831_v7 }
 0x998   :  { %6326 = vmatprep.subr.bf16.mxu0 %v7833_v9  ;;  %6390 = vmatprep.subr.bf16.mxu1 %v7836_v14 }
 0x99b   :  { %6328 = vmatpush1.bf16.msra.mxu0 %v7839_v23  ;;  %6392 = vmatpush1.bf16.msra.mxu1 %v7843_v24 }
 0x99c   :  { %6330 = vmatprep.subr.bf16.mxu0 %v7845_v26  ;;  %6394 = vmatprep.subr.bf16.mxu1 %v7848_v32 }
 0x99f   :  { %6332 = vmatpush1.bf16.msra.mxu0 %v7854_v41  ;;  %6396 = vmatpush1.bf16.msra.mxu1 %v7859_v44 }
 0x9a0   :  { %6334 = vmatprep.subr.bf16.mxu0 %v7861_v45  ;;  %6398 = vmatprep.subr.bf16.mxu1 %v7864_v52 }
 0x9a3   :  { %6336 = vmatpush1.bf16.msra.mxu0 %v7873_v61  ;;  %6400 = vmatpush1.bf16.msra.mxu1 %v7878_v0 }
 0x9a4   :  { %6338 = vmatprep.subr.bf16.mxu0 %v7880_v2  ;;  %6402 = vmatprep.subr.bf16.mxu1 %v7886_v10 }
 0x9a7   :  { %6340 = vmatpush1.bf16.msra.mxu0 %v7892_v19  ;;  %6404 = vmatpush1.bf16.msra.mxu1 %v10589_v4 }
 0x9a8   :  { %6342 = vmatprep.subr.bf16.mxu0 %v10590_v5  ;;  %6406 = vmatprep.subr.bf16.mxu1 %v10591_v1 }
 0x9ab   :  { %6344 = vmatpush1.bf16.msra.mxu0 %v10592_v22  ;;  %6408 = vmatpush1.bf16.msra.mxu1 %v10593_v60  ;;  %v10604_v60 = vld [vmem:[#allocation29_spill] sm:$0xff]  ;;  %v10620_v22 = vld [vmem:[#allocation142_spill] sm:$0xff] }
 0x9ac   :  { %6346 = vmatprep.subr.bf16.mxu0 %v10594_v35  ;;  %6410 = vmatprep.subr.bf16.mxu1 %v10595_v55  ;;  %v10605_v35 = vld [vmem:[#allocation30_spill] sm:$0xff]  ;;  %v10606_v55 = vld [vmem:[#allocation31_spill] sm:$0xff] }
 0x9af   :  { %6348 = vmatpush1.bf16.msra.mxu0 %v10596_v48  ;;  %6412 = vmatpush1.bf16.msra.mxu1 %v10597_v39  ;;  %v10607_v48 = vld [vmem:[#allocation32_spill] sm:$0xff]  ;;  %v10608_v39 = vld [vmem:[#allocation33_spill] sm:$0xff] }
 0x9b0   :  { %6350 = vmatprep.subr.bf16.mxu0 %v10598_v8  ;;  %6414 = vmatprep.subr.bf16.mxu1 %v10599_v15  ;;  %v10609_v8 = vld [vmem:[#allocation34_spill] sm:$0xff]  ;;  %v10610_v15 = vld [vmem:[#allocation35_spill] sm:$0xff] }
 0x9b3   :  { %6352 = vmatpush1.bf16.msra.mxu0 %v10600_v33  ;;  %6416 = vmatpush1.bf16.msra.mxu1 %v10601_v11  ;;  %v10611_v33 = vld [vmem:[#allocation36_spill] sm:$0xff]  ;;  %v10612_v11 = vld [vmem:[#allocation37_spill] sm:$0xff] }
 0x9b4   :  { %6354 = vmatprep.subr.bf16.mxu0 %v10602_v3  ;;  %6418 = vmatprep.subr.bf16.mxu1 %v10603_v49  ;;  %v10613_v3 = vld [vmem:[#allocation38_spill] sm:$0xff]  ;;  %v10614_v49 = vld [vmem:[#allocation39_spill] sm:$0xff] }
 0x9b7   :  { %6356 = vmatpush1.bf16.msra.mxu0 %v10604_v60  ;;  %6420 = vmatpush1.bf16.msra.mxu1 %v10605_v35  ;;  %v10615_v60 = vld [vmem:[#allocation40_spill] sm:$0xff]  ;;  %v10616_v35 = vld [vmem:[#allocation41_spill] sm:$0xff] }
 0x9b8   :  { %6358 = vmatprep.subr.bf16.mxu0 %v10606_v55  ;;  %6422 = vmatprep.subr.bf16.mxu1 %v10607_v48  ;;  %v10617_v55 = vld [vmem:[#allocation42_spill] sm:$0xff]  ;;  %v10618_v48 = vld [vmem:[#allocation43_spill] sm:$0xff] }
 0x9bb   :  { %6360 = vmatpush1.bf16.msra.mxu0 %v10608_v39  ;;  %6424 = vmatpush1.bf16.msra.mxu1 %v10609_v8  ;;  %v10619_v39 = vld [vmem:[#allocation44_spill] sm:$0xff] }
 0x9bc   :  { %6362 = vmatprep.subr.bf16.mxu0 %v10610_v15  ;;  %6426 = vmatprep.subr.bf16.mxu1 %v10611_v33 }
 0x9bf   :  { %6364 = vmatpush1.bf16.msra.mxu0 %v10612_v11  ;;  %6428 = vmatpush1.bf16.msra.mxu1 %v10613_v3 }
 0x9c0   :  { %6366 = vmatprep.subr.bf16.mxu0 %v10614_v49  ;;  %6430 = vmatprep.subr.bf16.mxu1 %v10615_v60 }
 0x9c3   :  { %6368 = vmatpush1.bf16.msra.mxu0 %v10616_v35  ;;  %6432 = vmatpush1.bf16.msra.mxu1 %v10617_v55 }
 0x9c4   :  { %6434 = vmatprep.subr.bf16.mxu0 %v10618_v48  ;;  %6498 = vmatprep.subr.bf16.mxu1 %v10619_v39 }
 0xa59   :  { %v3044_v8 = vpop.f32.mrb[24].mxu0  ;;  %v3115_v15 = vpop.f32.mrb[24].mxu1 }
 0xa5a   :  { %v3120_v33 = vadd.f32 %v3044_v8, %v10620_v22  ;;  %v3046_v1 = vpop.f32.mrb[25].mxu0  ;;  %v3117_v11 = vpop.f32.mrb[25].mxu1  ;;  %v3122_v55 = vadd.f32 %v3115_v15, %v8435_v62  ;;  %v10627_v15 = vld [vmem:[#allocation58_spill] sm:$0xff] }
 0xa5b   :  { %v3121_v3 = vadd.f32 %v3046_v1, %v8424_v43  ;;  %v3123_v35 = vadd.f32 %v3117_v11, %v10248_v17 }
 0xa5c   :  { %v4681_v5 = vmul.f32 -1.442695, %v3120_v33 }
 0xa5d   :  { %v4682_v49 = vmul.f32 -1.442695, %v3121_v3  ;;  %v4683_v60 = vmul.f32 -1.442695, %v3123_v35 }
 0xa5e   :  { %7512 = vpow2.f32 %v4681_v5 }
 0xa5f   :  { %7514 = vpow2.f32 %v4682_v49 }
 0xa60   :  { %7516 = vpow2.f32 %v4683_v60 }
 0xa61   :  { %7518 = vtanh.f32 %v3122_v55  ;;  %v10625_v55 = vld [vmem:[#allocation56_spill] sm:$0xff] }
 0xa68   :  { %v7513_v48 = vpop.eup %7512 }
 0xa69   :  { %v7515_v4 = vpop.eup %7514  ;;  %v3127_v39 = vadd.f32 1.0, %v7513_v48 }
 0xa6a   :  { %v3133_v19 = vadd.f32 1.0, %v7515_v4  ;;  %v7517_v8 = vpop.eup %7516  ;;  %v10623_v4 = vld [vmem:[#allocation54_spill] sm:$0xff] }
 0xa6b   :  { %7520 = vrcp.f32 %v3127_v39  ;;  %v7519_v22 = vpop.eup %7518  ;;  %v3140_v5 = vadd.f32 1.0, %v7517_v8  ;;  %v10626_v39 = vld [vmem:[#allocation57_spill] sm:$0xff]  ;;  %v10628_v8 = vld [vmem:[#allocation59_spill] sm:$0xff] }
 0xa6c   :  { %7522 = vrcp.f32 %v3133_v19  ;;  %v10621_v19 = vld [vmem:[#allocation52_spill] sm:$0xff] }
 0xa6d   :  { %7524 = vrcp.f32 %v3140_v5  ;;  %v10632_v5 = vld [vmem:[#allocation63_spill] sm:$0xff] }
 0xa75   :  { %v7521_v1 = vpop.eup %7520 }
 0xa76   :  { %v7523_v33 = vpop.eup %7522  ;;  %v3144_v3 = vmul.f32 %v7521_v1, %v7519_v22  ;;  %v10624_v22 = vld [vmem:[#allocation55_spill] sm:$0xff]  ;;  %v10629_v1 = vld [vmem:[#allocation60_spill] sm:$0xff] }
 0xa77   :  { %v3143_v49 = vmul.f32 %v7523_v33, %v8996_v50  ;;  %v7525_v35 = vpop.eup %7524  ;;  %v10622_v50 = vld [vmem:[#allocation53_spill] sm:$0xff] }
 0xa78   :  { %v10630_v33 = vld [vmem:[#allocation61_spill] sm:$0xff] }
 0xa79   :  { %v9182_v11 = vadd.f32 %v3144_v3, %v3143_v49  ;;  %v10631_v3 = vld [vmem:[#allocation62_spill] sm:$0xff]  ;;  %v10633_v49 = vld [vmem:[#allocation64_spill] sm:$0xff] }
 0xa7b   :  { %7526 = vtanh.f32 %v9182_v11 }
 0xa85   :  { %v7527_v48 = vpop.eup %7526 }
 0xa86   :  { %v3147_v60 = vmul.f32 %v7527_v48, %v7525_v35  ;;  %v10634_v35 = vld [vmem:[#allocation65_spill] sm:$0xff]  ;;  %v10635_v48 = vld [vmem:[#allocation66_spill] sm:$0xff] }
 0xa88   :  { %3212 = vmatprep.mubr.f32.mxu0 %v3147_v60  ;;  %3283 = vmatprep.mubr.f32.mxu1 %v3147_v60 }
 0xa89   :  { %3213 = vmatmul.mubr.f32.vlgmr.msra.gmra.mrb[10].mxu0 %v9109_v31  ;;  %3284 = vmatmul.mubr.f32.vlgmr.msra.gmra.mrb[10].mxu1 %v9109_v31 }
 0xa8a   :  { %6436 = vmatpush1.bf16.msra.mxu0 %v10125_v53  ;;  %6500 = vmatpush1.bf16.msra.mxu1 %v10126_v54 }
 0xa8b   :  { %3354 = vmatprep.mubr.f32.mxu0 %v3147_v60  ;;  %3425 = vmatprep.mubr.f32.mxu1 %v3147_v60  ;;  %v10636_v60 = vld [vmem:[#allocation67_spill] sm:$0xff] }
 0xa8c   :  { %6438 = vmatprep.subr.bf16.mxu0 %v10127_v12  ;;  %6502 = vmatprep.subr.bf16.mxu1 %v10128_v18 }
 0xa8e   :  { %6440 = vmatpush1.bf16.msra.mxu0 %v10249_v36  ;;  %6504 = vmatpush1.bf16.msra.mxu1 %v10373_v28 }
 0xa8f   :  { %6442 = vmatprep.subr.bf16.mxu0 %v10497_v27  ;;  %6506 = vmatprep.subr.bf16.mxu1 %v10621_v19 }
 0xa92   :  { %6444 = vmatpush1.bf16.msra.mxu0 %v10622_v50  ;;  %6508 = vmatpush1.bf16.msra.mxu1 %v10623_v4 }
 0xa93   :  { %6446 = vmatprep.subr.bf16.mxu0 %v10624_v22  ;;  %6510 = vmatprep.subr.bf16.mxu1 %v10625_v55 }
 0xa96   :  { %6448 = vmatpush1.bf16.msra.mxu0 %v10626_v39  ;;  %6512 = vmatpush1.bf16.msra.mxu1 %v10627_v15  ;;  %v10637_v39 = vld [vmem:[#allocation68_spill] sm:$0xff]  ;;  %v10638_v15 = vld [vmem:[#allocation69_spill] sm:$0xff] }
 0xa97   :  { %6450 = vmatprep.subr.bf16.mxu0 %v10628_v8  ;;  %6514 = vmatprep.subr.bf16.mxu1 %v10629_v1  ;;  %v10639_v8 = vld [vmem:[#allocation70_spill] sm:$0xff]  ;;  %v10640_v1 = vld [vmem:[#allocation71_spill] sm:$0xff] }
 0xa9a   :  { %6452 = vmatpush1.bf16.msra.mxu0 %v10630_v33  ;;  %6516 = vmatpush1.bf16.msra.mxu1 %v10631_v3  ;;  %v10641_v33 = vld [vmem:[#allocation72_spill] sm:$0xff]  ;;  %v10642_v3 = vld [vmem:[#allocation73_spill] sm:$0xff] }
 0xa9b   :  { %6454 = vmatprep.subr.bf16.mxu0 %v10632_v5  ;;  %6518 = vmatprep.subr.bf16.mxu1 %v10633_v49  ;;  %v10643_v5 = vld [vmem:[#allocation74_spill] sm:$0xff]  ;;  %v10644_v49 = vld [vmem:[#allocation75_spill] sm:$0xff] }
 0xa9e   :  { %6456 = vmatpush1.bf16.msra.mxu0 %v10634_v35  ;;  %6520 = vmatpush1.bf16.msra.mxu1 %v10635_v48  ;;  %v10645_v35 = vld [vmem:[#allocation76_spill] sm:$0xff]  ;;  %v10646_v48 = vld [vmem:[#allocation77_spill] sm:$0xff] }
 0xa9f   :  { %6458 = vmatprep.subr.bf16.mxu0 %v10636_v60  ;;  %6522 = vmatprep.subr.bf16.mxu1 %v10637_v39  ;;  %v10647_v60 = vld [vmem:[#allocation78_spill] sm:$0xff]  ;;  %v10648_v39 = vld [vmem:[#allocation79_spill] sm:$0xff] }
 0xaa2   :  { %6460 = vmatpush1.bf16.msra.mxu0 %v10638_v15  ;;  %6524 = vmatpush1.bf16.msra.mxu1 %v10639_v8  ;;  %v10649_v15 = vld [vmem:[#allocation80_spill] sm:$0xff]  ;;  %v10650_v8 = vld [vmem:[#allocation81_spill] sm:$0xff] }
 0xaa3   :  { %6462 = vmatprep.subr.bf16.mxu0 %v10640_v1  ;;  %6526 = vmatprep.subr.bf16.mxu1 %v10641_v33  ;;  %v10651_v1 = vld [vmem:[#allocation82_spill] sm:$0xff]  ;;  %v10652_v33 = vld [vmem:[#allocation83_spill] sm:$0xff] }
 0xaa6   :  { %6464 = vmatpush1.bf16.msra.mxu0 %v10642_v3  ;;  %6528 = vmatpush1.bf16.msra.mxu1 %v10643_v5  ;;  %v10653_v3 = vld [vmem:[#allocation84_spill] sm:$0xff]  ;;  %v10654_v5 = vld [vmem:[#allocation85_spill] sm:$0xff] }
 0xaa7   :  { %6466 = vmatprep.subr.bf16.mxu0 %v10644_v49  ;;  %6530 = vmatprep.subr.bf16.mxu1 %v10645_v35  ;;  %v10655_v49 = vld [vmem:[#allocation86_spill] sm:$0xff]  ;;  %v10656_v35 = vld [vmem:[#allocation87_spill] sm:$0xff] }
 0xaaa   :  { %6468 = vmatpush1.bf16.msra.mxu0 %v10646_v48  ;;  %6532 = vmatpush1.bf16.msra.mxu1 %v10647_v60  ;;  %v10657_v48 = vld [vmem:[#allocation88_spill] sm:$0xff]  ;;  %v10658_v60 = vld [vmem:[#allocation89_spill] sm:$0xff] }
 0xaab   :  { %6470 = vmatprep.subr.bf16.mxu0 %v10648_v39  ;;  %6534 = vmatprep.subr.bf16.mxu1 %v10649_v15  ;;  %v10659_v39 = vld [vmem:[#allocation90_spill] sm:$0xff]  ;;  %v10660_v15 = vld [vmem:[#allocation91_spill] sm:$0xff] }
 0xaae   :  { %6472 = vmatpush1.bf16.msra.mxu0 %v10650_v8  ;;  %6536 = vmatpush1.bf16.msra.mxu1 %v10651_v1  ;;  %v10661_v8 = vld [vmem:[#allocation92_spill] sm:$0xff]  ;;  %v10662_v1 = vld [vmem:[#allocation93_spill] sm:$0xff] }
 0xaaf   :  { %6474 = vmatprep.subr.bf16.mxu0 %v10652_v33  ;;  %6538 = vmatprep.subr.bf16.mxu1 %v10653_v3  ;;  %v10663_v33 = vld [vmem:[#allocation94_spill] sm:$0xff]  ;;  %v10664_v3 = vld [vmem:[#allocation95_spill] sm:$0xff] }
 0xab2   :  { %6476 = vmatpush1.bf16.msra.mxu0 %v10654_v5  ;;  %6540 = vmatpush1.bf16.msra.mxu1 %v10655_v49  ;;  %v10665_v5 = vld [vmem:[#allocation96_spill] sm:$0xff]  ;;  %v10666_v49 = vld [vmem:[#allocation97_spill] sm:$0xff] }
 0xab3   :  { %6478 = vmatprep.subr.bf16.mxu0 %v10656_v35  ;;  %6542 = vmatprep.subr.bf16.mxu1 %v10657_v48  ;;  %v10667_v35 = vld [vmem:[#allocation98_spill] sm:$0xff]  ;;  %v10668_v48 = vld [vmem:[#allocation99_spill] sm:$0xff] }
 0xab6   :  { %6480 = vmatpush1.bf16.msra.mxu0 %v10658_v60  ;;  %6544 = vmatpush1.bf16.msra.mxu1 %v10659_v39  ;;  %v10669_v60 = vld [vmem:[#allocation100_spill] sm:$0xff]  ;;  %v10670_v39 = vld [vmem:[#allocation101_spill] sm:$0xff] }
 0xab7   :  { %6482 = vmatprep.subr.bf16.mxu0 %v10660_v15  ;;  %6546 = vmatprep.subr.bf16.mxu1 %v10661_v8  ;;  %v10671_v15 = vld [vmem:[#allocation102_spill] sm:$0xff]  ;;  %v10672_v8 = vld [vmem:[#allocation103_spill] sm:$0xff] }
 0xaba   :  { %6484 = vmatpush1.bf16.msra.mxu0 %v10662_v1  ;;  %6548 = vmatpush1.bf16.msra.mxu1 %v10663_v33  ;;  %v10673_v1 = vld [vmem:[#allocation104_spill] sm:$0xff]  ;;  %v10674_v33 = vld [vmem:[#allocation105_spill] sm:$0xff] }
 0xabb   :  { %6486 = vmatprep.subr.bf16.mxu0 %v10664_v3  ;;  %6550 = vmatprep.subr.bf16.mxu1 %v10665_v5  ;;  %v10675_v3 = vld [vmem:[#allocation106_spill] sm:$0xff]  ;;  %v10676_v5 = vld [vmem:[#allocation107_spill] sm:$0xff] }
 0xabe   :  { %6488 = vmatpush1.bf16.msra.mxu0 %v10666_v49  ;;  %6552 = vmatpush1.bf16.msra.mxu1 %v10667_v35  ;;  %v10677_v49 = vld [vmem:[#allocation108_spill] sm:$0xff]  ;;  %v10711_v35 = vld [vmem:[#allocation139_spill] sm:$0xff] }
 0xabf   :  { %6490 = vmatprep.subr.bf16.mxu0 %v10668_v48  ;;  %6554 = vmatprep.subr.bf16.mxu1 %v10669_v60  ;;  %v10678_v60 = vld [vmem:[#allocation109_spill] sm:$0xff]  ;;  %v10692_v48 = vld [vmem:[#allocation122_spill] sm:$0xff] }
 0xac2   :  { %6492 = vmatpush1.bf16.msra.mxu0 %v10670_v39  ;;  %6556 = vmatpush1.bf16.msra.mxu1 %v10671_v15  ;;  %v10679_v39 = vld [vmem:[#allocation110_spill] sm:$0xff]  ;;  %v10680_v15 = vld [vmem:[#allocation111_spill] sm:$0xff] }
 0xac3   :  { %6494 = vmatprep.subr.bf16.mxu0 %v10672_v8  ;;  %6558 = vmatprep.subr.bf16.mxu1 %v10673_v1  ;;  %v10681_v8 = vld [vmem:[#allocation112_spill] sm:$0xff]  ;;  %v10682_v1 = vmov 0.0  }
 0xac6   :  { %6496 = vmatpush1.bf16.msra.mxu0 %v10674_v33  ;;  %6560 = vmatpush1.bf16.msra.mxu1 %v10675_v3  ;;  %v10683_v3 = vld [vmem:[#allocation113_spill] sm:$0xff]  ;;  %v10686_v33 = vld [vmem:[#allocation116_spill] sm:$0xff] }
 0xac7   :  { %6562 = vmatprep.subr.bf16.mxu0 %v10676_v5  ;;  %6594 = vmatprep.subr.bf16.mxu1 %v10677_v49  ;;  %v10684_v5 = vld [vmem:[#allocation114_spill] sm:$0xff]  ;;  %v10685_v49 = vld [vmem:[#allocation115_spill] sm:$0xff] }
 0xac9   :  { %3355 = vmatmul.mubr.f32.vlgmr.msra.gmra.mrb[26].mxu0 %v9109_v31  ;;  %3426 = vmatmul.mubr.f32.vlgmr.msra.gmra.mrb[26].mxu1 %v9109_v31  ;;  %v10687_v31 = vld [vmem:[#allocation117_spill] sm:$0xff] }
 0xaca   :  { %6564 = vmatpush1.bf16.msra.mxu0 %v10678_v60  ;;  %6596 = vmatpush1.bf16.msra.mxu1 %v10679_v39  ;;  %v10688_v60 = vld [vmem:[#allocation118_spill] sm:$0xff]  ;;  %v10689_v39 = vld [vmem:[#allocation119_spill] sm:$0xff] }
 0xacb   :  { %6566 = vmatprep.subr.bf16.mxu0 %v10680_v15  ;;  %6598 = vmatprep.subr.bf16.mxu1 %v10681_v8  ;;  %v10690_v15 = vld [vmem:[#allocation120_spill] sm:$0xff]  ;;  %v10691_v8 = vld [vmem:[#allocation121_spill] sm:$0xff] }
 0xacc   :  { %3528 = vmatprep.mubr.f32.mxu0 %v10682_v1  ;;  %3599 = vmatprep.mubr.f32.mxu1 %v10682_v1  ;;  %v10693_v1 = vld [vmem:[#allocation123_spill] sm:$0xff] }
 0xace   :  { %6568 = vmatpush1.bf16.msra.mxu0 %v10683_v3  ;;  %6600 = vmatpush1.bf16.msra.mxu1 %v10684_v5  ;;  %v10694_v3 = vld [vmem:[#allocation124_spill] sm:$0xff]  ;;  %v10695_v5 = vld [vmem:[#allocation125_spill] sm:$0xff] }
 0xacf   :  { %6570 = vmatprep.subr.bf16.mxu0 %v10685_v49  ;;  %6602 = vmatprep.subr.bf16.mxu1 %v10686_v33  ;;  %v10696_v49 = vld [vmem:[#allocation126_spill] sm:$0xff]  ;;  %v10697_v33 = vld [vmem:[#allocation127_spill] sm:$0xff] }
 0xad2   :  { %6572 = vmatpush1.bf16.msra.mxu0 %v10687_v31  ;;  %6604 = vmatpush1.bf16.msra.mxu1 %v10688_v60  ;;  %v10698_v31 = vld [vmem:[#allocation128_spill] sm:$0xff]  ;;  %v10699_v60 = vld [vmem:[#allocation129_spill] sm:$0xff] }
 0xad3   :  { %6574 = vmatprep.subr.bf16.mxu0 %v10689_v39  ;;  %6606 = vmatprep.subr.bf16.mxu1 %v10690_v15  ;;  %v10700_v39 = vld [vmem:[#allocation130_spill] sm:$0xff]  ;;  %v10701_v15 = vld [vmem:[#allocation131_spill] sm:$0xff] }
 0xad6   :  { %6576 = vmatpush1.bf16.msra.mxu0 %v10691_v8  ;;  %6608 = vmatpush1.bf16.msra.mxu1 %v10692_v48  ;;  %v10702_v8 = vld [vmem:[#allocation132_spill] sm:$0xff]  ;;  %v10703_v48 = vld [vmem:[#allocation133_spill] sm:$0xff] }
 0xad7   :  { %6578 = vmatprep.subr.bf16.mxu0 %v10693_v1  ;;  %6610 = vmatprep.subr.bf16.mxu1 %v10694_v3  ;;  %v10704_v1 = vld [vmem:[#allocation134_spill] sm:$0xff]  ;;  %v10705_v3 = vld [vmem:[#allocation135_spill] sm:$0xff] }
 0xada   :  { %6580 = vmatpush1.bf16.msra.mxu0 %v10695_v5  ;;  %6612 = vmatpush1.bf16.msra.mxu1 %v10696_v49  ;;  %v10706_v5 = vld [vmem:[#allocation136_spill] sm:$0xff]  ;;  %v10707_v49 = vld [vmem:[#allocation137_spill] sm:$0xff] }
 0xadb   :  { %6582 = vmatprep.subr.bf16.mxu0 %v10697_v33  ;;  %6614 = vmatprep.subr.bf16.mxu1 %v10698_v31  ;;  %v10708_v33 = vld [vmem:[#allocation138_spill] sm:$0xff] }
 0xadc   :  { %v10709_v31 = vld [vmem:[#allocation10_spill] sm:$0xff] }
 0xade   :  { %6584 = vmatpush1.bf16.msra.mxu0 %v10699_v60  ;;  %6616 = vmatpush1.bf16.msra.mxu1 %v10700_v39  ;;  %v10710_v60 = vld [vmem:[#allocation11_spill] sm:$0xff] }
 0xadf   :  { %6586 = vmatprep.subr.bf16.mxu0 %v10701_v15  ;;  %6618 = vmatprep.subr.bf16.mxu1 %v10702_v8 }
 0xae2   :  { %6588 = vmatpush1.bf16.msra.mxu0 %v10703_v48  ;;  %6620 = vmatpush1.bf16.msra.mxu1 %v10704_v1 }
 0xae3   :  { %6590 = vmatprep.subr.bf16.mxu0 %v10705_v3  ;;  %6622 = vmatprep.subr.bf16.mxu1 %v10706_v5 }
 0xae6   :  { %6592 = vmatpush1.bf16.msra.mxu0 %v10707_v49  ;;  %6624 = vmatpush1.bf16.msra.mxu1 %v10708_v33 }
 0xae7   :  { %6626 = vmatprep.subr.bf16.mxu0 %v10709_v31  ;;  %6690 = vmatprep.subr.bf16.mxu1 %v10710_v60 }
 0xb5c   :  { %v3214_v39 = vpop.f32.mrb[10].mxu0  ;;  %v3285_v15 = vpop.f32.mrb[10].mxu1 }
 0xb5d   :  { %v7275_v8 = vadd.f32 %v3214_v39, %v10711_v35  ;;  %v3216_v55 = vpop.f32.mrb[11].mxu0  ;;  %v3287_v48 = vpop.f32.mrb[11].mxu1  ;;  %v7291_v33 = vadd.f32 %v3285_v15, %v8341_v56 }
 0xb5e   :  { %v7276_v1 = vadd.f32 %v3216_v55, %v10218_v40  ;;  %v7292_v49 = vadd.f32 %v3287_v48, %v10219_v37 }
 0xb5f   :  { %v4684_v22 = vmul.f32 -1.442695, %v7275_v8 }
 0xb60   :  { %v4685_v3 = vmul.f32 -1.442695, %v7276_v1  ;;  %v4686_v5 = vmul.f32 -1.442695, %v7292_v49 }
 0xb61   :  { %7528 = vpow2.f32 %v4684_v22 }
 0xb62   :  { %7530 = vpow2.f32 %v4685_v3 }
 0xb63   :  { %7532 = vpow2.f32 %v4686_v5 }
 0xb64   :  { %7534 = vtanh.f32 %v7291_v33  ;;  %v10715_v33 = vld [vmem:[#allocation16_spill] sm:$0xff] }
 0xb6b   :  { %v7529_v31 = vpop.eup %7528 }
 0xb6c   :  { %v7531_v4 = vpop.eup %7530  ;;  %v3443_v60 = vadd.f32 1.0, %v7529_v31  ;;  %v10718_v31 = vld [vmem:[#allocation19_spill] sm:$0xff] }
 0xb6d   :  { %v3449_v50 = vadd.f32 1.0, %v7531_v4  ;;  %v7533_v39 = vpop.eup %7532  ;;  %v10714_v4 = vld [vmem:[#allocation15_spill] sm:$0xff] }
 0xb6e   :  { %7536 = vrcp.f32 %v3443_v60  ;;  %v7535_v35 = vpop.eup %7534  ;;  %v3456_v22 = vadd.f32 1.0, %v7533_v39  ;;  %v10717_v60 = vld [vmem:[#allocation18_spill] sm:$0xff]  ;;  %v10719_v39 = vld [vmem:[#allocation20_spill] sm:$0xff] }
 0xb6f   :  { %7538 = vrcp.f32 %v3449_v50  ;;  %v10713_v50 = vld [vmem:[#allocation14_spill] sm:$0xff] }
 0xb70   :  { %7540 = vrcp.f32 %v3456_v22  ;;  %v10723_v22 = vld [vmem:[#allocation24_spill] sm:$0xff] }
 0xb78   :  { %v7537_v55 = vpop.eup %7536 }
 0xb79   :  { %v7539_v8 = vpop.eup %7538  ;;  %v3460_v1 = vmul.f32 %v7537_v55, %v7535_v35  ;;  %v10716_v35 = vld [vmem:[#allocation17_spill] sm:$0xff] }
 0xb7a   :  { %v3459_v3 = vmul.f32 %v7539_v8, %v9106_v13  ;;  %v7541_v15 = vpop.eup %7540  ;;  %v10712_v13 = vld [vmem:[#allocation13_spill] sm:$0xff]  ;;  %v10721_v8 = vld [vmem:[#allocation22_spill] sm:$0xff] }
 0xb7b   :  { %v10720_v55 = vld [vmem:[#allocation21_spill] sm:$0xff] }
 0xb7c   :  { %v9292_v48 = vadd.f32 %v3460_v1, %v3459_v3  ;;  %v10722_v1 = vld [vmem:[#allocation23_spill] sm:$0xff]  ;;  %v10724_v3 = vld [vmem:[#allocation25_spill] sm:$0xff] }
 0xb7e   :  { %7542 = vtanh.f32 %v9292_v48 }
 0xb88   :  { %v7543_v49 = vpop.eup %7542 }
 0xb89   :  { %v9295_v5 = vmul.f32 %v7543_v49, %v7541_v15  ;;  %v10725_v15 = vld [vmem:[#allocation26_spill] sm:$0xff]  ;;  %v10726_v49 = vld [vmem:[#allocation27_spill] sm:$0xff] }
 0xb8b   :  { %3529 = vmatmul.mubr.f32.vlgmr.msra.gmra.mrb[26].mxu0 %v9295_v5  ;;  %3600 = vmatmul.mubr.f32.vlgmr.msra.gmra.mrb[26].mxu1 %v9295_v5 }
 0xb8c   :  { %6628 = vmatpush1.bf16.msra.mxu0 %v7779_v16  ;;  %6692 = vmatpush1.bf16.msra.mxu1 %v7783_v20 }
 0xb8d   :  { %6630 = vmatprep.subr.bf16.mxu0 %v7785_v21  ;;  %6694 = vmatprep.subr.bf16.mxu1 %v7789_v25 }
 0xb90   :  { %6632 = vmatpush1.bf16.msra.mxu0 %v7793_v29  ;;  %6696 = vmatpush1.bf16.msra.mxu1 %v7795_v30 }
 0xb91   :  { %6634 = vmatprep.subr.bf16.mxu0 %v7798_v34  ;;  %6698 = vmatprep.subr.bf16.mxu1 %v7800_v38 }
 0xb94   :  { %6636 = vmatpush1.bf16.msra.mxu0 %v7803_v42  ;;  %6700 = vmatpush1.bf16.msra.mxu1 %v7807_v46 }
 0xb95   :  { %6638 = vmatprep.subr.bf16.mxu0 %v7809_v47  ;;  %6702 = vmatprep.subr.bf16.mxu1 %v7812_v51 }
 0xb98   :  { %6640 = vmatpush1.bf16.msra.mxu0 %v7815_v57  ;;  %6704 = vmatpush1.bf16.msra.mxu1 %v7819_v58 }
 0xb99   :  { %6642 = vmatprep.subr.bf16.mxu0 %v7821_v59  ;;  %6706 = vmatprep.subr.bf16.mxu1 %v7824_v63 }
 0xb9c   :  { %6644 = vmatpush1.bf16.msra.mxu0 %v7827_v6  ;;  %6708 = vmatpush1.bf16.msra.mxu1 %v7831_v7 }
 0xb9d   :  { %6646 = vmatprep.subr.bf16.mxu0 %v7833_v9  ;;  %6710 = vmatprep.subr.bf16.mxu1 %v7836_v14 }
 0xba0   :  { %6648 = vmatpush1.bf16.msra.mxu0 %v7839_v23  ;;  %6712 = vmatpush1.bf16.msra.mxu1 %v7843_v24 }
 0xba1   :  { %6650 = vmatprep.subr.bf16.mxu0 %v7845_v26  ;;  %6714 = vmatprep.subr.bf16.mxu1 %v7848_v32 }
 0xba4   :  { %6652 = vmatpush1.bf16.msra.mxu0 %v7854_v41  ;;  %6716 = vmatpush1.bf16.msra.mxu1 %v7859_v44 }
 0xba5   :  { %6654 = vmatprep.subr.bf16.mxu0 %v7861_v45  ;;  %6718 = vmatprep.subr.bf16.mxu1 %v7864_v52 }
 0xba8   :  { %6656 = vmatpush1.bf16.msra.mxu0 %v7873_v61  ;;  %6720 = vmatpush1.bf16.msra.mxu1 %v7878_v0 }
 0xba9   :  { %6658 = vmatprep.subr.bf16.mxu0 %v7880_v2  ;;  %6722 = vmatprep.subr.bf16.mxu1 %v7886_v10 }
 0xbac   :  { %6660 = vmatpush1.bf16.msra.mxu0 %v10712_v13  ;;  %6724 = vmatpush1.bf16.msra.mxu1 %v10713_v50 }
 0xbad   :  { %6662 = vmatprep.subr.bf16.mxu0 %v10714_v4  ;;  %6726 = vmatprep.subr.bf16.mxu1 %v10715_v33  ;;  %v10744_v33 = vld [vmem:[#allocation142_spill] sm:$0xff] }
 0xbb0   :  { %6664 = vmatpush1.bf16.msra.mxu0 %v10716_v35  ;;  %6728 = vmatpush1.bf16.msra.mxu1 %v10717_v60  ;;  %v10727_v35 = vld [vmem:[#allocation28_spill] sm:$0xff]  ;;  %v10728_v60 = vld [vmem:[#allocation29_spill] sm:$0xff] }
 0xbb1   :  { %6666 = vmatprep.subr.bf16.mxu0 %v10718_v31  ;;  %6730 = vmatprep.subr.bf16.mxu1 %v10719_v39  ;;  %v10729_v31 = vld [vmem:[#allocation30_spill] sm:$0xff]  ;;  %v10730_v39 = vld [vmem:[#allocation31_spill] sm:$0xff] }
 0xbb4   :  { %6668 = vmatpush1.bf16.msra.mxu0 %v10720_v55  ;;  %6732 = vmatpush1.bf16.msra.mxu1 %v10721_v8  ;;  %v10731_v55 = vld [vmem:[#allocation32_spill] sm:$0xff]  ;;  %v10732_v8 = vld [vmem:[#allocation33_spill] sm:$0xff] }
 0xbb5   :  { %6670 = vmatprep.subr.bf16.mxu0 %v10722_v1  ;;  %6734 = vmatprep.subr.bf16.mxu1 %v10723_v22  ;;  %v10733_v1 = vld [vmem:[#allocation34_spill] sm:$0xff]  ;;  %v10734_v22 = vld [vmem:[#allocation35_spill] sm:$0xff] }
 0xbb8   :  { %6672 = vmatpush1.bf16.msra.mxu0 %v10724_v3  ;;  %6736 = vmatpush1.bf16.msra.mxu1 %v10725_v15  ;;  %v10735_v3 = vld [vmem:[#allocation36_spill] sm:$0xff]  ;;  %v10736_v15 = vld [vmem:[#allocation37_spill] sm:$0xff] }
 0xbb9   :  { %6674 = vmatprep.subr.bf16.mxu0 %v10726_v49  ;;  %6738 = vmatprep.subr.bf16.mxu1 %v10727_v35  ;;  %v10737_v49 = vld [vmem:[#allocation38_spill] sm:$0xff]  ;;  %v10738_v35 = vld [vmem:[#allocation39_spill] sm:$0xff] }
 0xbbc   :  { %6676 = vmatpush1.bf16.msra.mxu0 %v10728_v60  ;;  %6740 = vmatpush1.bf16.msra.mxu1 %v10729_v31  ;;  %v10739_v60 = vld [vmem:[#allocation40_spill] sm:$0xff]  ;;  %v10740_v31 = vld [vmem:[#allocation41_spill] sm:$0xff] }
 0xbbd   :  { %6678 = vmatprep.subr.bf16.mxu0 %v10730_v39  ;;  %6742 = vmatprep.subr.bf16.mxu1 %v10731_v55  ;;  %v10741_v39 = vld [vmem:[#allocation42_spill] sm:$0xff]  ;;  %v10742_v55 = vld [vmem:[#allocation43_spill] sm:$0xff] }
 0xbc0   :  { %6680 = vmatpush1.bf16.msra.mxu0 %v10732_v8  ;;  %6744 = vmatpush1.bf16.msra.mxu1 %v10733_v1  ;;  %v10743_v8 = vld [vmem:[#allocation44_spill] sm:$0xff] }
 0xbc1   :  { %6682 = vmatprep.subr.bf16.mxu0 %v10734_v22  ;;  %6746 = vmatprep.subr.bf16.mxu1 %v10735_v3 }
 0xbc4   :  { %6684 = vmatpush1.bf16.msra.mxu0 %v10736_v15  ;;  %6748 = vmatpush1.bf16.msra.mxu1 %v10737_v49 }
 0xbc5   :  { %6686 = vmatprep.subr.bf16.mxu0 %v10738_v35  ;;  %6750 = vmatprep.subr.bf16.mxu1 %v10739_v60 }
 0xbc8   :  { %6688 = vmatpush1.bf16.msra.mxu0 %v10740_v31  ;;  %6752 = vmatpush1.bf16.msra.mxu1 %v10741_v39 }
 0xbc9   :  { %6754 = vmatprep.subr.bf16.mxu0 %v10742_v55  ;;  %6818 = vmatprep.subr.bf16.mxu1 %v10743_v8 }
 0xc5e   :  { %v3530_v1 = vpop.f32.mrb[26].mxu0  ;;  %v3601_v22 = vpop.f32.mrb[26].mxu1 }
 0xc5f   :  { %v3606_v3 = vadd.f32 %v3530_v1, %v10744_v33  ;;  %v3532_v4 = vpop.f32.mrb[27].mxu0  ;;  %v3603_v15 = vpop.f32.mrb[27].mxu1  ;;  %v3608_v39 = vadd.f32 %v3601_v22, %v8435_v62  ;;  %v10751_v22 = vld [vmem:[#allocation59_spill] sm:$0xff] }
 0xc60   :  { %v3607_v49 = vadd.f32 %v3532_v4, %v8424_v43  ;;  %v3609_v31 = vadd.f32 %v3603_v15, %v10248_v17 }
 0xc61   :  { %v4687_v50 = vmul.f32 -1.442695, %v3606_v3 }
 0xc62   :  { %v4688_v35 = vmul.f32 -1.442695, %v3607_v49  ;;  %v4689_v60 = vmul.f32 -1.442695, %v3609_v31 }
 0xc63   :  { %7544 = vpow2.f32 %v4687_v50 }
 0xc64   :  { %7546 = vpow2.f32 %v4688_v35 }
 0xc65   :  { %7548 = vpow2.f32 %v4689_v60 }
 0xc66   :  { %7550 = vtanh.f32 %v3608_v39  ;;  %v10749_v39 = vld [vmem:[#allocation57_spill] sm:$0xff] }
 0xc6d   :  { %v7545_v55 = vpop.eup %7544 }
 0xc6e   :  { %v7547_v13 = vpop.eup %7546  ;;  %v3613_v8 = vadd.f32 1.0, %v7545_v55 }
 0xc6f   :  { %v3619_v10 = vadd.f32 1.0, %v7547_v13  ;;  %v7549_v1 = vpop.eup %7548  ;;  %v10747_v13 = vld [vmem:[#allocation55_spill] sm:$0xff] }
 0xc70   :  { %7552 = vrcp.f32 %v3613_v8  ;;  %v7551_v33 = vpop.eup %7550  ;;  %v3626_v50 = vadd.f32 1.0, %v7549_v1  ;;  %v10750_v8 = vld [vmem:[#allocation58_spill] sm:$0xff]  ;;  %v10752_v1 = vld [vmem:[#allocation60_spill] sm:$0xff] }
 0xc71   :  { %7554 = vrcp.f32 %v3619_v10  ;;  %v10745_v10 = vld [vmem:[#allocation53_spill] sm:$0xff] }
 0xc72   :  { %7556 = vrcp.f32 %v3626_v50  ;;  %v10756_v50 = vld [vmem:[#allocation64_spill] sm:$0xff] }
 0xc7a   :  { %v7553_v4 = vpop.eup %7552 }
 0xc7b   :  { %v7555_v3 = vpop.eup %7554  ;;  %v3630_v49 = vmul.f32 %v7553_v4, %v7551_v33  ;;  %v10748_v33 = vld [vmem:[#allocation56_spill] sm:$0xff]  ;;  %v10753_v4 = vld [vmem:[#allocation61_spill] sm:$0xff] }
 0xc7c   :  { %v3629_v35 = vmul.f32 %v7555_v3, %v9182_v11  ;;  %v7557_v31 = vpop.eup %7556  ;;  %v10746_v11 = vld [vmem:[#allocation54_spill] sm:$0xff] }
 0xc7d   :  { %v10754_v3 = vld [vmem:[#allocation62_spill] sm:$0xff] }
 0xc7e   :  { %v9368_v15 = vadd.f32 %v3630_v49, %v3629_v35  ;;  %v10755_v49 = vld [vmem:[#allocation63_spill] sm:$0xff]  ;;  %v10757_v35 = vld [vmem:[#allocation65_spill] sm:$0xff] }
 0xc80   :  { %7558 = vtanh.f32 %v9368_v15 }
 0xc8a   :  { %v7559_v55 = vpop.eup %7558 }
 0xc8b   :  { %v3633_v60 = vmul.f32 %v7559_v55, %v7557_v31  ;;  %v10758_v31 = vld [vmem:[#allocation66_spill] sm:$0xff]  ;;  %v10759_v55 = vld [vmem:[#allocation67_spill] sm:$0xff] }
 0xc8d   :  { %3698 = vmatprep.mubr.f32.mxu0 %v3633_v60  ;;  %3769 = vmatprep.mubr.f32.mxu1 %v3633_v60 }
 0xc8e   :  { %3699 = vmatmul.mubr.f32.vlgmr.msra.gmra.mrb[12].mxu0 %v9295_v5  ;;  %3770 = vmatmul.mubr.f32.vlgmr.msra.gmra.mrb[12].mxu1 %v9295_v5 }
 0xc8f   :  { %6756 = vmatpush1.bf16.msra.mxu0 %v10125_v53  ;;  %6820 = vmatpush1.bf16.msra.mxu1 %v10126_v54 }
 0xc90   :  { %3840 = vmatprep.mubr.f32.mxu0 %v3633_v60  ;;  %3911 = vmatprep.mubr.f32.mxu1 %v3633_v60  ;;  %v10760_v60 = vld [vmem:[#allocation68_spill] sm:$0xff] }
 0xc91   :  { %6758 = vmatprep.subr.bf16.mxu0 %v10127_v12  ;;  %6822 = vmatprep.subr.bf16.mxu1 %v10128_v18 }
 0xc93   :  { %6760 = vmatpush1.bf16.msra.mxu0 %v10249_v36  ;;  %6824 = vmatpush1.bf16.msra.mxu1 %v10373_v28 }
 0xc94   :  { %6762 = vmatprep.subr.bf16.mxu0 %v10497_v27  ;;  %6826 = vmatprep.subr.bf16.mxu1 %v10621_v19 }
 0xc97   :  { %6764 = vmatpush1.bf16.msra.mxu0 %v10745_v10  ;;  %6828 = vmatpush1.bf16.msra.mxu1 %v10746_v11 }
 0xc98   :  { %6766 = vmatprep.subr.bf16.mxu0 %v10747_v13  ;;  %6830 = vmatprep.subr.bf16.mxu1 %v10748_v33 }
 0xc9b   :  { %6768 = vmatpush1.bf16.msra.mxu0 %v10749_v39  ;;  %6832 = vmatpush1.bf16.msra.mxu1 %v10750_v8  ;;  %v10761_v8 = vld [vmem:[#allocation69_spill] sm:$0xff] }
 0xc9c   :  { %6770 = vmatprep.subr.bf16.mxu0 %v10751_v22  ;;  %6834 = vmatprep.subr.bf16.mxu1 %v10752_v1  ;;  %v10762_v22 = vld [vmem:[#allocation70_spill] sm:$0xff]  ;;  %v10763_v1 = vld [vmem:[#allocation71_spill] sm:$0xff] }
 0xc9f   :  { %6772 = vmatpush1.bf16.msra.mxu0 %v10753_v4  ;;  %6836 = vmatpush1.bf16.msra.mxu1 %v10754_v3  ;;  %v10764_v4 = vld [vmem:[#allocation72_spill] sm:$0xff]  ;;  %v10765_v3 = vld [vmem:[#allocation73_spill] sm:$0xff] }
 0xca0   :  { %6774 = vmatprep.subr.bf16.mxu0 %v10755_v49  ;;  %6838 = vmatprep.subr.bf16.mxu1 %v10756_v50  ;;  %v10766_v49 = vld [vmem:[#allocation74_spill] sm:$0xff]  ;;  %v10767_v50 = vld [vmem:[#allocation75_spill] sm:$0xff] }
 0xca3   :  { %6776 = vmatpush1.bf16.msra.mxu0 %v10757_v35  ;;  %6840 = vmatpush1.bf16.msra.mxu1 %v10758_v31  ;;  %v10768_v35 = vld [vmem:[#allocation76_spill] sm:$0xff]  ;;  %v10769_v31 = vld [vmem:[#allocation77_spill] sm:$0xff] }
 0xca4   :  { %6778 = vmatprep.subr.bf16.mxu0 %v10759_v55  ;;  %6842 = vmatprep.subr.bf16.mxu1 %v10760_v60  ;;  %v10770_v55 = vld [vmem:[#allocation78_spill] sm:$0xff]  ;;  %v10771_v60 = vld [vmem:[#allocation79_spill] sm:$0xff] }
 0xca7   :  { %6780 = vmatpush1.bf16.msra.mxu0 %v10761_v8  ;;  %6844 = vmatpush1.bf16.msra.mxu1 %v10762_v22  ;;  %v10772_v8 = vld [vmem:[#allocation80_spill] sm:$0xff]  ;;  %v10773_v22 = vld [vmem:[#allocation81_spill] sm:$0xff] }
 0xca8   :  { %6782 = vmatprep.subr.bf16.mxu0 %v10763_v1  ;;  %6846 = vmatprep.subr.bf16.mxu1 %v10764_v4  ;;  %v10774_v1 = vld [vmem:[#allocation82_spill] sm:$0xff]  ;;  %v10775_v4 = vld [vmem:[#allocation83_spill] sm:$0xff] }
 0xcab   :  { %6784 = vmatpush1.bf16.msra.mxu0 %v10765_v3  ;;  %6848 = vmatpush1.bf16.msra.mxu1 %v10766_v49  ;;  %v10776_v3 = vld [vmem:[#allocation84_spill] sm:$0xff]  ;;  %v10777_v49 = vld [vmem:[#allocation85_spill] sm:$0xff] }
 0xcac   :  { %6786 = vmatprep.subr.bf16.mxu0 %v10767_v50  ;;  %6850 = vmatprep.subr.bf16.mxu1 %v10768_v35  ;;  %v10778_v50 = vld [vmem:[#allocation86_spill] sm:$0xff]  ;;  %v10779_v35 = vld [vmem:[#allocation87_spill] sm:$0xff] }
 0xcaf   :  { %6788 = vmatpush1.bf16.msra.mxu0 %v10769_v31  ;;  %6852 = vmatpush1.bf16.msra.mxu1 %v10770_v55  ;;  %v10780_v31 = vld [vmem:[#allocation88_spill] sm:$0xff]  ;;  %v10781_v55 = vld [vmem:[#allocation89_spill] sm:$0xff] }
 0xcb0   :  { %6790 = vmatprep.subr.bf16.mxu0 %v10771_v60  ;;  %6854 = vmatprep.subr.bf16.mxu1 %v10772_v8  ;;  %v10782_v60 = vld [vmem:[#allocation90_spill] sm:$0xff]  ;;  %v10783_v8 = vld [vmem:[#allocation91_spill] sm:$0xff] }
 0xcb3   :  { %6792 = vmatpush1.bf16.msra.mxu0 %v10773_v22  ;;  %6856 = vmatpush1.bf16.msra.mxu1 %v10774_v1  ;;  %v10784_v22 = vld [vmem:[#allocation92_spill] sm:$0xff]  ;;  %v10785_v1 = vld [vmem:[#allocation93_spill] sm:$0xff] }
 0xcb4   :  { %6794 = vmatprep.subr.bf16.mxu0 %v10775_v4  ;;  %6858 = vmatprep.subr.bf16.mxu1 %v10776_v3  ;;  %v10786_v4 = vld [vmem:[#allocation94_spill] sm:$0xff]  ;;  %v10787_v3 = vld [vmem:[#allocation95_spill] sm:$0xff] }
 0xcb7   :  { %6796 = vmatpush1.bf16.msra.mxu0 %v10777_v49  ;;  %6860 = vmatpush1.bf16.msra.mxu1 %v10778_v50  ;;  %v10788_v49 = vld [vmem:[#allocation96_spill] sm:$0xff]  ;;  %v10789_v50 = vld [vmem:[#allocation97_spill] sm:$0xff] }
 0xcb8   :  { %6798 = vmatprep.subr.bf16.mxu0 %v10779_v35  ;;  %6862 = vmatprep.subr.bf16.mxu1 %v10780_v31  ;;  %v10790_v35 = vld [vmem:[#allocation98_spill] sm:$0xff]  ;;  %v10791_v31 = vld [vmem:[#allocation99_spill] sm:$0xff] }
 0xcbb   :  { %6800 = vmatpush1.bf16.msra.mxu0 %v10781_v55  ;;  %6864 = vmatpush1.bf16.msra.mxu1 %v10782_v60  ;;  %v10792_v55 = vld [vmem:[#allocation100_spill] sm:$0xff]  ;;  %v10793_v60 = vld [vmem:[#allocation101_spill] sm:$0xff] }
 0xcbc   :  { %6802 = vmatprep.subr.bf16.mxu0 %v10783_v8  ;;  %6866 = vmatprep.subr.bf16.mxu1 %v10784_v22  ;;  %v10794_v8 = vld [vmem:[#allocation102_spill] sm:$0xff]  ;;  %v10795_v22 = vld [vmem:[#allocation103_spill] sm:$0xff] }
 0xcbf   :  { %6804 = vmatpush1.bf16.msra.mxu0 %v10785_v1  ;;  %6868 = vmatpush1.bf16.msra.mxu1 %v10786_v4  ;;  %v10796_v1 = vld [vmem:[#allocation104_spill] sm:$0xff]  ;;  %v10797_v4 = vld [vmem:[#allocation105_spill] sm:$0xff] }
 0xcc0   :  { %6806 = vmatprep.subr.bf16.mxu0 %v10787_v3  ;;  %6870 = vmatprep.subr.bf16.mxu1 %v10788_v49  ;;  %v10798_v3 = vld [vmem:[#allocation106_spill] sm:$0xff]  ;;  %v10799_v49 = vld [vmem:[#allocation107_spill] sm:$0xff] }
 0xcc3   :  { %6808 = vmatpush1.bf16.msra.mxu0 %v10789_v50  ;;  %6872 = vmatpush1.bf16.msra.mxu1 %v10790_v35  ;;  %v10800_v50 = vld [vmem:[#allocation108_spill] sm:$0xff]  ;;  %v10834_v35 = vld [vmem:[#allocation139_spill] sm:$0xff] }
 0xcc4   :  { %6810 = vmatprep.subr.bf16.mxu0 %v10791_v31  ;;  %6874 = vmatprep.subr.bf16.mxu1 %v10792_v55  ;;  %v10801_v55 = vld [vmem:[#allocation109_spill] sm:$0xff]  ;;  %v10815_v31 = vld [vmem:[#allocation122_spill] sm:$0xff] }
 0xcc7   :  { %6812 = vmatpush1.bf16.msra.mxu0 %v10793_v60  ;;  %6876 = vmatpush1.bf16.msra.mxu1 %v10794_v8  ;;  %v10802_v60 = vld [vmem:[#allocation110_spill] sm:$0xff]  ;;  %v10803_v8 = vld [vmem:[#allocation111_spill] sm:$0xff] }
 0xcc8   :  { %6814 = vmatprep.subr.bf16.mxu0 %v10795_v22  ;;  %6878 = vmatprep.subr.bf16.mxu1 %v10796_v1  ;;  %v10804_v22 = vld [vmem:[#allocation112_spill] sm:$0xff]  ;;  %v10805_v1 = vmov 0.0  }
 0xccb   :  { %6816 = vmatpush1.bf16.msra.mxu0 %v10797_v4  ;;  %6880 = vmatpush1.bf16.msra.mxu1 %v10798_v3  ;;  %v10806_v3 = vld [vmem:[#allocation113_spill] sm:$0xff]  ;;  %v10809_v4 = vld [vmem:[#allocation116_spill] sm:$0xff] }
 0xccc   :  { %6882 = vmatprep.subr.bf16.mxu0 %v10799_v49  ;;  %6914 = vmatprep.subr.bf16.mxu1 %v10800_v50  ;;  %v10807_v49 = vld [vmem:[#allocation114_spill] sm:$0xff]  ;;  %v10808_v50 = vld [vmem:[#allocation115_spill] sm:$0xff] }
 0xcce   :  { %3841 = vmatmul.mubr.f32.vlgmr.msra.gmra.mrb[28].mxu0 %v9295_v5  ;;  %3912 = vmatmul.mubr.f32.vlgmr.msra.gmra.mrb[28].mxu1 %v9295_v5  ;;  %v10810_v5 = vld [vmem:[#allocation117_spill] sm:$0xff] }
 0xccf   :  { %6884 = vmatpush1.bf16.msra.mxu0 %v10801_v55  ;;  %6916 = vmatpush1.bf16.msra.mxu1 %v10802_v60  ;;  %v10811_v55 = vld [vmem:[#allocation118_spill] sm:$0xff]  ;;  %v10812_v60 = vld [vmem:[#allocation119_spill] sm:$0xff] }
 0xcd0   :  { %6886 = vmatprep.subr.bf16.mxu0 %v10803_v8  ;;  %6918 = vmatprep.subr.bf16.mxu1 %v10804_v22  ;;  %v10813_v8 = vld [vmem:[#allocation120_spill] sm:$0xff]  ;;  %v10814_v22 = vld [vmem:[#allocation121_spill] sm:$0xff] }
 0xcd1   :  { %4014 = vmatprep.mubr.f32.mxu0 %v10805_v1  ;;  %4085 = vmatprep.mubr.f32.mxu1 %v10805_v1  ;;  %v10816_v1 = vld [vmem:[#allocation123_spill] sm:$0xff] }
 0xcd3   :  { %6888 = vmatpush1.bf16.msra.mxu0 %v10806_v3  ;;  %6920 = vmatpush1.bf16.msra.mxu1 %v10807_v49  ;;  %v10817_v3 = vld [vmem:[#allocation124_spill] sm:$0xff]  ;;  %v10818_v49 = vld [vmem:[#allocation125_spill] sm:$0xff] }
 0xcd4   :  { %6890 = vmatprep.subr.bf16.mxu0 %v10808_v50  ;;  %6922 = vmatprep.subr.bf16.mxu1 %v10809_v4  ;;  %v10819_v50 = vld [vmem:[#allocation126_spill] sm:$0xff]  ;;  %v10820_v4 = vld [vmem:[#allocation127_spill] sm:$0xff] }
 0xcd7   :  { %6892 = vmatpush1.bf16.msra.mxu0 %v10810_v5  ;;  %6924 = vmatpush1.bf16.msra.mxu1 %v10811_v55  ;;  %v10821_v5 = vld [vmem:[#allocation128_spill] sm:$0xff]  ;;  %v10822_v55 = vld [vmem:[#allocation129_spill] sm:$0xff] }
 0xcd8   :  { %6894 = vmatprep.subr.bf16.mxu0 %v10812_v60  ;;  %6926 = vmatprep.subr.bf16.mxu1 %v10813_v8  ;;  %v10823_v60 = vld [vmem:[#allocation130_spill] sm:$0xff]  ;;  %v10824_v8 = vld [vmem:[#allocation131_spill] sm:$0xff] }
 0xcdb   :  { %6896 = vmatpush1.bf16.msra.mxu0 %v10814_v22  ;;  %6928 = vmatpush1.bf16.msra.mxu1 %v10815_v31  ;;  %v10825_v22 = vld [vmem:[#allocation132_spill] sm:$0xff]  ;;  %v10826_v31 = vld [vmem:[#allocation133_spill] sm:$0xff] }
 0xcdc   :  { %6898 = vmatprep.subr.bf16.mxu0 %v10816_v1  ;;  %6930 = vmatprep.subr.bf16.mxu1 %v10817_v3  ;;  %v10827_v1 = vld [vmem:[#allocation134_spill] sm:$0xff]  ;;  %v10828_v3 = vld [vmem:[#allocation135_spill] sm:$0xff] }
 0xcdf   :  { %6900 = vmatpush1.bf16.msra.mxu0 %v10818_v49  ;;  %6932 = vmatpush1.bf16.msra.mxu1 %v10819_v50  ;;  %v10829_v49 = vld [vmem:[#allocation136_spill] sm:$0xff]  ;;  %v10830_v50 = vld [vmem:[#allocation137_spill] sm:$0xff] }
 0xce0   :  { %6902 = vmatprep.subr.bf16.mxu0 %v10820_v4  ;;  %6934 = vmatprep.subr.bf16.mxu1 %v10821_v5  ;;  %v10831_v4 = vld [vmem:[#allocation138_spill] sm:$0xff] }
 0xce1   :  { %v10832_v5 = vld [vmem:[#allocation10_spill] sm:$0xff] }
 0xce3   :  { %6904 = vmatpush1.bf16.msra.mxu0 %v10822_v55  ;;  %6936 = vmatpush1.bf16.msra.mxu1 %v10823_v60  ;;  %v10833_v55 = vld [vmem:[#allocation11_spill] sm:$0xff] }
 0xce4   :  { %6906 = vmatprep.subr.bf16.mxu0 %v10824_v8  ;;  %6938 = vmatprep.subr.bf16.mxu1 %v10825_v22 }
 0xce7   :  { %6908 = vmatpush1.bf16.msra.mxu0 %v10826_v31  ;;  %6940 = vmatpush1.bf16.msra.mxu1 %v10827_v1 }
 0xce8   :  { %6910 = vmatprep.subr.bf16.mxu0 %v10828_v3  ;;  %6942 = vmatprep.subr.bf16.mxu1 %v10829_v49 }
 0xceb   :  { %6912 = vmatpush1.bf16.msra.mxu0 %v10830_v50  ;;  %6944 = vmatpush1.bf16.msra.mxu1 %v10831_v4 }
 0xcec   :  { %6946 = vmatprep.subr.bf16.mxu0 %v10832_v5  ;;  %7010 = vmatprep.subr.bf16.mxu1 %v10833_v55 }
 0xd61   :  { %v3700_v60 = vpop.f32.mrb[12].mxu0  ;;  %v3771_v8 = vpop.f32.mrb[12].mxu1 }
 0xd62   :  { %v7277_v22 = vadd.f32 %v3700_v60, %v10834_v35  ;;  %v3702_v39 = vpop.f32.mrb[13].mxu0  ;;  %v3773_v31 = vpop.f32.mrb[13].mxu1  ;;  %v7293_v4 = vadd.f32 %v3771_v8, %v8341_v56 }
 0xd63   :  { %v7278_v1 = vadd.f32 %v3702_v39, %v10218_v40  ;;  %v7294_v50 = vadd.f32 %v3773_v31, %v10219_v37 }
 0xd64   :  { %v4690_v33 = vmul.f32 -1.442695, %v7277_v22 }
 0xd65   :  { %v4691_v3 = vmul.f32 -1.442695, %v7278_v1  ;;  %v4692_v49 = vmul.f32 -1.442695, %v7294_v50 }
 0xd66   :  { %7560 = vpow2.f32 %v4690_v33 }
 0xd67   :  { %7562 = vpow2.f32 %v4691_v3 }
 0xd68   :  { %7564 = vpow2.f32 %v4692_v49 }
 0xd69   :  { %7566 = vtanh.f32 %v7293_v4 }
 0xd70   :  { %v7561_v5 = vpop.eup %7560 }
 0xd71   :  { %v7563_v13 = vpop.eup %7562  ;;  %v3929_v55 = vadd.f32 1.0, %v7561_v5 }
 0xd72   :  { %v3935_v11 = vadd.f32 1.0, %v7563_v13  ;;  %v7565_v60 = vpop.eup %7564 }
 0xd73   :  { %7568 = vrcp.f32 %v3929_v55  ;;  %v7567_v35 = vpop.eup %7566  ;;  %v3942_v33 = vadd.f32 1.0, %v7565_v60 }
 0xd74   :  { %7570 = vrcp.f32 %v3935_v11  ;;  %v10867_v11 = vld [vmem:[#allocation44_spill] sm:$0xff] }
 0xd75   :  { %7572 = vrcp.f32 %v3942_v33 }
 0xd7d   :  { %v7569_v39 = vpop.eup %7568 }
 0xd7e   :  { %v7571_v22 = vpop.eup %7570  ;;  %v3946_v1 = vmul.f32 %v7569_v39, %v7567_v35  ;;  %v10868_v35 = vld [vmem:[#allocation142_spill] sm:$0xff] }
 0xd7f   :  { %v3945_v3 = vmul.f32 %v7571_v22, %v9292_v48  ;;  %v7573_v8 = vpop.eup %7572  ;;  %v10866_v48 = vld [vmem:[#allocation43_spill] sm:$0xff] }
 0xd81   :  { %v9478_v31 = vadd.f32 %v3946_v1, %v3945_v3 }
 0xd83   :  { %7574 = vtanh.f32 %v9478_v31 }
 0xd8d   :  { %v7575_v50 = vpop.eup %7574 }
 0xd8e   :  { %v9481_v49 = vmul.f32 %v7575_v50, %v7573_v8 }
 0xd90   :  { %4015 = vmatmul.mubr.f32.vlgmr.msra.gmra.mrb[28].mxu0 %v9481_v49  ;;  %4086 = vmatmul.mubr.f32.vlgmr.msra.gmra.mrb[28].mxu1 %v9481_v49 }
 0xd91   :  { %6948 = vmatpush1.bf16.msra.mxu0 %v7779_v16  ;;  %7012 = vmatpush1.bf16.msra.mxu1 %v7783_v20  ;;  %v10835_v16 = vld [vmem:[#allocation12_spill] sm:$0xff]  ;;  %v10836_v20 = vld [vmem:[#allocation13_spill] sm:$0xff] }
 0xd92   :  { %6950 = vmatprep.subr.bf16.mxu0 %v7785_v21  ;;  %7014 = vmatprep.subr.bf16.mxu1 %v7789_v25  ;;  %v10837_v21 = vld [vmem:[#allocation14_spill] sm:$0xff]  ;;  %v10838_v25 = vld [vmem:[#allocation15_spill] sm:$0xff] }
 0xd95   :  { %6952 = vmatpush1.bf16.msra.mxu0 %v7793_v29  ;;  %7016 = vmatpush1.bf16.msra.mxu1 %v7795_v30  ;;  %v10839_v29 = vld [vmem:[#allocation16_spill] sm:$0xff]  ;;  %v10840_v30 = vld [vmem:[#allocation17_spill] sm:$0xff] }
 0xd96   :  { %6954 = vmatprep.subr.bf16.mxu0 %v7798_v34  ;;  %7018 = vmatprep.subr.bf16.mxu1 %v7800_v38  ;;  %v10841_v34 = vld [vmem:[#allocation18_spill] sm:$0xff]  ;;  %v10842_v38 = vld [vmem:[#allocation19_spill] sm:$0xff] }
 0xd99   :  { %6956 = vmatpush1.bf16.msra.mxu0 %v7803_v42  ;;  %7020 = vmatpush1.bf16.msra.mxu1 %v7807_v46  ;;  %v10843_v42 = vld [vmem:[#allocation20_spill] sm:$0xff]  ;;  %v10844_v46 = vld [vmem:[#allocation21_spill] sm:$0xff] }
 0xd9a   :  { %6958 = vmatprep.subr.bf16.mxu0 %v7809_v47  ;;  %7022 = vmatprep.subr.bf16.mxu1 %v7812_v51  ;;  %v10845_v47 = vld [vmem:[#allocation22_spill] sm:$0xff]  ;;  %v10846_v51 = vld [vmem:[#allocation23_spill] sm:$0xff] }
 0xd9d   :  { %6960 = vmatpush1.bf16.msra.mxu0 %v7815_v57  ;;  %7024 = vmatpush1.bf16.msra.mxu1 %v7819_v58  ;;  %v10847_v57 = vld [vmem:[#allocation24_spill] sm:$0xff]  ;;  %v10848_v58 = vld [vmem:[#allocation25_spill] sm:$0xff] }
 0xd9e   :  { %6962 = vmatprep.subr.bf16.mxu0 %v7821_v59  ;;  %7026 = vmatprep.subr.bf16.mxu1 %v7824_v63  ;;  %v10849_v59 = vld [vmem:[#allocation26_spill] sm:$0xff]  ;;  %v10850_v63 = vld [vmem:[#allocation27_spill] sm:$0xff] }
 0xda1   :  { %6964 = vmatpush1.bf16.msra.mxu0 %v7827_v6  ;;  %7028 = vmatpush1.bf16.msra.mxu1 %v7831_v7  ;;  %v10851_v6 = vld [vmem:[#allocation28_spill] sm:$0xff]  ;;  %v10852_v7 = vld [vmem:[#allocation29_spill] sm:$0xff] }
 0xda2   :  { %6966 = vmatprep.subr.bf16.mxu0 %v7833_v9  ;;  %7030 = vmatprep.subr.bf16.mxu1 %v7836_v14  ;;  %v10853_v9 = vld [vmem:[#allocation30_spill] sm:$0xff]  ;;  %v10854_v14 = vld [vmem:[#allocation31_spill] sm:$0xff] }
 0xda5   :  { %6968 = vmatpush1.bf16.msra.mxu0 %v7839_v23  ;;  %7032 = vmatpush1.bf16.msra.mxu1 %v7843_v24  ;;  %v10855_v23 = vld [vmem:[#allocation32_spill] sm:$0xff]  ;;  %v10856_v24 = vld [vmem:[#allocation33_spill] sm:$0xff] }
 0xda6   :  { %6970 = vmatprep.subr.bf16.mxu0 %v7845_v26  ;;  %7034 = vmatprep.subr.bf16.mxu1 %v7848_v32  ;;  %v10857_v26 = vld [vmem:[#allocation34_spill] sm:$0xff]  ;;  %v10858_v32 = vld [vmem:[#allocation35_spill] sm:$0xff] }
 0xda9   :  { %6972 = vmatpush1.bf16.msra.mxu0 %v7854_v41  ;;  %7036 = vmatpush1.bf16.msra.mxu1 %v7859_v44  ;;  %v10859_v41 = vld [vmem:[#allocation36_spill] sm:$0xff]  ;;  %v10860_v44 = vld [vmem:[#allocation37_spill] sm:$0xff] }
 0xdaa   :  { %6974 = vmatprep.subr.bf16.mxu0 %v7861_v45  ;;  %7038 = vmatprep.subr.bf16.mxu1 %v7864_v52  ;;  %v10861_v45 = vld [vmem:[#allocation38_spill] sm:$0xff]  ;;  %v10862_v52 = vld [vmem:[#allocation39_spill] sm:$0xff] }
 0xdad   :  { %6976 = vmatpush1.bf16.msra.mxu0 %v7873_v61  ;;  %7040 = vmatpush1.bf16.msra.mxu1 %v7878_v0  ;;  %v10863_v61 = vld [vmem:[#allocation40_spill] sm:$0xff]  ;;  %v10864_v0 = vld [vmem:[#allocation41_spill] sm:$0xff] }
 0xdae   :  { %6978 = vmatprep.subr.bf16.mxu0 %v7880_v2  ;;  %7042 = vmatprep.subr.bf16.mxu1 %v10835_v16  ;;  %v10865_v2 = vld [vmem:[#allocation42_spill] sm:$0xff] }
 0xdb1   :  { %6980 = vmatpush1.bf16.msra.mxu0 %v10836_v20  ;;  %7044 = vmatpush1.bf16.msra.mxu1 %v10837_v21 }
 0xdb2   :  { %6982 = vmatprep.subr.bf16.mxu0 %v10838_v25  ;;  %7046 = vmatprep.subr.bf16.mxu1 %v10839_v29 }
 0xdb5   :  { %6984 = vmatpush1.bf16.msra.mxu0 %v10840_v30  ;;  %7048 = vmatpush1.bf16.msra.mxu1 %v10841_v34 }
 0xdb6   :  { %6986 = vmatprep.subr.bf16.mxu0 %v10842_v38  ;;  %7050 = vmatprep.subr.bf16.mxu1 %v10843_v42 }
 0xdb9   :  { %6988 = vmatpush1.bf16.msra.mxu0 %v10844_v46  ;;  %7052 = vmatpush1.bf16.msra.mxu1 %v10845_v47 }
 0xdba   :  { %6990 = vmatprep.subr.bf16.mxu0 %v10846_v51  ;;  %7054 = vmatprep.subr.bf16.mxu1 %v10847_v57 }
 0xdbd   :  { %6992 = vmatpush1.bf16.msra.mxu0 %v10848_v58  ;;  %7056 = vmatpush1.bf16.msra.mxu1 %v10849_v59  ;;  %v10872_v59 = vld [vmem:[#allocation57_spill] sm:$0xff] }
 0xdbe   :  { %6994 = vmatprep.subr.bf16.mxu0 %v10850_v63  ;;  %7058 = vmatprep.subr.bf16.mxu1 %v10851_v6  ;;  %v10880_v63 = vld [vmem:[#allocation65_spill] sm:$0xff]  ;;  %v10881_v6 = vld [vmem:[#allocation66_spill] sm:$0xff] }
 0xdc1   :  { %6996 = vmatpush1.bf16.msra.mxu0 %v10852_v7  ;;  %7060 = vmatpush1.bf16.msra.mxu1 %v10853_v9  ;;  %v10882_v7 = vld [vmem:[#allocation67_spill] sm:$0xff]  ;;  %v10883_v9 = vld [vmem:[#allocation68_spill] sm:$0xff] }
 0xdc2   :  { %6998 = vmatprep.subr.bf16.mxu0 %v10854_v14  ;;  %7062 = vmatprep.subr.bf16.mxu1 %v10855_v23  ;;  %v10884_v14 = vld [vmem:[#allocation69_spill] sm:$0xff]  ;;  %v10885_v23 = vld [vmem:[#allocation70_spill] sm:$0xff] }
 0xdc5   :  { %7000 = vmatpush1.bf16.msra.mxu0 %v10856_v24  ;;  %7064 = vmatpush1.bf16.msra.mxu1 %v10857_v26  ;;  %v10886_v24 = vld [vmem:[#allocation71_spill] sm:$0xff]  ;;  %v10887_v26 = vld [vmem:[#allocation72_spill] sm:$0xff] }
 0xdc6   :  { %7002 = vmatprep.subr.bf16.mxu0 %v10858_v32  ;;  %7066 = vmatprep.subr.bf16.mxu1 %v10859_v41  ;;  %v10888_v32 = vld [vmem:[#allocation73_spill] sm:$0xff]  ;;  %v10889_v41 = vld [vmem:[#allocation74_spill] sm:$0xff] }
 0xdc9   :  { %7004 = vmatpush1.bf16.msra.mxu0 %v10860_v44  ;;  %7068 = vmatpush1.bf16.msra.mxu1 %v10861_v45  ;;  %v10890_v44 = vld [vmem:[#allocation75_spill] sm:$0xff]  ;;  %v10891_v45 = vld [vmem:[#allocation76_spill] sm:$0xff] }
 0xdca   :  { %7006 = vmatprep.subr.bf16.mxu0 %v10862_v52  ;;  %7070 = vmatprep.subr.bf16.mxu1 %v10863_v61  ;;  %v10892_v52 = vld [vmem:[#allocation77_spill] sm:$0xff]  ;;  %v10893_v61 = vld [vmem:[#allocation78_spill] sm:$0xff] }
 0xdcd   :  { %7008 = vmatpush1.bf16.msra.mxu0 %v10864_v0  ;;  %7072 = vmatpush1.bf16.msra.mxu1 %v10865_v2  ;;  %v10894_v0 = vld [vmem:[#allocation79_spill] sm:$0xff]  ;;  %v10895_v2 = vld [vmem:[#allocation80_spill] sm:$0xff] }
 0xdce   :  { %7074 = vmatprep.subr.bf16.mxu0 %v10866_v48  ;;  %7138 = vmatprep.subr.bf16.mxu1 %v10867_v11  ;;  %v10896_v48 = vld [vmem:[#allocation81_spill] sm:$0xff]  ;;  %v10897_v11 = vld [vmem:[#allocation82_spill] sm:$0xff] }
 0xe63   :  { %v4016_v13 = vpop.f32.mrb[28].mxu0  ;;  %v4087_v4 = vpop.f32.mrb[28].mxu1 }
 0xe64   :  { %v4092_v5 = vadd.f32 %v4016_v13, %v10868_v35  ;;  %v4018_v55 = vpop.f32.mrb[29].mxu0  ;;  %v4089_v60 = vpop.f32.mrb[29].mxu1  ;;  %v4094_v8 = vadd.f32 %v4087_v4, %v8435_v62  ;;  %v10898_v13 = vld [vmem:[#allocation83_spill] sm:$0xff]  ;;  %v10899_v4 = vld [vmem:[#allocation84_spill] sm:$0xff] }
 0xe65   :  { %v4093_v39 = vadd.f32 %v4018_v55, %v8424_v43  ;;  %v4095_v33 = vadd.f32 %v4089_v60, %v10248_v17  ;;  %v10901_v55 = vld [vmem:[#allocation86_spill] sm:$0xff]  ;;  %v10902_v60 = vld [vmem:[#allocation87_spill] sm:$0xff] }
 0xe66   :  { %v4693_v22 = vmul.f32 -1.442695, %v4092_v5  ;;  %v10900_v5 = vld [vmem:[#allocation85_spill] sm:$0xff] }
 0xe67   :  { %v4694_v1 = vmul.f32 -1.442695, %v4093_v39  ;;  %v4695_v3 = vmul.f32 -1.442695, %v4095_v33  ;;  %v10903_v39 = vld [vmem:[#allocation88_spill] sm:$0xff]  ;;  %v10906_v33 = vld [vmem:[#allocation91_spill] sm:$0xff] }
 0xe68   :  { %7576 = vpow2.f32 %v4693_v22  ;;  %v10904_v22 = vld [vmem:[#allocation89_spill] sm:$0xff] }
 0xe69   :  { %7578 = vpow2.f32 %v4694_v1  ;;  %v10905_v1 = vld [vmem:[#allocation90_spill] sm:$0xff] }
 0xe6a   :  { %7580 = vpow2.f32 %v4695_v3  ;;  %v10907_v3 = vld [vmem:[#allocation92_spill] sm:$0xff] }
 0xe6b   :  { %7582 = vtanh.f32 %v4094_v8  ;;  %v10908_v8 = vld [vmem:[#allocation93_spill] sm:$0xff] }
 0xe72   :  { %v7577_v50 = vpop.eup %7576 }
 0xe73   :  { %v7579_v16 = vpop.eup %7578  ;;  %v4099_v20 = vadd.f32 1.0, %v7577_v50  ;;  %v10909_v50 = vld [vmem:[#allocation94_spill] sm:$0xff] }
 0xe74   :  { %v4105_v21 = vadd.f32 1.0, %v7579_v16  ;;  %v7581_v25 = vpop.eup %7580  ;;  %v10910_v16 = vld [vmem:[#allocation95_spill] sm:$0xff] }
 0xe75   :  { %7584 = vrcp.f32 %v4099_v20  ;;  %v7583_v29 = vpop.eup %7582  ;;  %v4112_v42 = vadd.f32 1.0, %v7581_v25  ;;  %v10911_v20 = vld [vmem:[#allocation96_spill] sm:$0xff]  ;;  %v10913_v25 = vld [vmem:[#allocation98_spill] sm:$0xff] }
 0xe76   :  { %7586 = vrcp.f32 %v4105_v21  ;;  %v10912_v21 = vld [vmem:[#allocation97_spill] sm:$0xff] }
 0xe77   :  { %7588 = vrcp.f32 %v4112_v42  ;;  %v10918_v42 = vld [vmem:[#allocation103_spill] sm:$0xff] }
 0xe7f   :  { %v7585_v30 = vpop.eup %7584 }
 0xe80   :  { %v7587_v34 = vpop.eup %7586  ;;  %v4116_v38 = vmul.f32 %v7585_v30, %v7583_v29  ;;  %v10914_v29 = vld [vmem:[#allocation99_spill] sm:$0xff]  ;;  %v10915_v30 = vld [vmem:[#allocation100_spill] sm:$0xff] }
 0xe81   :  { %v4115_v46 = vmul.f32 %v7587_v34, %v9368_v15  ;;  %v7589_v51 = vpop.eup %7588  ;;  %v10869_v15 = vld [vmem:[#allocation54_spill] sm:$0xff]  ;;  %v10916_v34 = vld [vmem:[#allocation101_spill] sm:$0xff] }
 0xe83   :  { %v9554_v47 = vadd.f32 %v4116_v38, %v4115_v46  ;;  %v10917_v38 = vld [vmem:[#allocation102_spill] sm:$0xff]  ;;  %v10919_v46 = vld [vmem:[#allocation104_spill] sm:$0xff] }
 0xe85   :  { %7590 = vtanh.f32 %v9554_v47 }
 0xe8f   :  { %v7591_v57 = vpop.eup %7590 }
 0xe90   :  { %v4119_v58 = vmul.f32 %v7591_v57, %v7589_v51  ;;  %v10920_v51 = vld [vmem:[#allocation105_spill] sm:$0xff]  ;;  %v10921_v57 = vld [vmem:[#allocation106_spill] sm:$0xff] }
 0xe92   :  { %4184 = vmatprep.mubr.f32.mxu0 %v4119_v58  ;;  %4255 = vmatprep.mubr.f32.mxu1 %v4119_v58 }
 0xe93   :  { %4185 = vmatmul.mubr.f32.vlgmr.msra.gmra.mrb[14].mxu0 %v9481_v49  ;;  %4256 = vmatmul.mubr.f32.vlgmr.msra.gmra.mrb[14].mxu1 %v9481_v49 }
 0xe94   :  { %7076 = vmatpush1.bf16.msra.mxu0 %v10125_v53  ;;  %7140 = vmatpush1.bf16.msra.mxu1 %v10126_v54  ;;  %v10870_v53 = vld [vmem:[#allocation55_spill] sm:$0xff]  ;;  %v10871_v54 = vld [vmem:[#allocation56_spill] sm:$0xff] }
 0xe95   :  { %4326 = vmatprep.mubr.f32.mxu0 %v4119_v58  ;;  %4397 = vmatprep.mubr.f32.mxu1 %v4119_v58  ;;  %v10922_v58 = vld [vmem:[#allocation107_spill] sm:$0xff] }
 0xe96   :  { %7078 = vmatprep.subr.bf16.mxu0 %v10127_v12  ;;  %7142 = vmatprep.subr.bf16.mxu1 %v10128_v18  ;;  %v10873_v12 = vld [vmem:[#allocation58_spill] sm:$0xff]  ;;  %v10874_v18 = vld [vmem:[#allocation59_spill] sm:$0xff] }
 0xe98   :  { %7080 = vmatpush1.bf16.msra.mxu0 %v10249_v36  ;;  %7144 = vmatpush1.bf16.msra.mxu1 %v10373_v28  ;;  %v10875_v36 = vld [vmem:[#allocation60_spill] sm:$0xff]  ;;  %v10876_v28 = vld [vmem:[#allocation61_spill] sm:$0xff] }
 0xe99   :  { %7082 = vmatprep.subr.bf16.mxu0 %v10497_v27  ;;  %7146 = vmatprep.subr.bf16.mxu1 %v10621_v19  ;;  %v10877_v27 = vld [vmem:[#allocation62_spill] sm:$0xff]  ;;  %v10878_v19 = vld [vmem:[#allocation63_spill] sm:$0xff] }
 0xe9c   :  { %7084 = vmatpush1.bf16.msra.mxu0 %v10745_v10  ;;  %7148 = vmatpush1.bf16.msra.mxu1 %v10869_v15  ;;  %v10879_v10 = vld [vmem:[#allocation64_spill] sm:$0xff] }
 0xe9d   :  { %7086 = vmatprep.subr.bf16.mxu0 %v10870_v53  ;;  %7150 = vmatprep.subr.bf16.mxu1 %v10871_v54  ;;  %v10923_v15 = vld [vmem:[#allocation108_spill] sm:$0xff]  ;;  %v10924_v53 = vld [vmem:[#allocation109_spill] sm:$0xff]  ;;  %v10925_v54 = vld [vmem:[#allocation110_spill] sm:$0xff] }
 0xea0   :  { %7088 = vmatpush1.bf16.msra.mxu0 %v10872_v59  ;;  %7152 = vmatpush1.bf16.msra.mxu1 %v10873_v12  ;;  %v10926_v59 = vld [vmem:[#allocation111_spill] sm:$0xff]  ;;  %v10927_v12 = vld [vmem:[#allocation112_spill] sm:$0xff] }
 0xea1   :  { %7090 = vmatprep.subr.bf16.mxu0 %v10874_v18  ;;  %7154 = vmatprep.subr.bf16.mxu1 %v10875_v36  ;;  %v10928_v18 = vmov 0.0   ;;  %v10929_v36 = vld [vmem:[#allocation113_spill] sm:$0xff] }
 0xea4   :  { %7092 = vmatpush1.bf16.msra.mxu0 %v10876_v28  ;;  %7156 = vmatpush1.bf16.msra.mxu1 %v10877_v27  ;;  %v10930_v28 = vld [vmem:[#allocation114_spill] sm:$0xff]  ;;  %v10931_v27 = vld [vmem:[#allocation115_spill] sm:$0xff] }
 0xea5   :  { %7094 = vmatprep.subr.bf16.mxu0 %v10878_v19  ;;  %7158 = vmatprep.subr.bf16.mxu1 %v10879_v10  ;;  %v10932_v19 = vld [vmem:[#allocation116_spill] sm:$0xff]  ;;  %v10934_v10 = vld [vmem:[#allocation118_spill] sm:$0xff] }
 0xea8   :  { %7096 = vmatpush1.bf16.msra.mxu0 %v10880_v63  ;;  %7160 = vmatpush1.bf16.msra.mxu1 %v10881_v6  ;;  %v10935_v63 = vld [vmem:[#allocation119_spill] sm:$0xff]  ;;  %v10936_v6 = vld [vmem:[#allocation120_spill] sm:$0xff] }
 0xea9   :  { %7098 = vmatprep.subr.bf16.mxu0 %v10882_v7  ;;  %7162 = vmatprep.subr.bf16.mxu1 %v10883_v9  ;;  %v10937_v7 = vld [vmem:[#allocation121_spill] sm:$0xff]  ;;  %v10938_v9 = vld [vmem:[#allocation122_spill] sm:$0xff] }
 0xeac   :  { %7100 = vmatpush1.bf16.msra.mxu0 %v10884_v14  ;;  %7164 = vmatpush1.bf16.msra.mxu1 %v10885_v23  ;;  %v10939_v14 = vld [vmem:[#allocation123_spill] sm:$0xff]  ;;  %v10940_v23 = vld [vmem:[#allocation124_spill] sm:$0xff] }
 0xead   :  { %7102 = vmatprep.subr.bf16.mxu0 %v10886_v24  ;;  %7166 = vmatprep.subr.bf16.mxu1 %v10887_v26  ;;  %v10941_v24 = vld [vmem:[#allocation125_spill] sm:$0xff]  ;;  %v10942_v26 = vld [vmem:[#allocation126_spill] sm:$0xff] }
 0xeb0   :  { %7104 = vmatpush1.bf16.msra.mxu0 %v10888_v32  ;;  %7168 = vmatpush1.bf16.msra.mxu1 %v10889_v41  ;;  %v10943_v32 = vld [vmem:[#allocation127_spill] sm:$0xff]  ;;  %v10944_v41 = vld [vmem:[#allocation128_spill] sm:$0xff] }
 0xeb1   :  { %7106 = vmatprep.subr.bf16.mxu0 %v10890_v44  ;;  %7170 = vmatprep.subr.bf16.mxu1 %v10891_v45  ;;  %v10945_v44 = vld [vmem:[#allocation129_spill] sm:$0xff]  ;;  %v10946_v45 = vld [vmem:[#allocation130_spill] sm:$0xff] }
 0xeb4   :  { %7108 = vmatpush1.bf16.msra.mxu0 %v10892_v52  ;;  %7172 = vmatpush1.bf16.msra.mxu1 %v10893_v61  ;;  %v10947_v52 = vld [vmem:[#allocation131_spill] sm:$0xff]  ;;  %v10948_v61 = vld [vmem:[#allocation132_spill] sm:$0xff] }
 0xeb5   :  { %7110 = vmatprep.subr.bf16.mxu0 %v10894_v0  ;;  %7174 = vmatprep.subr.bf16.mxu1 %v10895_v2  ;;  %v10949_v0 = vld [vmem:[#allocation133_spill] sm:$0xff]  ;;  %v10950_v2 = vld [vmem:[#allocation134_spill] sm:$0xff] }
 0xeb8   :  { %7112 = vmatpush1.bf16.msra.mxu0 %v10896_v48  ;;  %7176 = vmatpush1.bf16.msra.mxu1 %v10897_v11  ;;  %v10951_v48 = vld [vmem:[#allocation135_spill] sm:$0xff]  ;;  %v10952_v11 = vld [vmem:[#allocation136_spill] sm:$0xff] }
 0xeb9   :  { %7114 = vmatprep.subr.bf16.mxu0 %v10898_v13  ;;  %7178 = vmatprep.subr.bf16.mxu1 %v10899_v4  ;;  %v10953_v13 = vld [vmem:[#allocation137_spill] sm:$0xff]  ;;  %v10954_v4 = vld [vmem:[#allocation138_spill] sm:$0xff] }
 0xebc   :  { %7116 = vmatpush1.bf16.msra.mxu0 %v10900_v5  ;;  %7180 = vmatpush1.bf16.msra.mxu1 %v10901_v55 }
 0xebd   :  { %7118 = vmatprep.subr.bf16.mxu0 %v10902_v60  ;;  %7182 = vmatprep.subr.bf16.mxu1 %v10903_v39  ;;  %v10955_v60 = vld [vmem:[#allocation139_spill] sm:$0xff] }
 0xec0   :  { %7120 = vmatpush1.bf16.msra.mxu0 %v10904_v22  ;;  %7184 = vmatpush1.bf16.msra.mxu1 %v10905_v1 }
 0xec1   :  { %7122 = vmatprep.subr.bf16.mxu0 %v10906_v33  ;;  %7186 = vmatprep.subr.bf16.mxu1 %v10907_v3 }
 0xec4   :  { %7124 = vmatpush1.bf16.msra.mxu0 %v10908_v8  ;;  %7188 = vmatpush1.bf16.msra.mxu1 %v10909_v50 }
 0xec5   :  { %7126 = vmatprep.subr.bf16.mxu0 %v10910_v16  ;;  %7190 = vmatprep.subr.bf16.mxu1 %v10911_v20 }
 0xec8   :  { %7128 = vmatpush1.bf16.msra.mxu0 %v10912_v21  ;;  %7192 = vmatpush1.bf16.msra.mxu1 %v10913_v25 }
 0xec9   :  { %7130 = vmatprep.subr.bf16.mxu0 %v10914_v29  ;;  %7194 = vmatprep.subr.bf16.mxu1 %v10915_v30 }
 0xecc   :  { %7132 = vmatpush1.bf16.msra.mxu0 %v10916_v34  ;;  %7196 = vmatpush1.bf16.msra.mxu1 %v10917_v38 }
 0xecd   :  { %7134 = vmatprep.subr.bf16.mxu0 %v10918_v42  ;;  %7198 = vmatprep.subr.bf16.mxu1 %v10919_v46 }
 0xed0   :  { %7136 = vmatpush1.bf16.msra.mxu0 %v10920_v51  ;;  %7200 = vmatpush1.bf16.msra.mxu1 %v10921_v57 }
 0xed1   :  { %7202 = vmatprep.subr.bf16.mxu0 %v10922_v58  ;;  %7234 = vmatprep.subr.bf16.mxu1 %v10923_v15 }
 0xed3   :  { %4327 = vmatmul.mubr.f32.vlgmr.msra.gmra.mrb[30].mxu0 %v9481_v49  ;;  %4398 = vmatmul.mubr.f32.vlgmr.msra.gmra.mrb[30].mxu1 %v9481_v49  ;;  %v10933_v49 = vld [vmem:[#allocation117_spill] sm:$0xff] }
 0xed4   :  { %7204 = vmatpush1.bf16.msra.mxu0 %v10924_v53  ;;  %7236 = vmatpush1.bf16.msra.mxu1 %v10925_v54 }
 0xed5   :  { %7206 = vmatprep.subr.bf16.mxu0 %v10926_v59  ;;  %7238 = vmatprep.subr.bf16.mxu1 %v10927_v12 }
 0xed6   :  { %4500 = vmatprep.mubr.f32.mxu0 %v10928_v18  ;;  %4571 = vmatprep.mubr.f32.mxu1 %v10928_v18 }
 0xed8   :  { %7208 = vmatpush1.bf16.msra.mxu0 %v10929_v36  ;;  %7240 = vmatpush1.bf16.msra.mxu1 %v10930_v28 }
 0xed9   :  { %7210 = vmatprep.subr.bf16.mxu0 %v10931_v27  ;;  %7242 = vmatprep.subr.bf16.mxu1 %v10932_v19 }
 0xedc   :  { %7212 = vmatpush1.bf16.msra.mxu0 %v10933_v49  ;;  %7244 = vmatpush1.bf16.msra.mxu1 %v10934_v10 }
 0xedd   :  { %7214 = vmatprep.subr.bf16.mxu0 %v10935_v63  ;;  %7246 = vmatprep.subr.bf16.mxu1 %v10936_v6 }
 0xee0   :  { %7216 = vmatpush1.bf16.msra.mxu0 %v10937_v7  ;;  %7248 = vmatpush1.bf16.msra.mxu1 %v10938_v9 }
 0xee1   :  { %7218 = vmatprep.subr.bf16.mxu0 %v10939_v14  ;;  %7250 = vmatprep.subr.bf16.mxu1 %v10940_v23 }
 0xee4   :  { %7220 = vmatpush1.bf16.msra.mxu0 %v10941_v24  ;;  %7252 = vmatpush1.bf16.msra.mxu1 %v10942_v26 }
 0xee5   :  { %7222 = vmatprep.subr.bf16.mxu0 %v10943_v32  ;;  %7254 = vmatprep.subr.bf16.mxu1 %v10944_v41  ;;  %v4702_v41 = vld [vmem:[%s9679_s6] ss:$0 sm:$0xff] }
 0xee8   :  { %7224 = vmatpush1.bf16.msra.mxu0 %v10945_v44  ;;  %7256 = vmatpush1.bf16.msra.mxu1 %v10946_v45 }
 0xee9   :  { %7226 = vmatprep.subr.bf16.mxu0 %v10947_v52  ;;  %7258 = vmatprep.subr.bf16.mxu1 %v10948_v61  ;;  %v4703_v52 = vld [vmem:[#allocation3] ss:$0 sm:$0xff] }
 0xeec   :  { %7228 = vmatpush1.bf16.msra.mxu0 %v10949_v0  ;;  %7260 = vmatpush1.bf16.msra.mxu1 %v10950_v2 }
 0xeed   :  { %7230 = vmatprep.subr.bf16.mxu0 %v10951_v48  ;;  %7262 = vmatprep.subr.bf16.mxu1 %v10952_v11 }
 0xef0   :  { %7232 = vmatpush1.bf16.msra.mxu0 %v10953_v13  ;;  %7264 = vmatpush1.bf16.msra.mxu1 %v10954_v4 }
 0xf66   :  { %v4186_v5 = vpop.f32.mrb[14].mxu0  ;;  %v4257_v55 = vpop.f32.mrb[14].mxu1 }
 0xf67   :  { %v7279_v39 = vadd.f32 %v4186_v5, %v10955_v60  ;;  %v4188_v22 = vpop.f32.mrb[15].mxu0  ;;  %v4259_v1 = vpop.f32.mrb[15].mxu1  ;;  %v7295_v20 = vadd.f32 %v4257_v55, %v8341_v56 }
 0xf68   :  { %v7280_v33 = vadd.f32 %v4188_v22, %v10218_v40  ;;  %v7296_v50 = vadd.f32 %v4259_v1, %v10219_v37 }
 0xf69   :  { %v4696_v3 = vmul.f32 -1.442695, %v7279_v39 }
 0xf6a   :  { %v4697_v8 = vmul.f32 -1.442695, %v7280_v33  ;;  %v4698_v16 = vmul.f32 -1.442695, %v7296_v50 }
 0xf6b   :  { %7592 = vpow2.f32 %v4696_v3 }
 0xf6c   :  { %7594 = vpow2.f32 %v4697_v8 }
 0xf6d   :  { %7596 = vpow2.f32 %v4698_v16 }
 0xf6e   :  { %7598 = vtanh.f32 %v7295_v20 }
 0xf75   :  { %v7593_v21 = vpop.eup %7592 }
 0xf76   :  { %v7595_v25 = vpop.eup %7594  ;;  %v4415_v29 = vadd.f32 1.0, %v7593_v21 }
 0xf77   :  { %v4421_v30 = vadd.f32 1.0, %v7595_v25  ;;  %v7597_v34 = vpop.eup %7596 }
 0xf78   :  { %7600 = vrcp.f32 %v4415_v29  ;;  %v7599_v38 = vpop.eup %7598  ;;  %v4428_v51 = vadd.f32 1.0, %v7597_v34 }
 0xf79   :  { %7602 = vrcp.f32 %v4421_v30 }
 0xf7a   :  { %7604 = vrcp.f32 %v4428_v51 }
 0xf82   :  { %v7601_v40 = vpop.eup %7600 }
 0xf83   :  { %v7603_v42 = vpop.eup %7602  ;;  %v4432_v46 = vmul.f32 %v7601_v40, %v7599_v38 }
 0xf84   :  { %v4431_v57 = vmul.f32 %v7603_v42, %v9478_v31  ;;  %v7605_v56 = vpop.eup %7604 }
 0xf86   :  { %v4433_v37 = vadd.f32 %v4432_v46, %v4431_v57 }
 0xf88   :  { %7606 = vtanh.f32 %v4433_v37 }
 0xf92   :  { %v7607_v58 = vpop.eup %7606 }
 0xf93   :  { %v4435_v15 = vmul.f32 %v7607_v58, %v7605_v56 }
 0xf95   :  { %4501 = vmatmul.mubr.f32.vlgmr.msra.gmra.mrb[30].mxu0 %v4435_v15  ;;  %4572 = vmatmul.mubr.f32.vlgmr.msra.gmra.mrb[30].mxu1 %v4435_v15 }
0x1068   :  { %v4502_v53 = vpop.f32.mrb[30].mxu0  ;;  %v4573_v54 = vpop.f32.mrb[30].mxu1 }
0x1069   :  { %v4578_v59 = vadd.f32 %v4502_v53, %v10868_v35  ;;  %v4504_v12 = vpop.f32.mrb[31].mxu0  ;;  %v4575_v18 = vpop.f32.mrb[31].mxu1  ;;  %v4580_v49 = vadd.f32 %v4573_v54, %v8435_v62 }
0x106a   :  { %v4579_v36 = vadd.f32 %v4504_v12, %v8424_v43  ;;  %v4581_v31 = vadd.f32 %v4575_v18, %v10248_v17 }
0x106b   :  { %v4699_v28 = vmul.f32 -1.442695, %v4578_v59 }
0x106c   :  { %v4700_v27 = vmul.f32 -1.442695, %v4579_v36  ;;  %v4701_v19 = vmul.f32 -1.442695, %v4581_v31 }
0x106d   :  { %7608 = vpow2.f32 %v4699_v28 }
0x106e   :  { %7610 = vpow2.f32 %v4700_v27 }
0x106f   :  { %7612 = vpow2.f32 %v4701_v19 }
0x1070   :  { %7614 = vtanh.f32 %v4580_v49 }
0x1077   :  { %v7609_v10 = vpop.eup %7608 }
0x1078   :  { %v7611_v63 = vpop.eup %7610  ;;  %v4585_v6 = vadd.f32 1.0, %v7609_v10 }
0x1079   :  { %v4591_v7 = vadd.f32 1.0, %v7611_v63  ;;  %v7613_v35 = vpop.eup %7612 }
0x107a   :  { %7616 = vrcp.f32 %v4585_v6  ;;  %v7615_v9 = vpop.eup %7614  ;;  %v4598_v24 = vadd.f32 1.0, %v7613_v35 }
0x107b   :  { %7618 = vrcp.f32 %v4591_v7 }
0x107c   :  { %7620 = vrcp.f32 %v4598_v24 }
0x1084   :  { %v7617_v43 = vpop.eup %7616 }
0x1085   :  { %v7619_v14 = vpop.eup %7618  ;;  %v4602_v23 = vmul.f32 %v7617_v43, %v7615_v9 }
0x1086   :  { %v4601_v26 = vmul.f32 %v7619_v14, %v9554_v47  ;;  %v7621_v62 = vpop.eup %7620 }
0x1088   :  { %v4603_v17 = vadd.f32 %v4602_v23, %v4601_v26 }
0x108a   :  { %7622 = vtanh.f32 %v4603_v17 }
0x1094   :  { %v7623_v32 = vpop.eup %7622 }
0x1095   :  { %v4605_v44 = vmul.f32 %v7623_v32, %v7621_v62 }
0x1097   :  { %v4613_v45 = vmul.f32 %v4702_v41, %v4605_v44 }
0x1099   :  { %4614 = vadd.xlane.f32.xlu0 %v4613_v45 }
0x1126   :  { %v4615_v61 = vpop.xlane.xlu0 %4614 }
0x1127   :  { %v4623_v0 = vadd.f32 %v4703_v52, %v4615_v61 }
0x1129   :  { %v4704_v2 = vmul.f32 -1.442695, %v4623_v0 }
0x112b   :  { %7624 = vpow2.f32 %v4704_v2 }
0x1135   :  { %v7625_v48 = vpop.eup %7624 }
0x1136   :  { %v4627_v11 = vadd.f32 1.0, %v7625_v48 }
0x1138   :  { %7626 = vrcp.f32 %v4627_v11 }
0x1142   :  { %v7627_v47 = vpop.eup %7626 }
0x1143   :  { %4631 = vst.msk [vmem:[%s9681_s8] sm:$0xff] %vm4630_vm1, %v7627_v47 }
0x1144   :  { %4636 = vsyncpa [#allocation5], 1 }
0x1145   :  { %4637 = vsyncpa [#allocation7], 1 }

</bundles_post_ra>
